<compile_context>
chip_gen: v5e
topology: v5e:2x2
jax: 0.10.0
libtpu: 0.0.40
codegen_flags: <defaults>
</compile_context>

<pallas_src>
import functools
import math

import jax
import jax.numpy as jnp
from jax.experimental import pallas as pl
from jax.experimental.pallas import tpu as pltpu

LN_EPS = 1e-5
D_FF = 16  # dim_feedforward in the PyTorch module

# (B_TILE*F, B_TILE*F) square-weight stack order (out-projections, cross-attn Q).
WSQ_ORDER = ['e_wo', 'd_wo', 'c_wq', 'c_wo']
WSQ_IDX = {n: i for i, n in enumerate(WSQ_ORDER)}

# (B_TILE*F,) vector stack order (biases, LayerNorm gammas/betas).
VBF_ORDER = ['e_bo', 'e_b2', 'e_g1', 'e_be1', 'e_g2', 'e_be2',
             'd_bo', 'c_bq', 'c_bo', 'd_b2',
             'd_g1', 'd_be1', 'd_g2', 'd_be2', 'd_g3', 'd_be3']
VBF_IDX = {n: i for i, n in enumerate(VBF_ORDER)}

# Attention square weights in the raw (per-feature) parameter dict.
_ATTN_SQ = ['e_wq', 'e_wk', 'e_wv', 'e_wo',
            'd_wq', 'd_wk', 'd_wv', 'd_wo',
            'c_wq', 'c_wk', 'c_wv', 'c_wo']


def tranad_basic_kernel(src_ref, tgt_ref, pe_ref, wqkv_ref, bqkv_ref,
                        wkv_ref, bkv_ref, wsq_ref, mln_ref, wup_ref, wdn_ref,
                        vbf_ref, vff_ref, out_ref, *, n_feats):
    f32 = jnp.float32
    bf = src_ref.shape[1]                          # B_TILE * F (lane-dense width)
    lt = tgt_ref.shape[0]                          # static tgt length

    def W(name):                                   # (bf, bf) block-diag weight tile
        return wsq_ref[WSQ_IDX[name]]

    def vec(name):                                 # (1, bf) tiled bias / ln param
        i = VBF_IDX[name]
        return vbf_ref[i:i + 1, :]

    m_ln = mln_ref[...]                            # (2*bf, 2*bf) fused-stats averaging

    def layernorm(x, gname, bname):
        # ONE MXU op yields both E[x] and E[x^2]; the [x | x*x] concat is along the
        # lane axis (offset bf, a multiple of 128) so it is layout-free.
        xs = jnp.concatenate([x, x * x], axis=1)                      # (L, 2*bf)
        stats = jnp.dot(xs, m_ln, preferred_element_type=f32)         # (L, 2*bf)
        mu = stats[:, :bf]
        var = stats[:, bf:] - mu * mu
        return (x - mu) * jax.lax.rsqrt(var + LN_EPS) * vec(gname) + vec(bname)

    def attn(q, k, v):
        # nhead == d_model  =>  head_dim == 1, scale == 1: every lane column is an
        # independent (batch, head) pair.  Keys sit on the leading (untiled) axis so
        # the softmax reductions are plain VPU add/max chains over (Lq, bf) tiles,
        # and the normalization is reassociated: reduce first, ONE reciprocal after.
        s = k[:, None, :] * q[None, :, :]                      # (Lk, Lq, bf)
        m = jnp.max(s, axis=0, keepdims=True)
        p = jnp.exp(s - m)
        num = jnp.sum(p * v[:, None, :], axis=0)               # (Lq, bf)
        den = jnp.sum(p, axis=0)                               # (Lq, bf)
        return num * pl.reciprocal(den, approx=True)

    def out_proj(a, wname, bname):
        return jnp.dot(a, W(wname), preferred_element_type=f32) + vec(bname)

    def ffn(x, idx, bname):
        h = jnp.maximum(jnp.dot(x, wup_ref[idx], preferred_element_type=f32)
                        + vff_ref[idx:idx + 1, :], 0.0)
        return jnp.dot(h, wdn_ref[idx], preferred_element_type=f32) + vec(bname)

    # src * sqrt(n_feats) + positional encoding (pos-encoder dropout = identity).
    x = src_ref[...] * f32(math.sqrt(n_feats)) + pe_ref[...]

    # ---- TransformerEncoder: 1 post-norm layer, relu FFN, no final norm ----
    qkv = jnp.dot(x, wqkv_ref[0], preferred_element_type=f32) + bqkv_ref[0:1, :]
    a = attn(qkv[:, :bf], qkv[:, bf:2 * bf], qkv[:, 2 * bf:])
    x = layernorm(x + out_proj(a, 'e_wo', 'e_bo'), 'e_g1', 'e_be1')
    memory = layernorm(x + ffn(x, 0, 'e_b2'), 'e_g2', 'e_be2')

    # ---- TransformerDecoder: 1 post-norm layer ----
    y = tgt_ref[...]
    if lt == 1:
        # Static specialization (TranAD always feeds a length-1 tgt): softmax over a
        # single key is the identity, so self-attention == V projection of tgt.
        # Only the V third of the fused QKV weight is read (static, aligned slice).
        a = (jnp.dot(y, wqkv_ref[1, :, 2 * bf:], preferred_element_type=f32)
             + bqkv_ref[1:2, 2 * bf:])
    else:
        qkv = jnp.dot(y, wqkv_ref[1], preferred_element_type=f32) + bqkv_ref[1:2, :]
        a = attn(qkv[:, :bf], qkv[:, bf:2 * bf], qkv[:, 2 * bf:])
    y = layernorm(y + out_proj(a, 'd_wo', 'd_bo'), 'd_g1', 'd_be1')

    # cross-attention: Q from the tgt stream, fused K|V from encoder memory
    q = jnp.dot(y, W('c_wq'), preferred_element_type=f32) + vec('c_bq')
    kv = jnp.dot(memory, wkv_ref[...], preferred_element_type=f32) + bkv_ref[...]
    a = attn(q, kv[:, :bf], kv[:, bf:])
    y = layernorm(y + out_proj(a, 'c_wo', 'c_bo'), 'd_g2', 'd_be2')

    y = layernorm(y + ffn(y, 1, 'd_b2'), 'd_g3', 'd_be3')

    # ---- self.fcn = nn.Sigmoid() ----
    out_ref[...] = 1.0 / (1.0 + jnp.exp(-y))


def _positional_encoding(length, d_model):
    # TranAD's dlutils PositionalEncoding: pe[l, f] = sin(l * w_f) + cos(l * w_f),
    # w_f = exp(-f * ln(10000) / d_model)  (NOT the standard interleaved sin/cos).
    pos = jnp.arange(length, dtype=jnp.float32)[:, None]
    div = jnp.exp(jnp.arange(d_model, dtype=jnp.float32)
                  * (-math.log(10000.0) / d_model))
    ang = pos * div[None, :]
    return jnp.sin(ang) + jnp.cos(ang)             # (length, d_model)


def pack_params(params, feats, n_window, b_tile, d_ff=D_FF):
    """Pack weights ONCE (hoisted out of the per-forward path).

    All packed tensors have a constant footprint set by `b_tile` (independent of the
    real batch): shared per-feature weights are expanded to block-diagonal
    kron(I_b_tile, W^T) tiles so the kernel stays in the lane-dense (L, b_tile*F)
    layout; Q/K/V (and cross K/V) weights are fused along the output dim.  Weights
    stay f32 to hold the 2e-3 accuracy budget vs. the f32 reference.
    """
    f32 = jnp.float32
    eye = jnp.eye(b_tile, dtype=f32)
    bd = lambda w: jnp.kron(eye, w.T.astype(f32))   # torch (out,in) -> (Bt*in, Bt*out)
    tv = lambda v: jnp.tile(v.astype(f32), b_tile)

    pe = jnp.tile(_positional_encoding(n_window, feats), (1, b_tile))   # (L, Bt*F)

    w_qkv = jnp.stack([
        jnp.concatenate([bd(params['e_wq']), bd(params['e_wk']), bd(params['e_wv'])], axis=1),
        jnp.concatenate([bd(params['d_wq']), bd(params['d_wk']), bd(params['d_wv'])], axis=1),
    ])                                                                  # (2, BtF, 3*BtF)
    b_qkv = jnp.stack([
        jnp.concatenate([tv(params['e_bq']), tv(params['e_bk']), tv(params['e_bv'])]),
        jnp.concatenate([tv(params['d_bq']), tv(params['d_bk']), tv(params['d_bv'])]),
    ])                                                                  # (2, 3*BtF)
    w_kv = jnp.concatenate([bd(params['c_wk']), bd(params['c_wv'])], axis=1)   # (BtF, 2*BtF)
    b_kv = jnp.concatenate([tv(params['c_bk']), tv(params['c_bv'])])[None, :]  # (1, 2*BtF)

    w_sq = jnp.stack([bd(params[n]) for n in WSQ_ORDER])                # (4, BtF, BtF)
    # Fused LayerNorm-stats matrix: block-diag per-F-chunk averaging applied to the
    # lane-concatenated [x | x*x] slab -> one matmul yields E[x] and E[x^2].
    m_ln = jnp.kron(jnp.eye(2 * b_tile, dtype=f32),
                    jnp.full((feats, feats), 1.0 / feats, f32))         # (2BtF, 2BtF)

    w_up = jnp.stack([bd(params['e_w1']), bd(params['d_w1'])])          # (2, BtF, Bt*D_FF)
    w_dn = jnp.stack([bd(params['e_w2']), bd(params['d_w2'])])          # (2, Bt*D_FF, BtF)
    v_bf = jnp.stack([tv(params[n]) for n in VBF_ORDER])                # (16, BtF)
    v_ff = jnp.stack([tv(params['e_b1']), tv(params['d_b1'])])          # (2, Bt*D_FF)
    return (pe, w_qkv, b_qkv, w_kv, b_kv, w_sq, m_ln, w_up, w_dn, v_bf, v_ff)


def pick_b_tile(batch, feats):
    """Generation-matched lane width.

    256 lanes (B_TILE=32 @ F=8) fills v6e's single-TC 256x256 MXU and drops a grid
    step; v5e (128x128 MXU) and v7x (2 TensorCores -> keep >= 2 'parallel' grid steps
    at B=32) stay at 128 lanes (B_TILE=16).  Falls back safely if the device kind is
    unknown.
    """
    b_tile = 16
    try:
        kind = jax.devices()[0].device_kind.lower()
    except Exception:
        kind = ""
    if "v6" in kind and batch % 32 == 0:
        b_tile = 32
    while b_tile > 1 and batch % b_tile:
        b_tile //= 2
    return b_tile


def tranad_basic_forward(src, tgt, packed, b_tile):
    """src: (L, B, F) window; tgt: (Lt, B, F).  Returns sigmoid(decoder output)."""
    L, B, F = src.shape
    Lt, Bt_, Ft = tgt.shape
    assert (Bt_, Ft) == (B, F)
    # TODO(synk): the `src.permute(1,0,2) if src.size(0)==1` branch (plotting-only
    # path) is not implemented; TranAD_Basic always calls with L == n_window > 1.
    assert L > 1
    assert B % b_tile == 0
    bf = b_tile * F
    n_tiles = B // b_tile

    src2 = src.reshape(L, B * F).astype(jnp.float32)
    tgt2 = tgt.reshape(Lt, B * F).astype(jnp.float32)

    def full_spec(arr):
        nd = arr.ndim
        return pl.BlockSpec(arr.shape, lambda b, _nd=nd: (0,) * _nd)

    in_specs = ([pl.BlockSpec((L, bf), lambda b: (0, b)),
                 pl.BlockSpec((Lt, bf), lambda b: (0, b))]
                + [full_spec(a) for a in packed])
    out_spec = pl.BlockSpec((Lt, bf), lambda b: (0, b))

    kernel = functools.partial(tranad_basic_kernel, n_feats=F)
    out2 = pl.pallas_call(
        kernel,
        grid=(n_tiles,),
        in_specs=in_specs,
        out_specs=out_spec,
        out_shape=jax.ShapeDtypeStruct((Lt, B * F), jnp.float32),
        compiler_params=pltpu.CompilerParams(
            dimension_semantics=("parallel",)),
    )(src2, tgt2, *packed)
    return out2.reshape(Lt, B, F)


def init_params(key, feats, d_ff=D_FF):
    """Deterministic synthetic parameters mirroring the PyTorch module shapes
    (attention in_proj split into q/k/v pieces; Linear weights are (out, in))."""
    wshapes = {n: (feats, feats) for n in _ATTN_SQ}
    wshapes.update({'e_w1': (d_ff, feats), 'e_w2': (feats, d_ff),
                    'd_w1': (d_ff, feats), 'd_w2': (feats, d_ff)})
    bshapes = {n: (feats,) for n in
               ['e_bq', 'e_bk', 'e_bv', 'e_bo', 'e_b2',
                'd_bq', 'd_bk', 'd_bv', 'd_bo',
                'c_bq', 'c_bk', 'c_bv', 'c_bo', 'd_b2']}
    bshapes.update({'e_b1': (d_ff,), 'd_b1': (d_ff,)})
    gammas = ['e_g1', 'e_g2', 'd_g1', 'd_g2', 'd_g3']
    betas = ['e_be1', 'e_be2', 'd_be1', 'd_be2', 'd_be3']

    total = len(wshapes) + len(bshapes) + len(gammas) + len(betas)
    keys = iter(jax.random.split(key, total))
    params = {}
    for n, s in wshapes.items():
        params[n] = 0.3 * jax.random.normal(next(keys), s, jnp.float32)
    for n, s in bshapes.items():
        params[n] = 0.05 * jax.random.normal(next(keys), s, jnp.float32)
    for n in gammas:
        params[n] = 1.0 + 0.1 * jax.random.normal(next(keys), (feats,), jnp.float32)
    for n in betas:
        params[n] = 0.05 * jax.random.normal(next(keys), (feats,), jnp.float32)
    return params


def reference_forward(src, tgt, params):
    """Pure-JAX reference in the native (L, B, F) layout (eval-mode dropout)."""
    L, B, F = src.shape
    pe = _positional_encoding(L, F)
    x = src * math.sqrt(F) + pe[:, None, :]

    def mha(q_in, kv_in, pfx):
        q = jnp.einsum('lbf,gf->lbg', q_in, params[pfx + 'wq']) + params[pfx + 'bq']
        k = jnp.einsum('lbf,gf->lbg', kv_in, params[pfx + 'wk']) + params[pfx + 'bk']
        v = jnp.einsum('lbf,gf->lbg', kv_in, params[pfx + 'wv']) + params[pfx + 'bv']
        s = jnp.einsum('ibh,jbh->bhij', q, k)          # head_dim = 1, scale = 1
        p = jax.nn.softmax(s, axis=-1)
        o = jnp.einsum('bhij,jbh->ibh', p, v)
        return jnp.einsum('ibh,gh->ibg', o, params[pfx + 'wo']) + params[pfx + 'bo']

    def ln(z, g, b):
        mu = z.mean(-1, keepdims=True)
        var = ((z - mu) ** 2).mean(-1, keepdims=True)
        return (z - mu) / jnp.sqrt(var + LN_EPS) * params[g] + params[b]

    def ff(z, w1, b1, w2, b2):
        h = jax.nn.relu(jnp.einsum('lbf,of->lbo', z, params[w1]) + params[b1])
        return jnp.einsum('lbo,fo->lbf', h, params[w2]) + params[b2]

    x = ln(x + mha(x, x, 'e_'), 'e_g1', 'e_be1')
    memory = ln(x + ff(x, 'e_w1', 'e_b1', 'e_w2', 'e_b2'), 'e_g2', 'e_be2')

    y = tgt
    y = ln(y + mha(y, y, 'd_'), 'd_g1', 'd_be1')
    y = ln(y + mha(y, memory, 'c_'), 'd_g2', 'd_be2')
    y = ln(y + ff(y, 'd_w1', 'd_b1', 'd_w2', 'd_b2'), 'd_g3', 'd_be3')
    return jax.nn.sigmoid(y)


if __name__ == "__main__":
    FEATS = 8        # d_model = nhead = feats  ->  head_dim = 1
    N_WINDOW = 10    # TranAD_Basic.n_window
    BATCH = 32
    L_TGT = 1        # TranAD feeds the last window element as tgt: (1, B, feats)

    B_TILE = pick_b_tile(BATCH, FEATS)   # 16 (128 lanes) on v5e/v7x, 32 on v6e

    key = jax.random.PRNGKey(0)
    kp, ks, kt = jax.random.split(key, 3)
    params = init_params(kp, FEATS)
    src = jax.random.normal(ks, (N_WINDOW, BATCH, FEATS), jnp.float32)
    tgt = jax.random.normal(kt, (L_TGT, BATCH, FEATS), jnp.float32)

    # Pack weights once (hoisted out of the per-forward path).
    packed = pack_params(params, FEATS, N_WINDOW, B_TILE)

    fwd = jax.jit(tranad_basic_forward, static_argnums=(3,))
    out = jax.block_until_ready(fwd(src, tgt, packed, B_TILE))

    with jax.default_matmul_precision('highest'):
        ref = jax.block_until_ready(reference_forward(src, tgt, params))

    assert out.shape == (L_TGT, BATCH, FEATS), out.shape
    assert bool(jnp.all(jnp.isfinite(out)))
    max_err = float(jnp.max(jnp.abs(out - ref)))
    assert max_err < 2e-3, f"kernel/reference mismatch: {max_err}"
    print("KERNEL_OK")
</pallas_src>

<mosaic_0001>
module attributes {stable_mosaic.version = 11 : i64} {
  func.func @tranad_basic_kernel(%arg0: i32, %arg1: memref<10x128xf32, #tpu.memory_space<vmem>>, %arg2: memref<1x128xf32, #tpu.memory_space<vmem>>, %arg3: memref<10x128xf32, #tpu.memory_space<vmem>>, %arg4: memref<2x128x384xf32, #tpu.memory_space<vmem>>, %arg5: memref<2x384xf32, #tpu.memory_space<vmem>>, %arg6: memref<128x256xf32, #tpu.memory_space<vmem>>, %arg7: memref<1x256xf32, #tpu.memory_space<vmem>>, %arg8: memref<4x128x128xf32, #tpu.memory_space<vmem>>, %arg9: memref<256x256xf32, #tpu.memory_space<vmem>>, %arg10: memref<2x128x256xf32, #tpu.memory_space<vmem>>, %arg11: memref<2x256x128xf32, #tpu.memory_space<vmem>>, %arg12: memref<16x128xf32, #tpu.memory_space<vmem>>, %arg13: memref<2x256xf32, #tpu.memory_space<vmem>>, %arg14: memref<1x128xf32, #tpu.memory_space<vmem>>) attributes {dimension_semantics = [#tpu.dimension_semantics<parallel>], iteration_bounds = array<i64: 2>, scalar_prefetch = 0 : i64, scratch_operands = 0 : i64, tpu.core_type = #tpu.core_type<tc>, window_params = [{transform_indices = @transform_0, window_bounds = array<i64: 10, 128>}, {transform_indices = @transform_1, window_bounds = array<i64: 1, 128>}, {pipeline_mode = #tpu.pipeline_mode<synchronous>, transform_indices = @transform_2, window_bounds = array<i64: 10, 128>}, {pipeline_mode = #tpu.pipeline_mode<synchronous>, transform_indices = @transform_3, window_bounds = array<i64: 2, 128, 384>}, {pipeline_mode = #tpu.pipeline_mode<synchronous>, transform_indices = @transform_4, window_bounds = array<i64: 2, 384>}, {pipeline_mode = #tpu.pipeline_mode<synchronous>, transform_indices = @transform_5, window_bounds = array<i64: 128, 256>}, {pipeline_mode = #tpu.pipeline_mode<synchronous>, transform_indices = @transform_6, window_bounds = array<i64: 1, 256>}, {pipeline_mode = #tpu.pipeline_mode<synchronous>, transform_indices = @transform_7, window_bounds = array<i64: 4, 128, 128>}, {pipeline_mode = #tpu.pipeline_mode<synchronous>, transform_indices = @transform_8, window_bounds = array<i64: 256, 256>}, {pipeline_mode = #tpu.pipeline_mode<synchronous>, transform_indices = @transform_9, window_bounds = array<i64: 2, 128, 256>}, {pipeline_mode = #tpu.pipeline_mode<synchronous>, transform_indices = @transform_10, window_bounds = array<i64: 2, 256, 128>}, {pipeline_mode = #tpu.pipeline_mode<synchronous>, transform_indices = @transform_11, window_bounds = array<i64: 16, 128>}, {pipeline_mode = #tpu.pipeline_mode<synchronous>, transform_indices = @transform_12, window_bounds = array<i64: 2, 256>}, {transform_indices = @transform_13, window_bounds = array<i64: 1, 128>}]} {
    %c0 = arith.constant 0 : index
    %c0_0 = arith.constant 0 : index
    %0 = vector.load %arg9[%c0, %c0_0] : memref<256x256xf32, #tpu.memory_space<vmem>>, vector<256x256xf32>
    %c0_1 = arith.constant 0 : index
    %c0_2 = arith.constant 0 : index
    %1 = vector.load %arg1[%c0_1, %c0_2] : memref<10x128xf32, #tpu.memory_space<vmem>>, vector<10x128xf32>
    %cst = arith.constant 2.82842708 : f32
    %2 = vector.broadcast %cst : f32 to vector<10x128xf32>
    %3 = arith.mulf %1, %2 : vector<10x128xf32>
    %c0_3 = arith.constant 0 : index
    %c0_4 = arith.constant 0 : index
    %4 = vector.load %arg3[%c0_3, %c0_4] : memref<10x128xf32, #tpu.memory_space<vmem>>, vector<10x128xf32>
    %5 = arith.addf %3, %4 : vector<10x128xf32>
    %c0_5 = arith.constant 0 : index
    %c0_6 = arith.constant 0 : index
    %c0_7 = arith.constant 0 : index
    %6 = vector.load %arg4[%c0_5, %c0_6, %c0_7] : memref<2x128x384xf32, #tpu.memory_space<vmem>>, vector<1x128x384xf32>
    %7 = vector.shape_cast %6 : vector<1x128x384xf32> to vector<128x384xf32>
    %cst_8 = arith.constant dense<0.000000e+00> : vector<10x384xf32>
    %8 = tpu.matmul %5, %7, %cst_8 {dimension_numbers = #tpu.dot_dimension_numbers<[1], [0], [0], [1], [0, 0, 1, 1], [], []>} : vector<10x128xf32>, vector<128x384xf32>, vector<10x384xf32> -> vector<10x384xf32>
    %c0_9 = arith.constant 0 : index
    %c0_10 = arith.constant 0 : index
    %9 = vector.load %arg5[%c0_9, %c0_10] : memref<2x384xf32, #tpu.memory_space<vmem>>, vector<1x384xf32>
    %10 = vector.broadcast %9 : vector<1x384xf32> to vector<10x384xf32>
    %11 = arith.addf %8, %10 : vector<10x384xf32>
    %12 = vector.extract_strided_slice %11 {offsets = [0, 0], sizes = [10, 128], strides = [1, 1]} : vector<10x384xf32> to vector<10x128xf32>
    %13 = vector.extract_strided_slice %11 {offsets = [0, 128], sizes = [10, 128], strides = [1, 1]} : vector<10x384xf32> to vector<10x128xf32>
    %14 = vector.extract_strided_slice %11 {offsets = [0, 256], sizes = [10, 128], strides = [1, 1]} : vector<10x384xf32> to vector<10x128xf32>
    %15 = vector.shape_cast %13 : vector<10x128xf32> to vector<10x1x128xf32>
    %16 = vector.shape_cast %12 : vector<10x128xf32> to vector<1x10x128xf32>
    %17 = vector.broadcast %15 : vector<10x1x128xf32> to vector<10x10x128xf32>
    %18 = vector.broadcast %16 : vector<1x10x128xf32> to vector<10x10x128xf32>
    %19 = arith.mulf %17, %18 : vector<10x10x128xf32>
    %cst_11 = arith.constant dense<0xFF800000> : vector<10x128xf32>
    %20 = vector.multi_reduction <maximumf>, %19, %cst_11 [0] : vector<10x10x128xf32> to vector<10x128xf32>
    %21 = vector.shape_cast %20 : vector<10x128xf32> to vector<1x10x128xf32>
    %22 = vector.broadcast %21 : vector<1x10x128xf32> to vector<10x10x128xf32>
    %23 = arith.subf %19, %22 : vector<10x10x128xf32>
    %24 = math.exp %23 : vector<10x10x128xf32>
    %25 = vector.shape_cast %14 : vector<10x128xf32> to vector<10x1x128xf32>
    %26 = vector.broadcast %25 : vector<10x1x128xf32> to vector<10x10x128xf32>
    %27 = arith.mulf %24, %26 : vector<10x10x128xf32>
    %cst_12 = arith.constant dense<0.000000e+00> : vector<10x128xf32>
    %28 = vector.multi_reduction <add>, %27, %cst_12 [0] : vector<10x10x128xf32> to vector<10x128xf32>
    %cst_13 = arith.constant dense<0.000000e+00> : vector<10x128xf32>
    %29 = vector.multi_reduction <add>, %24, %cst_13 [0] : vector<10x10x128xf32> to vector<10x128xf32>
    %30 = tpu.reciprocal %29 {approx = true} : vector<10x128xf32> -> vector<10x128xf32>
    %31 = arith.mulf %28, %30 : vector<10x128xf32>
    %c0_14 = arith.constant 0 : index
    %c0_15 = arith.constant 0 : index
    %c0_16 = arith.constant 0 : index
    %32 = vector.load %arg8[%c0_14, %c0_15, %c0_16] : memref<4x128x128xf32, #tpu.memory_space<vmem>>, vector<1x128x128xf32>
    %33 = vector.shape_cast %32 : vector<1x128x128xf32> to vector<128x128xf32>
    %cst_17 = arith.constant dense<0.000000e+00> : vector<10x128xf32>
    %34 = tpu.matmul %31, %33, %cst_17 {dimension_numbers = #tpu.dot_dimension_numbers<[1], [0], [0], [1], [0, 0, 1, 1], [], []>} : vector<10x128xf32>, vector<128x128xf32>, vector<10x128xf32> -> vector<10x128xf32>
    %c0_18 = arith.constant 0 : index
    %c0_19 = arith.constant 0 : index
    %35 = vector.load %arg12[%c0_18, %c0_19] : memref<16x128xf32, #tpu.memory_space<vmem>>, vector<1x128xf32>
    %36 = vector.broadcast %35 : vector<1x128xf32> to vector<10x128xf32>
    %37 = arith.addf %34, %36 : vector<10x128xf32>
    %38 = arith.addf %5, %37 : vector<10x128xf32>
    %39 = arith.mulf %38, %38 : vector<10x128xf32>
    %40 = tpu.concatenate %38, %39 in 1 : vector<10x128xf32>, vector<10x128xf32> -> vector<10x256xf32>
    %cst_20 = arith.constant dense<0.000000e+00> : vector<10x256xf32>
    %41 = tpu.matmul %40, %0, %cst_20 {dimension_numbers = #tpu.dot_dimension_numbers<[1], [0], [0], [1], [0, 0, 1, 1], [], []>} : vector<10x256xf32>, vector<256x256xf32>, vector<10x256xf32> -> vector<10x256xf32>
    %42 = vector.extract_strided_slice %41 {offsets = [0, 0], sizes = [10, 128], strides = [1, 1]} : vector<10x256xf32> to vector<10x128xf32>
    %43 = vector.extract_strided_slice %41 {offsets = [0, 128], sizes = [10, 128], strides = [1, 1]} : vector<10x256xf32> to vector<10x128xf32>
    %44 = arith.mulf %42, %42 : vector<10x128xf32>
    %45 = arith.subf %43, %44 : vector<10x128xf32>
    %46 = arith.subf %38, %42 : vector<10x128xf32>
    %cst_21 = arith.constant 9.99999974E-6 : f32
    %47 = vector.broadcast %cst_21 : f32 to vector<10x128xf32>
    %48 = arith.addf %45, %47 : vector<10x128xf32>
    %49 = math.rsqrt %48 : vector<10x128xf32>
    %50 = arith.mulf %46, %49 : vector<10x128xf32>
    %c2 = arith.constant 2 : index
    %c0_22 = arith.constant 0 : index
    %51 = vector.load %arg12[%c2, %c0_22] : memref<16x128xf32, #tpu.memory_space<vmem>>, vector<1x128xf32>
    %52 = vector.broadcast %51 : vector<1x128xf32> to vector<10x128xf32>
    %53 = arith.mulf %50, %52 : vector<10x128xf32>
    %c3 = arith.constant 3 : index
    %c0_23 = arith.constant 0 : index
    %54 = vector.load %arg12[%c3, %c0_23] : memref<16x128xf32, #tpu.memory_space<vmem>>, vector<1x128xf32>
    %55 = vector.broadcast %54 : vector<1x128xf32> to vector<10x128xf32>
    %56 = arith.addf %53, %55 : vector<10x128xf32>
    %c0_24 = arith.constant 0 : index
    %c0_25 = arith.constant 0 : index
    %c0_26 = arith.constant 0 : index
    %57 = vector.load %arg10[%c0_24, %c0_25, %c0_26] : memref<2x128x256xf32, #tpu.memory_space<vmem>>, vector<1x128x256xf32>
    %58 = vector.shape_cast %57 : vector<1x128x256xf32> to vector<128x256xf32>
    %cst_27 = arith.constant dense<0.000000e+00> : vector<10x256xf32>
    %59 = tpu.matmul %56, %58, %cst_27 {dimension_numbers = #tpu.dot_dimension_numbers<[1], [0], [0], [1], [0, 0, 1, 1], [], []>} : vector<10x128xf32>, vector<128x256xf32>, vector<10x256xf32> -> vector<10x256xf32>
    %c0_28 = arith.constant 0 : index
    %c0_29 = arith.constant 0 : index
    %60 = vector.load %arg13[%c0_28, %c0_29] : memref<2x256xf32, #tpu.memory_space<vmem>>, vector<1x256xf32>
    %61 = vector.broadcast %60 : vector<1x256xf32> to vector<10x256xf32>
    %62 = arith.addf %59, %61 : vector<10x256xf32>
    %cst_30 = arith.constant 0.000000e+00 : f32
    %63 = vector.broadcast %cst_30 : f32 to vector<10x256xf32>
    %64 = arith.maximumf %62, %63 : vector<10x256xf32>
    %c0_31 = arith.constant 0 : index
    %c0_32 = arith.constant 0 : index
    %c0_33 = arith.constant 0 : index
    %65 = vector.load %arg11[%c0_31, %c0_32, %c0_33] : memref<2x256x128xf32, #tpu.memory_space<vmem>>, vector<1x256x128xf32>
    %66 = vector.shape_cast %65 : vector<1x256x128xf32> to vector<256x128xf32>
    %cst_34 = arith.constant dense<0.000000e+00> : vector<10x128xf32>
    %67 = tpu.matmul %64, %66, %cst_34 {dimension_numbers = #tpu.dot_dimension_numbers<[1], [0], [0], [1], [0, 0, 1, 1], [], []>} : vector<10x256xf32>, vector<256x128xf32>, vector<10x128xf32> -> vector<10x128xf32>
    %c1 = arith.constant 1 : index
    %c0_35 = arith.constant 0 : index
    %68 = vector.load %arg12[%c1, %c0_35] : memref<16x128xf32, #tpu.memory_space<vmem>>, vector<1x128xf32>
    %69 = vector.broadcast %68 : vector<1x128xf32> to vector<10x128xf32>
    %70 = arith.addf %67, %69 : vector<10x128xf32>
    %71 = arith.addf %56, %70 : vector<10x128xf32>
    %72 = arith.mulf %71, %71 : vector<10x128xf32>
    %73 = tpu.concatenate %71, %72 in 1 : vector<10x128xf32>, vector<10x128xf32> -> vector<10x256xf32>
    %cst_36 = arith.constant dense<0.000000e+00> : vector<10x256xf32>
    %74 = tpu.matmul %73, %0, %cst_36 {dimension_numbers = #tpu.dot_dimension_numbers<[1], [0], [0], [1], [0, 0, 1, 1], [], []>} : vector<10x256xf32>, vector<256x256xf32>, vector<10x256xf32> -> vector<10x256xf32>
    %75 = vector.extract_strided_slice %74 {offsets = [0, 0], sizes = [10, 128], strides = [1, 1]} : vector<10x256xf32> to vector<10x128xf32>
    %76 = vector.extract_strided_slice %74 {offsets = [0, 128], sizes = [10, 128], strides = [1, 1]} : vector<10x256xf32> to vector<10x128xf32>
    %77 = arith.mulf %75, %75 : vector<10x128xf32>
    %78 = arith.subf %76, %77 : vector<10x128xf32>
    %79 = arith.subf %71, %75 : vector<10x128xf32>
    %cst_37 = arith.constant 9.99999974E-6 : f32
    %80 = vector.broadcast %cst_37 : f32 to vector<10x128xf32>
    %81 = arith.addf %78, %80 : vector<10x128xf32>
    %82 = math.rsqrt %81 : vector<10x128xf32>
    %83 = arith.mulf %79, %82 : vector<10x128xf32>
    %c4 = arith.constant 4 : index
    %c0_38 = arith.constant 0 : index
    %84 = vector.load %arg12[%c4, %c0_38] : memref<16x128xf32, #tpu.memory_space<vmem>>, vector<1x128xf32>
    %85 = vector.broadcast %84 : vector<1x128xf32> to vector<10x128xf32>
    %86 = arith.mulf %83, %85 : vector<10x128xf32>
    %c5 = arith.constant 5 : index
    %c0_39 = arith.constant 0 : index
    %87 = vector.load %arg12[%c5, %c0_39] : memref<16x128xf32, #tpu.memory_space<vmem>>, vector<1x128xf32>
    %88 = vector.broadcast %87 : vector<1x128xf32> to vector<10x128xf32>
    %89 = arith.addf %86, %88 : vector<10x128xf32>
    %c0_40 = arith.constant 0 : index
    %c0_41 = arith.constant 0 : index
    %90 = vector.load %arg2[%c0_40, %c0_41] : memref<1x128xf32, #tpu.memory_space<vmem>>, vector<1x128xf32>
    %c1_42 = arith.constant 1 : index
    %c0_43 = arith.constant 0 : index
    %c256 = arith.constant 256 : index
    %91 = vector.load %arg4[%c1_42, %c0_43, %c256] : memref<2x128x384xf32, #tpu.memory_space<vmem>>, vector<1x128x128xf32>
    %92 = vector.shape_cast %91 : vector<1x128x128xf32> to vector<128x128xf32>
    %cst_44 = arith.constant dense<0.000000e+00> : vector<1x128xf32>
    %93 = tpu.matmul %90, %92, %cst_44 {dimension_numbers = #tpu.dot_dimension_numbers<[1], [0], [0], [1], [0, 0, 1, 1], [], []>} : vector<1x128xf32>, vector<128x128xf32>, vector<1x128xf32> -> vector<1x128xf32>
    %c1_45 = arith.constant 1 : index
    %c256_46 = arith.constant 256 : index
    %94 = vector.load %arg5[%c1_45, %c256_46] : memref<2x384xf32, #tpu.memory_space<vmem>>, vector<1x128xf32>
    %95 = arith.addf %93, %94 : vector<1x128xf32>
    %c1_47 = arith.constant 1 : index
    %c0_48 = arith.constant 0 : index
    %c0_49 = arith.constant 0 : index
    %96 = vector.load %arg8[%c1_47, %c0_48, %c0_49] : memref<4x128x128xf32, #tpu.memory_space<vmem>>, vector<1x128x128xf32>
    %97 = vector.shape_cast %96 : vector<1x128x128xf32> to vector<128x128xf32>
    %cst_50 = arith.constant dense<0.000000e+00> : vector<1x128xf32>
    %98 = tpu.matmul %95, %97, %cst_50 {dimension_numbers = #tpu.dot_dimension_numbers<[1], [0], [0], [1], [0, 0, 1, 1], [], []>} : vector<1x128xf32>, vector<128x128xf32>, vector<1x128xf32> -> vector<1x128xf32>
    %c6 = arith.constant 6 : index
    %c0_51 = arith.constant 0 : index
    %99 = vector.load %arg12[%c6, %c0_51] : memref<16x128xf32, #tpu.memory_space<vmem>>, vector<1x128xf32>
    %100 = arith.addf %98, %99 : vector<1x128xf32>
    %101 = arith.addf %90, %100 : vector<1x128xf32>
    %102 = arith.mulf %101, %101 : vector<1x128xf32>
    %103 = tpu.concatenate %101, %102 in 1 : vector<1x128xf32>, vector<1x128xf32> -> vector<1x256xf32>
    %cst_52 = arith.constant dense<0.000000e+00> : vector<1x256xf32>
    %104 = tpu.matmul %103, %0, %cst_52 {dimension_numbers = #tpu.dot_dimension_numbers<[1], [0], [0], [1], [0, 0, 1, 1], [], []>} : vector<1x256xf32>, vector<256x256xf32>, vector<1x256xf32> -> vector<1x256xf32>
    %105 = vector.extract_strided_slice %104 {offsets = [0, 0], sizes = [1, 128], strides = [1, 1]} : vector<1x256xf32> to vector<1x128xf32>
    %106 = vector.extract_strided_slice %104 {offsets = [0, 128], sizes = [1, 128], strides = [1, 1]} : vector<1x256xf32> to vector<1x128xf32>
    %107 = arith.mulf %105, %105 : vector<1x128xf32>
    %108 = arith.subf %106, %107 : vector<1x128xf32>
    %109 = arith.subf %101, %105 : vector<1x128xf32>
    %cst_53 = arith.constant 9.99999974E-6 : f32
    %110 = vector.broadcast %cst_53 : f32 to vector<1x128xf32>
    %111 = arith.addf %108, %110 : vector<1x128xf32>
    %112 = math.rsqrt %111 : vector<1x128xf32>
    %113 = arith.mulf %109, %112 : vector<1x128xf32>
    %c10 = arith.constant 10 : index
    %c0_54 = arith.constant 0 : index
    %114 = vector.load %arg12[%c10, %c0_54] : memref<16x128xf32, #tpu.memory_space<vmem>>, vector<1x128xf32>
    %115 = arith.mulf %113, %114 : vector<1x128xf32>
    %c11 = arith.constant 11 : index
    %c0_55 = arith.constant 0 : index
    %116 = vector.load %arg12[%c11, %c0_55] : memref<16x128xf32, #tpu.memory_space<vmem>>, vector<1x128xf32>
    %117 = arith.addf %115, %116 : vector<1x128xf32>
    %c2_56 = arith.constant 2 : index
    %c0_57 = arith.constant 0 : index
    %c0_58 = arith.constant 0 : index
    %118 = vector.load %arg8[%c2_56, %c0_57, %c0_58] : memref<4x128x128xf32, #tpu.memory_space<vmem>>, vector<1x128x128xf32>
    %119 = vector.shape_cast %118 : vector<1x128x128xf32> to vector<128x128xf32>
    %cst_59 = arith.constant dense<0.000000e+00> : vector<1x128xf32>
    %120 = tpu.matmul %117, %119, %cst_59 {dimension_numbers = #tpu.dot_dimension_numbers<[1], [0], [0], [1], [0, 0, 1, 1], [], []>} : vector<1x128xf32>, vector<128x128xf32>, vector<1x128xf32> -> vector<1x128xf32>
    %c7 = arith.constant 7 : index
    %c0_60 = arith.constant 0 : index
    %121 = vector.load %arg12[%c7, %c0_60] : memref<16x128xf32, #tpu.memory_space<vmem>>, vector<1x128xf32>
    %122 = arith.addf %120, %121 : vector<1x128xf32>
    %c0_61 = arith.constant 0 : index
    %c0_62 = arith.constant 0 : index
    %123 = vector.load %arg6[%c0_61, %c0_62] : memref<128x256xf32, #tpu.memory_space<vmem>>, vector<128x256xf32>
    %cst_63 = arith.constant dense<0.000000e+00> : vector<10x256xf32>
    %124 = tpu.matmul %89, %123, %cst_63 {dimension_numbers = #tpu.dot_dimension_numbers<[1], [0], [0], [1], [0, 0, 1, 1], [], []>} : vector<10x128xf32>, vector<128x256xf32>, vector<10x256xf32> -> vector<10x256xf32>
    %c0_64 = arith.constant 0 : index
    %c0_65 = arith.constant 0 : index
    %125 = vector.load %arg7[%c0_64, %c0_65] : memref<1x256xf32, #tpu.memory_space<vmem>>, vector<1x256xf32>
    %126 = vector.broadcast %125 : vector<1x256xf32> to vector<10x256xf32>
    %127 = arith.addf %124, %126 : vector<10x256xf32>
    %128 = vector.extract_strided_slice %127 {offsets = [0, 0], sizes = [10, 128], strides = [1, 1]} : vector<10x256xf32> to vector<10x128xf32>
    %129 = vector.extract_strided_slice %127 {offsets = [0, 128], sizes = [10, 128], strides = [1, 1]} : vector<10x256xf32> to vector<10x128xf32>
    %130 = vector.shape_cast %128 : vector<10x128xf32> to vector<10x1x128xf32>
    %131 = vector.shape_cast %122 : vector<1x128xf32> to vector<1x1x128xf32>
    %132 = vector.broadcast %131 : vector<1x1x128xf32> to vector<10x1x128xf32>
    %133 = arith.mulf %130, %132 : vector<10x1x128xf32>
    %cst_66 = arith.constant dense<0xFF800000> : vector<1x128xf32>
    %134 = vector.multi_reduction <maximumf>, %133, %cst_66 [0] : vector<10x1x128xf32> to vector<1x128xf32>
    %135 = vector.shape_cast %134 : vector<1x128xf32> to vector<1x1x128xf32>
    %136 = vector.broadcast %135 : vector<1x1x128xf32> to vector<10x1x128xf32>
    %137 = arith.subf %133, %136 : vector<10x1x128xf32>
    %138 = math.exp %137 : vector<10x1x128xf32>
    %139 = vector.shape_cast %129 : vector<10x128xf32> to vector<10x1x128xf32>
    %140 = arith.mulf %138, %139 : vector<10x1x128xf32>
    %cst_67 = arith.constant dense<0.000000e+00> : vector<1x128xf32>
    %141 = vector.multi_reduction <add>, %140, %cst_67 [0] : vector<10x1x128xf32> to vector<1x128xf32>
    %cst_68 = arith.constant dense<0.000000e+00> : vector<1x128xf32>
    %142 = vector.multi_reduction <add>, %138, %cst_68 [0] : vector<10x1x128xf32> to vector<1x128xf32>
    %143 = tpu.reciprocal %142 {approx = true} : vector<1x128xf32> -> vector<1x128xf32>
    %144 = arith.mulf %141, %143 : vector<1x128xf32>
    %c3_69 = arith.constant 3 : index
    %c0_70 = arith.constant 0 : index
    %c0_71 = arith.constant 0 : index
    %145 = vector.load %arg8[%c3_69, %c0_70, %c0_71] : memref<4x128x128xf32, #tpu.memory_space<vmem>>, vector<1x128x128xf32>
    %146 = vector.shape_cast %145 : vector<1x128x128xf32> to vector<128x128xf32>
    %cst_72 = arith.constant dense<0.000000e+00> : vector<1x128xf32>
    %147 = tpu.matmul %144, %146, %cst_72 {dimension_numbers = #tpu.dot_dimension_numbers<[1], [0], [0], [1], [0, 0, 1, 1], [], []>} : vector<1x128xf32>, vector<128x128xf32>, vector<1x128xf32> -> vector<1x128xf32>
    %c8 = arith.constant 8 : index
    %c0_73 = arith.constant 0 : index
    %148 = vector.load %arg12[%c8, %c0_73] : memref<16x128xf32, #tpu.memory_space<vmem>>, vector<1x128xf32>
    %149 = arith.addf %147, %148 : vector<1x128xf32>
    %150 = arith.addf %117, %149 : vector<1x128xf32>
    %151 = arith.mulf %150, %150 : vector<1x128xf32>
    %152 = tpu.concatenate %150, %151 in 1 : vector<1x128xf32>, vector<1x128xf32> -> vector<1x256xf32>
    %cst_74 = arith.constant dense<0.000000e+00> : vector<1x256xf32>
    %153 = tpu.matmul %152, %0, %cst_74 {dimension_numbers = #tpu.dot_dimension_numbers<[1], [0], [0], [1], [0, 0, 1, 1], [], []>} : vector<1x256xf32>, vector<256x256xf32>, vector<1x256xf32> -> vector<1x256xf32>
    %154 = vector.extract_strided_slice %153 {offsets = [0, 0], sizes = [1, 128], strides = [1, 1]} : vector<1x256xf32> to vector<1x128xf32>
    %155 = vector.extract_strided_slice %153 {offsets = [0, 128], sizes = [1, 128], strides = [1, 1]} : vector<1x256xf32> to vector<1x128xf32>
    %156 = arith.mulf %154, %154 : vector<1x128xf32>
    %157 = arith.subf %155, %156 : vector<1x128xf32>
    %158 = arith.subf %150, %154 : vector<1x128xf32>
    %cst_75 = arith.constant 9.99999974E-6 : f32
    %159 = vector.broadcast %cst_75 : f32 to vector<1x128xf32>
    %160 = arith.addf %157, %159 : vector<1x128xf32>
    %161 = math.rsqrt %160 : vector<1x128xf32>
    %162 = arith.mulf %158, %161 : vector<1x128xf32>
    %c12 = arith.constant 12 : index
    %c0_76 = arith.constant 0 : index
    %163 = vector.load %arg12[%c12, %c0_76] : memref<16x128xf32, #tpu.memory_space<vmem>>, vector<1x128xf32>
    %164 = arith.mulf %162, %163 : vector<1x128xf32>
    %c13 = arith.constant 13 : index
    %c0_77 = arith.constant 0 : index
    %165 = vector.load %arg12[%c13, %c0_77] : memref<16x128xf32, #tpu.memory_space<vmem>>, vector<1x128xf32>
    %166 = arith.addf %164, %165 : vector<1x128xf32>
    %c1_78 = arith.constant 1 : index
    %c0_79 = arith.constant 0 : index
    %c0_80 = arith.constant 0 : index
    %167 = vector.load %arg10[%c1_78, %c0_79, %c0_80] : memref<2x128x256xf32, #tpu.memory_space<vmem>>, vector<1x128x256xf32>
    %168 = vector.shape_cast %167 : vector<1x128x256xf32> to vector<128x256xf32>
    %cst_81 = arith.constant dense<0.000000e+00> : vector<1x256xf32>
    %169 = tpu.matmul %166, %168, %cst_81 {dimension_numbers = #tpu.dot_dimension_numbers<[1], [0], [0], [1], [0, 0, 1, 1], [], []>} : vector<1x128xf32>, vector<128x256xf32>, vector<1x256xf32> -> vector<1x256xf32>
    %c1_82 = arith.constant 1 : index
    %c0_83 = arith.constant 0 : index
    %170 = vector.load %arg13[%c1_82, %c0_83] : memref<2x256xf32, #tpu.memory_space<vmem>>, vector<1x256xf32>
    %171 = arith.addf %169, %170 : vector<1x256xf32>
    %cst_84 = arith.constant 0.000000e+00 : f32
    %172 = vector.broadcast %cst_84 : f32 to vector<1x256xf32>
    %173 = arith.maximumf %171, %172 : vector<1x256xf32>
    %c1_85 = arith.constant 1 : index
    %c0_86 = arith.constant 0 : index
    %c0_87 = arith.constant 0 : index
    %174 = vector.load %arg11[%c1_85, %c0_86, %c0_87] : memref<2x256x128xf32, #tpu.memory_space<vmem>>, vector<1x256x128xf32>
    %175 = vector.shape_cast %174 : vector<1x256x128xf32> to vector<256x128xf32>
    %cst_88 = arith.constant dense<0.000000e+00> : vector<1x128xf32>
    %176 = tpu.matmul %173, %175, %cst_88 {dimension_numbers = #tpu.dot_dimension_numbers<[1], [0], [0], [1], [0, 0, 1, 1], [], []>} : vector<1x256xf32>, vector<256x128xf32>, vector<1x128xf32> -> vector<1x128xf32>
    %c9 = arith.constant 9 : index
    %c0_89 = arith.constant 0 : index
    %177 = vector.load %arg12[%c9, %c0_89] : memref<16x128xf32, #tpu.memory_space<vmem>>, vector<1x128xf32>
    %178 = arith.addf %176, %177 : vector<1x128xf32>
    %179 = arith.addf %166, %178 : vector<1x128xf32>
    %180 = arith.mulf %179, %179 : vector<1x128xf32>
    %181 = tpu.concatenate %179, %180 in 1 : vector<1x128xf32>, vector<1x128xf32> -> vector<1x256xf32>
    %cst_90 = arith.constant dense<0.000000e+00> : vector<1x256xf32>
    %182 = tpu.matmul %181, %0, %cst_90 {dimension_numbers = #tpu.dot_dimension_numbers<[1], [0], [0], [1], [0, 0, 1, 1], [], []>} : vector<1x256xf32>, vector<256x256xf32>, vector<1x256xf32> -> vector<1x256xf32>
    %183 = vector.extract_strided_slice %182 {offsets = [0, 0], sizes = [1, 128], strides = [1, 1]} : vector<1x256xf32> to vector<1x128xf32>
    %184 = vector.extract_strided_slice %182 {offsets = [0, 128], sizes = [1, 128], strides = [1, 1]} : vector<1x256xf32> to vector<1x128xf32>
    %185 = arith.mulf %183, %183 : vector<1x128xf32>
    %186 = arith.subf %184, %185 : vector<1x128xf32>
    %187 = arith.subf %179, %183 : vector<1x128xf32>
    %cst_91 = arith.constant 9.99999974E-6 : f32
    %188 = vector.broadcast %cst_91 : f32 to vector<1x128xf32>
    %189 = arith.addf %186, %188 : vector<1x128xf32>
    %190 = math.rsqrt %189 : vector<1x128xf32>
    %191 = arith.mulf %187, %190 : vector<1x128xf32>
    %c14 = arith.constant 14 : index
    %c0_92 = arith.constant 0 : index
    %192 = vector.load %arg12[%c14, %c0_92] : memref<16x128xf32, #tpu.memory_space<vmem>>, vector<1x128xf32>
    %193 = arith.mulf %191, %192 : vector<1x128xf32>
    %c15 = arith.constant 15 : index
    %c0_93 = arith.constant 0 : index
    %194 = vector.load %arg12[%c15, %c0_93] : memref<16x128xf32, #tpu.memory_space<vmem>>, vector<1x128xf32>
    %195 = arith.addf %193, %194 : vector<1x128xf32>
    %cst_94 = arith.constant 0.000000e+00 : f32
    %196 = vector.broadcast %cst_94 : f32 to vector<1x128xf32>
    %197 = arith.subf %196, %195 : vector<1x128xf32>
    %198 = math.exp %197 : vector<1x128xf32>
    %cst_95 = arith.constant 1.000000e+00 : f32
    %199 = vector.broadcast %cst_95 : f32 to vector<1x128xf32>
    %200 = arith.addf %199, %198 : vector<1x128xf32>
    %cst_96 = arith.constant 1.000000e+00 : f32
    %201 = vector.broadcast %cst_96 : f32 to vector<1x128xf32>
    %202 = arith.divf %201, %200 : vector<1x128xf32>
    %c0_97 = arith.constant 0 : index
    %c0_98 = arith.constant 0 : index
    %203 = vector.load %arg14[%c0_97, %c0_98] : memref<1x128xf32, #tpu.memory_space<vmem>>, vector<1x128xf32>
    tpu.vector_store %arg14[%c0_97, %c0_98], %202 {strides = array<i32>} : memref<1x128xf32, #tpu.memory_space<vmem>>, vector<1x128xf32>,
    return
  }
  func.func @transform_0(%arg0: i32) -> (i32, i32) {
    %c0_i32 = arith.constant 0 : i32
    %c0_i32_0 = arith.constant 0 : i32
    return %c0_i32, %arg0 : i32, i32
  }
  func.func @transform_1(%arg0: i32) -> (i32, i32) {
    %c0_i32 = arith.constant 0 : i32
    %c0_i32_0 = arith.constant 0 : i32
    return %c0_i32, %arg0 : i32, i32
  }
  func.func @transform_2(%arg0: i32) -> (i32, i32) {
    %c0_i32 = arith.constant 0 : i32
    %c0_i32_0 = arith.constant 0 : i32
    %c0_i32_1 = arith.constant 0 : i32
    return %c0_i32, %c0_i32_0 : i32, i32
  }
  func.func @transform_3(%arg0: i32) -> (i32, i32, i32) {
    %c0_i32 = arith.constant 0 : i32
    %c0_i32_0 = arith.constant 0 : i32
    %c0_i32_1 = arith.constant 0 : i32
    %c0_i32_2 = arith.constant 0 : i32
    return %c0_i32, %c0_i32_0, %c0_i32_1 : i32, i32, i32
  }
  func.func @transform_4(%arg0: i32) -> (i32, i32) {
    %c0_i32 = arith.constant 0 : i32
    %c0_i32_0 = arith.constant 0 : i32
    %c0_i32_1 = arith.constant 0 : i32
    return %c0_i32, %c0_i32_0 : i32, i32
  }
  func.func @transform_5(%arg0: i32) -> (i32, i32) {
    %c0_i32 = arith.constant 0 : i32
    %c0_i32_0 = arith.constant 0 : i32
    %c0_i32_1 = arith.constant 0 : i32
    return %c0_i32, %c0_i32_0 : i32, i32
  }
  func.func @transform_6(%arg0: i32) -> (i32, i32) {
    %c0_i32 = arith.constant 0 : i32
    %c0_i32_0 = arith.constant 0 : i32
    %c0_i32_1 = arith.constant 0 : i32
    return %c0_i32, %c0_i32_0 : i32, i32
  }
  func.func @transform_7(%arg0: i32) -> (i32, i32, i32) {
    %c0_i32 = arith.constant 0 : i32
    %c0_i32_0 = arith.constant 0 : i32
    %c0_i32_1 = arith.constant 0 : i32
    %c0_i32_2 = arith.constant 0 : i32
    return %c0_i32, %c0_i32_0, %c0_i32_1 : i32, i32, i32
  }
  func.func @transform_8(%arg0: i32) -> (i32, i32) {
    %c0_i32 = arith.constant 0 : i32
    %c0_i32_0 = arith.constant 0 : i32
    %c0_i32_1 = arith.constant 0 : i32
    return %c0_i32, %c0_i32_0 : i32, i32
  }
  func.func @transform_9(%arg0: i32) -> (i32, i32, i32) {
    %c0_i32 = arith.constant 0 : i32
    %c0_i32_0 = arith.constant 0 : i32
    %c0_i32_1 = arith.constant 0 : i32
    %c0_i32_2 = arith.constant 0 : i32
    return %c0_i32, %c0_i32_0, %c0_i32_1 : i32, i32, i32
  }
  func.func @transform_10(%arg0: i32) -> (i32, i32, i32) {
    %c0_i32 = arith.constant 0 : i32
    %c0_i32_0 = arith.constant 0 : i32
    %c0_i32_1 = arith.constant 0 : i32
    %c0_i32_2 = arith.constant 0 : i32
    return %c0_i32, %c0_i32_0, %c0_i32_1 : i32, i32, i32
  }
  func.func @transform_11(%arg0: i32) -> (i32, i32) {
    %c0_i32 = arith.constant 0 : i32
    %c0_i32_0 = arith.constant 0 : i32
    %c0_i32_1 = arith.constant 0 : i32
    return %c0_i32, %c0_i32_0 : i32, i32
  }
  func.func @transform_12(%arg0: i32) -> (i32, i32) {
    %c0_i32 = arith.constant 0 : i32
    %c0_i32_0 = arith.constant 0 : i32
    %c0_i32_1 = arith.constant 0 : i32
    return %c0_i32, %c0_i32_0 : i32, i32
  }
  func.func @transform_13(%arg0: i32) -> (i32, i32) {
    %c0_i32 = arith.constant 0 : i32
    %c0_i32_0 = arith.constant 0 : i32
    return %c0_i32, %arg0 : i32, i32
  }
}

</mosaic_0001>

<bundles_post_ra>
// kernel: tranad_basic_forward.1
= control target key start
LH: loop header
LB: loop body
LE: loop exit
PB: predicated region body
PF: predicated region fallthrough
CT: control target
= control target key end

     0   :  { %s4446_s0 = inlined_call_operand.vmem [shape: f32[10,256], index: 0, kind: input, shape index: {}]   ;;  %s4447_s1 = inlined_call_operand.vmem [shape: f32[1,256], index: 1, kind: input, shape index: {}]   ;;  %s4448_s2 = inlined_call_operand.vmem [shape: f32[10,128], index: 2, kind: input, shape index: {}]   ;;  %s4449_s3 = inlined_call_operand.hbm [shape: f32[2,128,384], index: 3, kind: input, shape index: {}]   ;;  %s4450_s4 = inlined_call_operand.vmem [shape: f32[2,384], index: 4, kind: input, shape index: {}]   ;;  %s4451_s5 = inlined_call_operand.vmem [shape: f32[128,256], index: 5, kind: input, shape index: {}]   ;;  %s4452_s6 = inlined_call_operand.vmem [shape: f32[1,256], index: 6, kind: input, shape index: {}]   ;;  %s4453_s7 = inlined_call_operand.vmem [shape: f32[4,128,128], index: 7, kind: input, shape index: {}]   ;;  %s4454_s8 = inlined_call_operand.hbm [shape: f32[256,256], index: 8, kind: input, shape index: {}]   ;;  %s4455_s9 = inlined_call_operand.hbm [shape: f32[2,128,256], index: 9, kind: input, shape index: {}]   ;;  %s4456_s10 = inlined_call_operand.hbm [shape: f32[2,256,128], index: 10, kind: input, shape index: {}]   ;;  %s4457_s11 = inlined_call_operand.vmem [shape: f32[16,128], index: 11, kind: input, shape index: {}]   ;;  %s4458_s12 = inlined_call_operand.vmem [shape: f32[2,256], index: 12, kind: input, shape index: {}]   ;;  %s4459_s13 = inlined_call_operand.vmem [shape: f32[1,256], index: 13, kind: output, shape index: {}]  }
   0x1   :  { %4511 = sst [smem:[#allocation37_spill]] %s4447_s1 }
   0x2   :  { %4512 = sst [smem:[#allocation38_spill]] %s4449_s3 }
   0x3   :  { %4513 = sst [smem:[#allocation39_spill]] %s4451_s5 }
   0x4   :  { %4514 = sst [smem:[#allocation40_spill]] %s4452_s6 }
   0x5   :  { %4515 = sst [smem:[#allocation41_spill]] %s4454_s8 }
   0x6   :  { %4516 = sst [smem:[#allocation42_spill]] %s4458_s12 }
   0x7   :  { %4517 = sst [smem:[#allocation43_spill]] %s4459_s13 }
   0x8   :  { %18 = vsyncpa [#allocation4], 0 }
   0x9   :  { %19 = vsyncpa [#allocation6], 0 }
   0xa   :  { %20 = vsyncpa [#allocation9], 0  ;;  %s2999_s25 = smov 0   ;;  %s3001_s26 = smov 0  }
   0xb   :  { %s3003_s27 = smov 0  }
   0xc LB: > { %s3015_s28 = sadd.s32 4294967295, %s2917_s27   ;;  %s3018_s29 = sadd.s32 1, %s2917_s27   ;;  %s2917_s27 = sphi %s3003_s27, %s4599_s27   ;;  %s2913_s26 = sphi %s3001_s26, %s4602_s26   ;;  %s2909_s25 = sphi %s2999_s25, %s4601_s25  }
   0xd   : > { %4518 = sst [smem:[#allocation13_spill]] %s3018_s29  ;;  %s30_s30 = ssub.s32 %s2917_s27, %s3018_s29 }
   0xe   : > { %s33_s14 = sadd.s32 1, %s2913_s26  ;;  %p31_p0 = scmp.eq.s32.totalorder %s30_s30, 0 }
   0xf   : > { %p40_p1 = scmp.ne.s32.totalorder %s2913_s26, %s2909_s25  ;;  %p41_p2 = scmp.eq.s32.totalorder %s2917_s27, 0 }
  0x10   : > { %p2451_p3 = scmp.ge.s32.totalorder %s2917_s27, 1  ;;  %p340_p5 = scmp.lt.s32.totalorder %s2917_s27, 3 }
  0x11   : > { %s3028_s15 = scalar_select %p31_p0, %s2913_s26, %s33_s14  }
  0x12   : > { %p3030_p4 = por %p41_p2, %p40_p1  ;;  %p2545_p6 = scmp.eq.s32.totalorder %s3015_s28, 0 }
  0x13   : > { %4519 = sst [smem:[#allocation14_spill]] %s3028_s15  ;;  %p3036_p7 = pnand %p2451_p3, %p340_p5 }
  0x14   : > { %s4522_s8 = sld [smem:[#allocation41_spill]]  ;;  %s2919_s21 = smov [#allocation5]  }
  0x15   : > { %p2532_p8 = pneg %p3036_p7  ;;  %s382_s22 = sshll.u32 %s2919_s21, 4  ;;  %s383_s22 = int_to_ptr.vmem [resolvable:$true] %s382_s22 }
  0x16   : > { %s4524_s3 = sld [smem:[#allocation38_spill]]  ;;  %s2920_s18 = smov 256  }
  0x17   : > { %p3047_p9 = pnand %p2545_p6, %p2532_p8  ;;  %s2921_s19 = smov 16  }
  0x18   : > { %s2923_s15 = smov 384   ;;  %s2924_s29 = smov 24  }
  0x19   : > { %s394_s24 = sshll.u32 %s4455_s9, 4  ;;  %s2925_s30 = smov [#allocation7]   ;;  %s395_s24 = int_to_ptr.hbm [resolvable:$true] %s394_s24 }
  0x1a   : > { %s380_s20 = sshll.u32 %s4522_s8, 4  ;;  %s2922_s8 = smov [#allocation3]   ;;  %s381_s20 = int_to_ptr.hbm [resolvable:$true] %s380_s20 }
  0x1b   : > { %2538 = dma.hbm_to_vmem [thread:$0]  (!%p3047_p9), %s381_s20, 8192, %s383_s22, [#allocation6], %s2920_s18, %s2920_s18, %s2921_s19  }
  0x1c   : > { %s354_s14 = sshll.u32 %s4524_s3, 4  ;;  %s356_s21 = sshll.u32 %s2922_s8, 4  ;;  %s355_s14 = int_to_ptr.hbm [resolvable:$true] %s354_s14  ;;  %s357_s21 = int_to_ptr.vmem [resolvable:$true] %s356_s21 }
  0x1d   : > { %2535 = dma.hbm_to_vmem [thread:$0]  (!%p3047_p9), %s355_s14, 12288, %s357_s21, [#allocation4], %s2923_s15, %s2923_s15, %s2924_s29  }
  0x1e   : > { %s396_s3 = sshll.u32 %s2925_s30, 4  ;;  %s408_s20 = sshll.u32 %s4456_s10, 4  ;;  %s397_s3 = int_to_ptr.vmem [resolvable:$true] %s396_s3  ;;  %s409_s20 = int_to_ptr.hbm [resolvable:$true] %s408_s20 }
  0x1f   : > { %2541 = dma.hbm_to_vmem [thread:$0]  (!%p3047_p9), %s395_s24, 8192, %s397_s3, [#allocation6], %s2920_s18, %s2920_s18, %s2921_s19  }
  0x20   : > { %s2926_s8 = smov [#allocation8]   ;;  %s2927_s12 = smov 128  }
  0x21   : > { %s410_s22 = sshll.u32 %s2926_s8, 4  ;;  %s2928_s29 = smov 8   ;;  %s411_s22 = int_to_ptr.vmem [resolvable:$true] %s410_s22 }
  0x22   : > { %2544 = dma.hbm_to_vmem [thread:$0]  (!%p3047_p9), %s409_s20, 8192, %s411_s22, [#allocation9], %s2927_s12, %s2927_s12, %s2928_s29  }
  0x23   : > { %p2456_p10 = scmp.ge.s32.totalorder %s2917_s27, 2 }
  0x25   : > { %426 = sbr.rel (%p2456_p10) target bundleno = 48 (0x30), region = 60 }
  0x2a   : > { %429 = sbr.rel (!%p3030_p4) target bundleno = 48 (0x30), region = 64  ;;  %s431_s1 = sand.u32 (%p3030_p4), 1, %s2913_s26  }
  0x2b   : > { %s2458_s5 = sshll.u32 (%p3030_p4), %s2917_s27, 3  ;;  %s2457_s6 = sshll.u32 (%p3030_p4), %s431_s1, 4 }
  0x2c   : > { %s435_s15 = scalar_lea.vmem (%p3030_p4), %s4446_s0, %s2458_s5  ;;  %s433_s14 = scalar_lea.vmem (%p3030_p4), [#allocation2], %s2457_s6 }
  0x2d   : > { %v466_v0 = vld [vmem:[%s435_s15] sm:$0xff] (%p3030_p4)  ;;  %v468_v1 = vld [vmem:[%s435_s15 + $0x10] sm:$0xff] (%p3030_p4) }
  0x2e   : > { %467 = vst [vmem:[%s433_s14] sm:$0xff] (%p3030_p4), %v466_v0 }
  0x2f   : > { %469 = vst [vmem:[%s433_s14 + $0x8] sm:$0xff] %v468_v1 }
  0x30 PF: > { %484 = sbr.rel (%p3036_p7) target bundleno = 2244 (0x8c4), region = 106 }
  0x35   : > { %s487_s12 = sand.u32 1, %s2909_s25  }
  0x36   : > { %s3079_s16 = sshll.u32 %s487_s12, 4 }
  0x37   : > { %s489_s27 = scalar_lea.vmem [#allocation2], %s3079_s16 }
  0x38   : > { %2896 = dma.done.wait (%p2545_p6), [#allocation4], 12288  }
  0x39   : > { %2898 = vsyncadd (%p2545_p6), [#allocation4], 4294955008 }
  0x3a   : > { %2900 = dma.done.wait (%p2545_p6), [#allocation6], 16384  }
  0x3b   : > { %2902 = vsyncadd (%p2545_p6), [#allocation6], 4294950912 }
  0x3c   : > { %2904 = dma.done.wait (%p2545_p6), [#allocation9], 8192  }
  0x3d   : > { %2906 = vsyncadd (%p2545_p6), [#allocation9], 4294959104  ;;  %v674_v2 = vld [vmem:[#allocation3 + $0x168] sm:$0xff]  ;;  %v675_v3 = vld [vmem:[#allocation3 + $0x170] sm:$0xff]  ;;  %vm813_vm0 = vcmask 1041408   ;;  %s4555_s23 = sld [smem:[#allocation42_spill]] }
  0x3e   : > { %v671_v4 = vld [vmem:[#allocation3 + $0x150] sm:$0xff]  ;;  %685 = vmatpush.msra.mxu0 %v674_v2  ;;  %708 = vmatpush.msra.mxu1 %v675_v3  ;;  %v672_v5 = vld [vmem:[#allocation3 + $0x158] sm:$0xff]  ;;  %v669_v7 = vld [vmem:[#allocation3 + $0x140] sm:$0xff]  ;;  %p551_p11 = scmp.lt.s32.totalorder %s3015_s28, 1  ;;  %s4570_s12 = sld [smem:[#allocation37_spill]] }
  0x3f   : > { %v668_v6 = vld [vmem:[#allocation3 + $0x138] sm:$0xff]  ;;  %v665_v8 = vld [vmem:[#allocation3 + $0x120] sm:$0xff]  ;;  %v666_v9 = vld [vmem:[#allocation3 + $0x128] sm:$0xff]  ;;  %s4571_s25 = sld [smem:[#allocation39_spill]] }
  0x40   : > { %686 = vmatpush.msra.mxu0 %v671_v4  ;;  %709 = vmatpush.msra.mxu1 %v672_v5  ;;  %v676_v10 = vld [vmem:[#allocation3 + $0x178] sm:$0xff]  ;;  %v673_v11 = vld [vmem:[#allocation3 + $0x160] sm:$0xff]  ;;  %v662_v12 = vld [vmem:[#allocation3 + $0x108] sm:$0xff]  ;;  %s4604_s28 = smov (!%p551_p11, %s3015_s28), 1  ;;  %s4584_s3 = sld [smem:[#allocation40_spill]] }
  0x41   : > { %v663_v13 = vld [vmem:[#allocation3 + $0x110] sm:$0xff]  ;;  %731 = vmatpush.msra.mxu2 %v676_v10  ;;  %v670_v14 = vld [vmem:[#allocation3 + $0x148] sm:$0xff]  ;;  %v660_v16 = vld [vmem:[#allocation3 + $0xf8] sm:$0xff] }
  0x42   : > { %687 = vmatpush.msra.mxu0 %v668_v6  ;;  %710 = vmatpush.msra.mxu1 %v669_v7  ;;  %v659_v15 = vld [vmem:[#allocation3 + $0xf0] sm:$0xff]  ;;  %v656_v18 = vld [vmem:[#allocation3 + $0xd8] sm:$0xff]  ;;  %v657_v19 = vld [vmem:[#allocation3 + $0xe0] sm:$0xff] }
  0x43   : > { %732 = vmatpush.msra.mxu2 %v673_v11  ;;  %v667_v17 = vld [vmem:[#allocation3 + $0x130] sm:$0xff]  ;;  %v664_v20 = vld [vmem:[#allocation3 + $0x118] sm:$0xff]  ;;  %v653_v21 = vld [vmem:[#allocation3 + $0xc0] sm:$0xff] }
  0x44   : > { %688 = vmatpush.msra.mxu0 %v665_v8  ;;  %711 = vmatpush.msra.mxu1 %v666_v9  ;;  %v654_v22 = vld [vmem:[#allocation3 + $0xc8] sm:$0xff]  ;;  %v661_v23 = vld [vmem:[#allocation3 + $0x100] sm:$0xff]  ;;  %v651_v25 = vld [vmem:[#allocation3 + $0xb0] sm:$0xff]  ;;  %s553_s16 = scalar_lea.vmem %s4570_s12, %s4604_s28 }
  0x45   : > { %733 = vmatpush.msra.mxu2 %v670_v14  ;;  %v650_v24 = vld [vmem:[#allocation3 + $0xa8] sm:$0xff]  ;;  %v647_v27 = vld [vmem:[#allocation3 + $0x90] sm:$0xff]  ;;  %v648_v28 = vld [vmem:[#allocation3 + $0x98] sm:$0xff]  ;;  %s4572_s17 = smov %s4571_s25 }
  0x46   : > { %689 = vmatpush.msra.mxu0 %v662_v12  ;;  %712 = vmatpush.msra.mxu1 %v663_v13  ;;  %v658_v26 = vld [vmem:[#allocation3 + $0xe8] sm:$0xff]  ;;  %v644_v29 = vld [vmem:[#allocation3 + $0x78] sm:$0xff]  ;;  %v645_v30 = vld [vmem:[#allocation3 + $0x80] sm:$0xff] }
  0x47   : > { %734 = vmatpush.msra.mxu2 %v667_v17  ;;  %v655_v31 = vld [vmem:[#allocation3 + $0xd0] sm:$0xff]  ;;  %v652_v32 = vld [vmem:[#allocation3 + $0xb8] sm:$0xff]  ;;  %v641_v33 = vld [vmem:[#allocation3 + $0x60] sm:$0xff] }
  0x48   : > { %690 = vmatpush.msra.mxu0 %v659_v15  ;;  %713 = vmatpush.msra.mxu1 %v660_v16  ;;  %v642_v34 = vld [vmem:[#allocation3 + $0x68] sm:$0xff]  ;;  %v649_v35 = vld [vmem:[#allocation3 + $0xa0] sm:$0xff]  ;;  %v639_v38 = vld [vmem:[#allocation3 + $0x50] sm:$0xff] }
  0x49   : > { %735 = vmatpush.msra.mxu2 %v664_v20  ;;  %v621_v36 = vld [vmem:[%s489_s27] sm:$0xff]  ;;  %v638_v37 = vld [vmem:[#allocation3 + $0x48] sm:$0xff]  ;;  %v636_v41 = vld [vmem:[#allocation3 + $0x38] sm:$0xff] }
  0x4a   : > { %691 = vmatpush.msra.mxu0 %v656_v18  ;;  %714 = vmatpush.msra.mxu1 %v657_v19  ;;  %v646_v39 = vld [vmem:[#allocation3 + $0x88] sm:$0xff]  ;;  %v635_v40 = vld [vmem:[#allocation3 + $0x30] sm:$0xff]  ;;  %v623_v42 = vmul.f32 2.828427, %v621_v36  ;;  %v625_v43 = vld [vmem:[%s4448_s2] sm:$0xff] }
  0x4b   : > { %736 = vmatpush.msra.mxu2 %v661_v23  ;;  %v643_v44 = vld [vmem:[#allocation3 + $0x70] sm:$0xff]  ;;  %v632_v45 = vld [vmem:[#allocation3 + $0x18] sm:$0xff]  ;;  %v633_v46 = vld [vmem:[#allocation3 + $0x20] sm:$0xff] }
  0x4c   : > { %692 = vmatpush.msra.mxu0 %v653_v21  ;;  %715 = vmatpush.msra.mxu1 %v654_v22  ;;  %v640_v47 = vld [vmem:[#allocation3 + $0x58] sm:$0xff]  ;;  %v629_v48 = vld [vmem:[#allocation3] sm:$0xff]  ;;  %v630_v49 = vld [vmem:[#allocation3 + $0x8] sm:$0xff]  ;;  %v3099_v50 = vadd.f32 %v625_v43, %v623_v42 }
  0x4d   : > { %737 = vmatpush.msra.mxu2 %v658_v26  ;;  %v622_v51 = vld [vmem:[%s489_s27 + $0x8] sm:$0x3]  ;;  %v637_v52 = vld [vmem:[#allocation3 + $0x40] sm:$0xff]  ;;  %v631_v56 = vld [vmem:[#allocation3 + $0x10] sm:$0xff] }
  0x4e   : > { %693 = vmatpush.msra.mxu0 %v650_v24  ;;  %716 = vmatpush.msra.mxu1 %v651_v25  ;;  %v624_v53 = vmul.f32 2.828427, %v622_v51  ;;  %v634_v54 = vld [vmem:[#allocation3 + $0x28] sm:$0xff]  ;;  %v3117_v58 = vld [vmem:[%s4450_s4] ss:$2 sm:$0x7] }
  0x4f   : > { %738 = vmatpush.msra.mxu2 %v655_v31  ;;  %v626_v55 = vld [vmem:[%s4448_s2 + $0x8] sm:$0x3]  ;;  %v680_v59 = vperm.slane %v3117_v58, 1  ;;  %v679_v60 = vperm.slane %v3117_v58, 0 }
  0x50   : > { %694 = vmatpush.msra.mxu0 %v647_v27  ;;  %717 = vmatpush.msra.mxu1 %v648_v28  ;;  %v3108_v57 = vadd.f32 %v626_v55, %v624_v53 }
  0x51   : > { %739 = vmatpush.msra.mxu2 %v652_v32 }
  0x52   : > { %695 = vmatpush.msra.mxu0 %v644_v29  ;;  %718 = vmatpush.msra.mxu1 %v645_v30 }
  0x53   : > { %740 = vmatpush.msra.mxu2 %v649_v35 }
  0x54   : > { %696 = vmatpush.msra.mxu0 %v641_v33  ;;  %719 = vmatpush.msra.mxu1 %v642_v34 }
  0x55   : > { %741 = vmatpush.msra.mxu2 %v646_v39 }
  0x56   : > { %697 = vmatpush.msra.mxu0 %v638_v37  ;;  %720 = vmatpush.msra.mxu1 %v639_v38 }
  0x57   : > { %742 = vmatpush.msra.mxu2 %v643_v44 }
  0x58   : > { %698 = vmatpush.msra.mxu0 %v635_v40  ;;  %721 = vmatpush.msra.mxu1 %v636_v41 }
  0x59   : > { %743 = vmatpush.msra.mxu2 %v640_v47 }
  0x5a   : > { %699 = vmatpush.msra.mxu0 %v632_v45  ;;  %722 = vmatpush.msra.mxu1 %v633_v46 }
  0x5b   : > { %744 = vmatpush.msra.mxu2 %v637_v52 }
  0x5c   : > { %700 = vmatpush.msra.mxu0 %v629_v48  ;;  %723 = vmatpush.msra.mxu1 %v630_v49 }
  0x5d   : > { %701 = vmatmul.f32.vlgmr.msra.gmra.mxu0 %v3099_v50  ;;  %724 = vmatmul.f32.vlgmr.msra.gmra.mxu1 %v3099_v50 }
  0x5e   : > { %745 = vmatpush.msra.mxu2 %v634_v54 }
  0x60   : > { %746 = vmatpush.msra.mxu2 %v631_v56 }
  0x61   : > { %747 = vmatmul.f32.vlgmr.msra.gmra.mxu2 %v3099_v50 }
  0x65   : > { %704 = vmatmul.f32.gmra.mxu0 %v3108_v57  ;;  %727 = vmatmul.f32.gmra.mxu1 %v3108_v57 }
  0x69   : > { %750 = vmatmul.f32.gmra.mxu2 %v3108_v57 }
  0xda   : > { %v702_v61 = vpop.f32.mrf.mxu0  ;;  %v725_v62 = vpop.f32.mrf.mxu1 }
  0xdb   : > { %v726_v63 = vadd.f32 %v725_v62, %v680_v59  ;;  %v703_v0 = vadd.f32 %v702_v61, %v679_v60 }
  0xdd   : > { %v756_v1 = vrot.slane %v726_v63, 1  ;;  %v757_v2 = vrot.slane %v726_v63, 2  ;;  %v758_v3 = vrot.slane %v726_v63, 3  ;;  %v759_v4 = vrot.slane %v726_v63, 4 }
  0xde   : > { %v760_v5 = vrot.slane %v726_v63, 5  ;;  %v761_v6 = vrot.slane %v726_v63, 6  ;;  %v762_v7 = vrot.slane %v726_v63, 7  ;;  %v764_v8 = vperm.slane %v726_v63, 0 }
  0xdf   : > { %v765_v9 = vperm.slane %v756_v1, 0  ;;  %v766_v10 = vperm.slane %v757_v2, 0  ;;  %v767_v11 = vperm.slane %v758_v3, 0  ;;  %v768_v12 = vperm.slane %v759_v4, 0  ;;  %v1017_v3 = vld [vmem:[%s4453_s7 + $0x70] sm:$0xff] }
  0xe0   : > { %v769_v13 = vperm.slane %v760_v5, 0  ;;  %v770_v19 = vperm.slane %v761_v6, 0  ;;  %v771_v20 = vperm.slane %v762_v7, 0  ;;  %v3127_v21 = vmul.f32 %v764_v8, %v703_v0 }
  0xe1   : > { %v3121_v14 = vmul.f32 %v765_v9, %v703_v0  ;;  %v3123_v15 = vmul.f32 %v766_v10, %v703_v0  ;;  %v3125_v16 = vmul.f32 %v767_v11, %v703_v0  ;;  %v3129_v24 = vmul.f32 %v768_v12, %v703_v0 }
  0xe2   : > { %v705_v17 = vpop.f32.mrf.mxu0  ;;  %v728_v18 = vpop.f32.mrf.mxu1  ;;  %v3131_v25 = vmul.f32 %v769_v13, %v703_v0  ;;  %v3145_v34 = vmul.f32 %v770_v19, %v703_v0  ;;  %v3147_v35 = vmul.f32 %v771_v20, %v703_v0 }
  0xe3   : > { %v706_v22 = vadd.f32 %v705_v17, %v679_v60  ;;  %v729_v23 = vadd.f32 %v728_v18, %v680_v59  ;;  %v804_v26 = vmax.f32 %v3127_v21, %v3123_v15  ;;  %v805_v27 = vmax.f32 %v3121_v14, %v3125_v16  ;;  %v1018_v60 = vld [vmem:[%s4453_s7 + $0x78] sm:$0xff]  ;;  %v1015_v18 = vld [vmem:[%s4453_s7 + $0x60] sm:$0xff] }
  0xe4   : > { %v748_v48 = vpop.f32.mrf.mxu2  ;;  %1021 = vmatpush.msra.mxu3 %v1018_v60 }
  0xe5   : > { %v763_v28 = vrot.slane %v729_v23, 1  ;;  %v772_v29 = vperm.slane %v729_v23, 0  ;;  %v3137_v30 = vmul.f32 %v764_v8, %v706_v22  ;;  %v3139_v31 = vmul.f32 %v765_v9, %v706_v22  ;;  %v1016_v9 = vld [vmem:[%s4453_s7 + $0x68] sm:$0xff] }
  0xe6   : > { %v3141_v32 = vmul.f32 %v766_v10, %v706_v22  ;;  %v3143_v33 = vmul.f32 %v767_v11, %v706_v22  ;;  %v3149_v37 = vmul.f32 %v768_v12, %v706_v22  ;;  %v3151_v38 = vmul.f32 %v769_v13, %v706_v22  ;;  %1022 = vmatpush.msra.mxu3 %v1017_v3  ;;  %v1007_v3 = vld [vmem:[%s4453_s7 + $0x20] sm:$0xff] }
  0xe7   : > { %v773_v36 = vperm.slane %v763_v28, 0  ;;  %v3153_v39 = vmul.f32 %v770_v19, %v706_v22  ;;  %v3155_v40 = vmul.f32 %v772_v29, %v703_v0  ;;  %v806_v41 = vmax.f32 %v804_v26, %v3129_v24  ;;  %v1014_v19 = vld [vmem:[%s4453_s7 + $0x58] sm:$0xff] }
  0xe8   : > { %v807_v42 = vmax.f32 %v805_v27, %v3131_v25  ;;  %v814_v43 = vsel %vm813_vm0, %v3137_v30, -inf  ;;  %v3161_v44 = vmul.f32 %v771_v20, %v706_v22  ;;  %v815_v46 = vsel %vm813_vm0, %v3139_v31, -inf  ;;  %1023 = vmatpush.msra.mxu3 %v1016_v9 }
  0xe9   : > { %v3163_v45 = vmul.f32 %v773_v36, %v703_v0  ;;  %v816_v47 = vsel %vm813_vm0, %v3141_v32, -inf  ;;  %v808_v49 = vmax.f32 %v806_v41, %v3145_v34  ;;  %v818_v53 = vsel %vm813_vm0, %v3143_v33, -inf }
  0xea   : > { %v809_v51 = vmax.f32 %v807_v42, %v3147_v35  ;;  %v817_v52 = vmax.f32 %v814_v43, %v816_v47  ;;  %v3173_v54 = vmul.f32 %v772_v29, %v706_v22  ;;  %v3175_v55 = vmul.f32 %v773_v36, %v706_v22  ;;  %1024 = vmatpush.msra.mxu3 %v1015_v18  ;;  %v1012_v36 = vld [vmem:[%s4453_s7 + $0x48] sm:$0xff]  ;;  %v1011_v43 = vld [vmem:[%s4453_s7 + $0x40] sm:$0xff] }
  0xeb   : > { %v819_v56 = vmax.f32 %v815_v46, %v818_v53  ;;  %v820_v59 = vsel %vm813_vm0, %v3149_v37, -inf  ;;  %v810_v61 = vmax.f32 %v808_v49, %v3155_v40  ;;  %v822_v0 = vsel %vm813_vm0, %v3151_v38, -inf }
  0xec   : > { %v811_v62 = vmax.f32 %v809_v51, %v3163_v45  ;;  %v821_v63 = vmax.f32 %v817_v52, %v820_v59  ;;  %v824_v2 = vsel %vm813_vm0, %v3153_v39, -inf  ;;  %v826_v6 = vsel %vm813_vm0, %v3161_v44, -inf  ;;  %1025 = vmatpush.msra.mxu3 %v1014_v19  ;;  %v1010_v51 = vld [vmem:[%s4453_s7 + $0x38] sm:$0xff] }
  0xed   : > { %v823_v1 = vmax.f32 %v819_v56, %v822_v0  ;;  %v828_v8 = vsel %vm813_vm0, %v3173_v54, -inf  ;;  %v830_v11 = vsel %vm813_vm0, %v3175_v55, -inf  ;;  %v681_v20 = vperm.slane %v3117_v58, 2  ;;  %v1009_v56 = vld [vmem:[%s4453_s7 + $0x30] sm:$0xff]  ;;  %v1006_v19 = vld [vmem:[%s4453_s7 + $0x18] sm:$0xff] }
  0xee   : > { %v3191_v4 = vmax.f32 %v810_v61, %v811_v62  ;;  %v825_v5 = vmax.f32 %v821_v63, %v824_v2  ;;  %v1008_v61 = vld [vmem:[%s4453_s7 + $0x28] sm:$0xff] }
  0xef   : > { %v827_v7 = vmax.f32 %v823_v1, %v826_v6  ;;  %v3231_v42 = vadd.f32 %v748_v48, %v681_v20 }
  0xf0   : > { %v829_v10 = vmax.f32 %v825_v5, %v828_v8  ;;  %v833_v12 = vsub.f32 %v3127_v21, %v3191_v4  ;;  %v835_v13 = vsub.f32 %v3121_v14, %v3191_v4  ;;  %v751_v21 = vpop.f32.mrf.mxu2  ;;  %v1013_v14 = vld [vmem:[%s4453_s7 + $0x50] sm:$0xff]  ;;  %v837_v26 = vsub.f32 %v3123_v15, %v3191_v4 }
  0xf1   : > { %v831_v17 = vmax.f32 %v827_v7, %v830_v11  ;;  %v839_v29 = vsub.f32 %v3125_v16, %v3191_v4  ;;  %v3233_v15 = vadd.f32 %v751_v21, %v681_v20  ;;  %1026 = vmatpush.msra.mxu3 %v1013_v14  ;;  %v851_v52 = vsub.f32 %v3163_v45, %v3191_v4 }
  0xf2   : > { %v853_v23 = vmul.f32 1.442695, %v833_v12  ;;  %v857_v27 = vmul.f32 1.442695, %v835_v13  ;;  %v861_v47 = vmul.f32 1.442695, %v837_v26 }
  0xf3   : > { %v3213_v22 = vmax.f32 %v829_v10, %v831_v17  ;;  %1027 = vmatpush.msra.mxu3 %v1012_v36  ;;  %v865_v49 = vmul.f32 1.442695, %v839_v29  ;;  %v895_v62 = vrot.slane %v3231_v42, 1  ;;  %v896_v63 = vrot.slane %v3231_v42, 2 }
  0xf4   : > { %2593 = vpow2.f32 %v853_v23  ;;  %v898_v10 = vrot.slane %v3231_v42, 4  ;;  %v903_v11 = vperm.slane %v3231_v42, 0  ;;  %v889_v18 = vmul.f32 1.442695, %v851_v52 }
  0xf5   : > { %v834_v28 = vsub.f32 %v3137_v30, %v3213_v22  ;;  %v836_v58 = vsub.f32 %v3139_v31, %v3213_v22  ;;  %v838_v41 = vsub.f32 %v3141_v32, %v3213_v22  ;;  %v841_v30 = vsub.f32 %v3129_v24, %v3191_v4  ;;  %1028 = vmatpush.msra.mxu3 %v1011_v43  ;;  %v1004_v43 = vld [vmem:[%s4453_s7 + $0x8] sm:$0xff] }
  0xf6   : > { %v843_v31 = vsub.f32 %v3131_v25, %v3191_v4  ;;  %v845_v32 = vsub.f32 %v3145_v34, %v3191_v4  ;;  %2595 = vpow2.f32 %v857_v27  ;;  %v840_v48 = vsub.f32 %v3143_v33, %v3213_v22 }
  0xf7   : > { %v855_v16 = vmul.f32 1.442695, %v834_v28  ;;  %v859_v46 = vmul.f32 1.442695, %v836_v58  ;;  %v847_v24 = vsub.f32 %v3147_v35, %v3191_v4  ;;  %v849_v25 = vsub.f32 %v3155_v40, %v3191_v4  ;;  %1029 = vmatpush.msra.mxu3 %v1010_v51  ;;  %v1005_v28 = vld [vmem:[%s4453_s7 + $0x10] sm:$0xff] }
  0xf8   : > { %v842_v34 = vsub.f32 %v3149_v37, %v3213_v22  ;;  %v863_v53 = vmul.f32 1.442695, %v838_v41  ;;  %v844_v33 = vsub.f32 %v3151_v38, %v3213_v22  ;;  %v869_v35 = vmul.f32 1.442695, %v841_v30 }
  0xf9   : > { %2597 = vpow2.f32 %v855_v16  ;;  %v873_v40 = vmul.f32 1.442695, %v843_v31  ;;  %v846_v59 = vsub.f32 %v3153_v39, %v3213_v22  ;;  %v848_v37 = vsub.f32 %v3161_v44, %v3213_v22  ;;  %1030 = vmatpush.msra.mxu3 %v1009_v56 }
  0xfa   : > { %2599 = vpow2.f32 %v859_v46  ;;  %v850_v45 = vsub.f32 %v3173_v54, %v3213_v22  ;;  %v2594_v60 = vpop.eup %2593  ;;  %v867_v38 = vmul.f32 1.442695, %v840_v48  ;;  %v852_v1 = vsub.f32 %v3175_v55, %v3213_v22  ;;  %v3399_v55 = vld [vmem:[#allocation5 + $0xb0] sm:$0xff]  ;;  %v3401_v22 = vld [vmem:[#allocation5 + $0xb8] sm:$0xff] }
  0xfb   : > { %2601 = vpow2.f32 %v861_v47  ;;  %v871_v2 = vmul.f32 1.442695, %v842_v34  ;;  %v897_v4 = vrot.slane %v3231_v42, 3  ;;  %v875_v5 = vmul.f32 1.442695, %v844_v33  ;;  %1031 = vmatpush.msra.mxu3 %v1008_v61  ;;  %v1003_v34 = vld [vmem:[%s4453_s7] sm:$0xff] }
  0xfc   : > { %2603 = vpow2.f32 %v865_v49  ;;  %v2596_v0 = vpop.eup %2595  ;;  %v877_v6 = vmul.f32 1.442695, %v845_v32  ;;  %v881_v7 = vmul.f32 1.442695, %v847_v24  ;;  %v904_v12 = vperm.slane %v895_v62, 0 }
  0xfd   : > { %2605 = vpow2.f32 %v863_v53  ;;  %v971_v8 = vadd.f32 %v2596_v0, %v2594_v60  ;;  %v885_v17 = vmul.f32 1.442695, %v849_v25  ;;  %v905_v20 = vperm.slane %v896_v63, 0  ;;  %1032 = vmatpush.msra.mxu3 %v1007_v3 }
  0xfe   : > { %2607 = vpow2.f32 %v869_v35  ;;  %v899_v21 = vrot.slane %v3231_v42, 5  ;;  %v906_v14 = vperm.slane %v897_v4, 0  ;;  %v923_v26 = vmul.f32 %v2594_v60, %v903_v11 }
  0xff   : > { %v3279_v9 = vpop.eup %2597  ;;  %2609 = vpow2.f32 %v867_v38  ;;  %v900_v58 = vrot.slane %v3231_v42, 6  ;;  %v925_v29 = vmul.f32 %v2596_v0, %v904_v12  ;;  %1033 = vmatpush.msra.mxu3 %v1006_v19  ;;  %v3295_v30 = vperm.slane %v898_v10, 0  ;;  %v3335_v10 = vld [vmem:[#allocation5 + $0xe0] sm:$0xff]  ;;  %v3343_v19 = vld [vmem:[#allocation5 + $0x1f0] sm:$0xff] }
 0x100   : > { %v3283_v13 = vpop.eup %2599  ;;  %2611 = vpow2.f32 %v873_v40  ;;  %v924_v31 = vmul.f32 %v3279_v9, %v903_v11  ;;  %v901_v24 = vrot.slane %v3231_v42, 7  ;;  %v3303_v25 = vperm.slane %v899_v21, 0  ;;  %1071 = vmatpush.msrb.mxu1 %v3343_v19 }
 0x101   : > { %v2602_v23 = vpop.eup %2601  ;;  %2613 = vpow2.f32 %v871_v2  ;;  %v926_v16 = vmul.f32 %v3283_v13, %v904_v12  ;;  %v943_v46 = vadd.f32 %v925_v29, %v923_v26  ;;  %1034 = vmatpush.msra.mxu3 %v1005_v28  ;;  %v879_v42 = vmul.f32 1.442695, %v846_v59  ;;  %v3354_v28 = vld [vmem:[#allocation5 + $0xd0] sm:$0xff]  ;;  %v3358_v29 = vld [vmem:[#allocation5 + $0xd8] sm:$0xff] }
 0x102   : > { %v2604_v27 = vpop.eup %2603  ;;  %v972_v36 = vadd.f32 %v2602_v23, %v971_v8  ;;  %2615 = vpow2.f32 %v877_v6  ;;  %v927_v32 = vmul.f32 %v2602_v23, %v905_v20  ;;  %v952_v35 = vsel %vm813_vm0, %v924_v31, 0.0  ;;  %v3333_v8 = vld [vmem:[#allocation5 + $0xf8] sm:$0xff] }
 0x103   : > { %v3293_v41 = vpop.eup %2605  ;;  %2617 = vpow2.f32 %v881_v7  ;;  %v929_v49 = vmul.f32 %v2604_v27, %v906_v14  ;;  %v3318_v56 = vmul.f32 1.442695, %v848_v37  ;;  %1035 = vmatpush.msra.mxu3 %v1004_v43  ;;  %v953_v60 = vsel %vm813_vm0, %v926_v16, 0.0  ;;  %v3331_v7 = vld [vmem:[#allocation5 + $0xf0] sm:$0xff]  ;;  %1094 = vmatpush.msrb.mxu2 %v3333_v8  ;;  %v3347_v23 = vld [vmem:[#allocation5 + $0x1f8] sm:$0xff] }
 0x104   : > { %v973_v47 = vadd.f32 %v2604_v27, %v972_v36  ;;  %v2608_v48 = vpop.eup %2607  ;;  %2619 = vpow2.f32 %v875_v5  ;;  %v944_v52 = vadd.f32 %v943_v46, %v927_v32  ;;  %v928_v33 = vmul.f32 %v3293_v41, %v905_v20  ;;  %1048 = vmatpush.msrb.mxu0 %v3331_v7  ;;  %v3345_v20 = vld [vmem:[#allocation5 + $0xe8] sm:$0xff]  ;;  %v3370_v46 = vld [vmem:[#allocation5 + $0x1d0] sm:$0xff] }
 0x105   : > { %v3305_v51 = vpop.eup %2609  ;;  %2621 = vpow2.f32 %v885_v17  ;;  %v3323_v61 = vperm.slane %v900_v58, 0  ;;  %v931_v62 = vmul.f32 %v2608_v48, %v3295_v30  ;;  %1036 = vmatpush.msra.mxu3 %v1003_v34  ;;  %v3326_v39 = vperm.slane %v901_v24, 0  ;;  %v3356_v58 = vld [vmem:[#allocation5 + $0x1e0] sm:$0xff]  ;;  %1095 = vmatpush.msrb.mxu2 %v3345_v20  ;;  %v3368_v32 = vld [vmem:[#allocation5 + $0x1e8] sm:$0xff]  ;;  %v3381_v34 = vld [vmem:[#allocation5 + $0x1d8] sm:$0xff] }
 0x106   : > { %v974_v53 = vadd.f32 %v2608_v48, %v973_v47  ;;  %v2612_v40 = vpop.eup %2611  ;;  %v945_v63 = vadd.f32 %v944_v52, %v929_v49  ;;  %2623 = vpow2.f32 %v889_v18  ;;  %v930_v44 = vmul.f32 %v3305_v51, %v906_v14  ;;  %1049 = vmatpush.msrb.mxu0 %v3335_v10  ;;  %1072 = vmatpush.msrb.mxu1 %v3356_v58  ;;  %v3379_v49 = vld [vmem:[#allocation5 + $0xc8] sm:$0xff] }
 0x107   : > { %v3321_v38 = vpop.eup %2613  ;;  %v954_v59 = vadd.f32 %v953_v60, %v952_v35  ;;  %v933_v3 = vmul.f32 %v2612_v40, %v3303_v25  ;;  %v955_v6 = vsel %vm813_vm0, %v928_v33, 0.0  ;;  %2625 = vpow2.f32 %v879_v42  ;;  %1117 = vmatpush.msrb.mxu3 %v3347_v23  ;;  %1096 = vmatpush.msrb.mxu2 %v3358_v29  ;;  %v3390_v33 = vld [vmem:[#allocation5 + $0x1c0] sm:$0xff]  ;;  %v3392_v35 = vld [vmem:[#allocation5 + $0x1c8] sm:$0xff] }
 0x108   : > { %v975_v0 = vadd.f32 %v2612_v40, %v974_v53  ;;  %v2616_v2 = vpop.eup %2615  ;;  %v946_v4 = vadd.f32 %v945_v63, %v931_v62  ;;  %v902_v12 = vrot.slane %v3233_v15, 1  ;;  %v911_v17 = vperm.slane %v3233_v15, 0  ;;  %1050 = vmatpush.msrb.mxu0 %v3354_v28  ;;  %1073 = vmatpush.msrb.mxu1 %v3370_v46  ;;  %v3503_v15 = vld [vmem:[#allocation5 + $0x40] sm:$0xff] }
 0x109   : > { %v2618_v37 = vpop.eup %2617  ;;  %v956_v18 = vadd.f32 %v955_v6, %v954_v59  ;;  %v935_v21 = vmul.f32 %v2616_v2, %v3323_v61  ;;  %v980_v27 = vsel %vm813_vm0, %v3279_v9, 0.0  ;;  %v932_v16 = vmul.f32 %v3321_v38, %v3295_v30  ;;  %1118 = vmatpush.msrb.mxu3 %v3368_v32  ;;  %1097 = vmatpush.msrb.mxu2 %v3379_v49  ;;  %v3426_v6 = vld [vmem:[#allocation5 + $0x1a8] sm:$0xff] }
 0x10a   : > { %v976_v5 = vadd.f32 %v2616_v2, %v975_v0  ;;  %v3337_v11 = vpop.eup %2619  ;;  %v947_v14 = vadd.f32 %v946_v4, %v933_v3  ;;  %v937_v31 = vmul.f32 %v2618_v37, %v3326_v39  ;;  %v957_v43 = vsel %vm813_vm0, %v930_v44, 0.0  ;;  %v3412_v2 = vld [vmem:[#allocation5 + $0x1b8] sm:$0xff]  ;;  %1074 = vmatpush.msrb.mxu1 %v3390_v33  ;;  %4526 = vst [vmem:[#allocation16_spill] sm:$0xff] %v3426_v6 }
 0x10b   : > { %v2622_v36 = vpop.eup %2621  ;;  %v981_v9 = vsel %vm813_vm0, %v3283_v13, 0.0  ;;  %v887_v47 = vmul.f32 1.442695, %v850_v45  ;;  %v958_v30 = vadd.f32 %v957_v43, %v956_v18  ;;  %v3377_v13 = vld [vmem:[#allocation5 + $0xc0] sm:$0xff]  ;;  %v891_v53 = vmul.f32 1.442695, %v852_v1  ;;  %1119 = vmatpush.msrb.mxu3 %v3381_v34  ;;  %1098 = vmatpush.msrb.mxu2 %v3401_v22 }
 0x10c   : > { %v977_v26 = vadd.f32 %v2618_v37, %v976_v5  ;;  %v948_v48 = vadd.f32 %v947_v14, %v935_v21  ;;  %v2624_v52 = vpop.eup %2623  ;;  %v3386_v54 = vperm.slane %v902_v12, 0  ;;  %v982_v45 = vadd.f32 %v981_v9, %v980_v27  ;;  %1051 = vmatpush.msrb.mxu0 %v3377_v13  ;;  %v3420_v37 = vld [vmem:[#allocation5 + $0xa8] sm:$0xff]  ;;  %v3424_v5 = vld [vmem:[#allocation5 + $0x1a0] sm:$0xff]  ;;  %v3432_v12 = vld [vmem:[#allocation5 + $0x90] sm:$0xff] }
 0x10d   : > { %2627 = vpow2.f32 %v3318_v56  ;;  %v983_v60 = vsel %vm813_vm0, %v3293_v41, 0.0  ;;  %v2626_v1 = vpop.eup %2625  ;;  %v939_v62 = vmul.f32 %v2622_v36, %v911_v17  ;;  %v934_v56 = vmul.f32 %v3337_v11, %v3303_v25  ;;  %v3410_v41 = vld [vmem:[#allocation5 + $0x1b0] sm:$0xff]  ;;  %1120 = vmatpush.msrb.mxu3 %v3392_v35  ;;  %v3418_v25 = vld [vmem:[#allocation5 + $0xa0] sm:$0xff]  ;;  %4525 = vst [vmem:[#allocation15_spill] sm:$0xff] %v3420_v37  ;;  %v3434_v18 = vld [vmem:[#allocation5 + $0x98] sm:$0xff]  ;;  %1099 = vmatpush.msrb.mxu2 %v3420_v37 }
 0x10e   : > { %v978_v24 = vadd.f32 %v2622_v36, %v977_v26  ;;  %v949_v40 = vadd.f32 %v948_v48, %v937_v31  ;;  %v959_v63 = vsel %vm813_vm0, %v932_v16, 0.0  ;;  %v984_v0 = vadd.f32 %v983_v60, %v982_v45  ;;  %1052 = vmatpush.msrb.mxu0 %v3399_v55  ;;  %1075 = vmatpush.msrb.mxu1 %v3410_v41  ;;  %v3443_v36 = vld [vmem:[#allocation5 + $0x198] sm:$0xff]  ;;  %v3451_v9 = vld [vmem:[#allocation5 + $0x88] sm:$0xff] }
 0x10f   : > { %v960_v44 = vadd.f32 %v959_v63, %v958_v30  ;;  %v985_v59 = vsel %vm813_vm0, %v3305_v51, 0.0  ;;  %v987_v51 = vsel %vm813_vm0, %v3321_v38, 0.0  ;;  %1121 = vmatpush.msrb.mxu3 %v3412_v2  ;;  %4527 = vst [vmem:[#allocation17_spill] sm:$0xff] %v3434_v18  ;;  %v941_v21 = vmul.f32 %v2624_v52, %v3386_v54  ;;  %v3441_v38 = vld [vmem:[#allocation5 + $0x190] sm:$0xff]  ;;  %1100 = vmatpush.msrb.mxu2 %v3434_v18  ;;  %v3457_v30 = vld [vmem:[#allocation5 + $0x188] sm:$0xff] }
 0x110   : > { %v979_v42 = vadd.f32 %v2624_v52, %v978_v24  ;;  %v950_v3 = vadd.f32 %v949_v40, %v939_v62  ;;  %v986_v4 = vadd.f32 %v985_v59, %v984_v0  ;;  %v936_v14 = vmul.f32 %v2626_v1, %v3323_v61  ;;  %1053 = vmatpush.msrb.mxu0 %v3418_v25  ;;  %v3449_v61 = vld [vmem:[#allocation5 + $0x80] sm:$0xff]  ;;  %v3477_v59 = vld [vmem:[#allocation5 + $0x178] sm:$0xff] }
 0x111   : > { %v961_v26 = vsel %vm813_vm0, %v934_v56, 0.0  ;;  %4528 = vst [vmem:[#allocation18_spill] sm:$0xff] %v3443_v36  ;;  %v989_v43 = vsel %vm813_vm0, %v3337_v11, 0.0  ;;  %1076 = vmatpush.msrb.mxu1 %v3424_v5  ;;  %1122 = vmatpush.msrb.mxu3 %v3426_v6  ;;  %v3455_v24 = vld [vmem:[#allocation5 + $0x180] sm:$0xff]  ;;  %v991_v11 = vsel %vm813_vm0, %v2626_v1, 0.0  ;;  %v3468_v56 = vld [vmem:[#allocation5 + $0x78] sm:$0xff] }
 0x112   : > { %2629 = vrcp.f32 %v979_v42  ;;  %v988_v27 = vadd.f32 %v987_v51, %v986_v4  ;;  %v962_v16 = vadd.f32 %v961_v26, %v960_v44  ;;  %4529 = vst [vmem:[#allocation19_spill] sm:$0xff] %v3451_v9  ;;  %1054 = vmatpush.msrb.mxu0 %v3432_v12  ;;  %v963_v60 = vsel %vm813_vm0, %v936_v14, 0.0  ;;  %1101 = vmatpush.msrb.mxu2 %v3451_v9  ;;  %v3470_v1 = vld [vmem:[#allocation5 + $0x170] sm:$0xff]  ;;  %v3480_v4 = vld [vmem:[#allocation5 + $0x68] sm:$0xff]  ;;  %v3482_v51 = vld [vmem:[#allocation5 + $0x160] sm:$0xff] }
 0x113   : > { %2631 = vpow2.f32 %v887_v47  ;;  %v2628_v31 = vpop.eup %2627  ;;  %v951_v47 = vadd.f32 %v950_v3, %v941_v21  ;;  %4530 = vst [vmem:[#allocation20_spill] sm:$0xff] %v3457_v30  ;;  %1077 = vmatpush.msrb.mxu1 %v3441_v38  ;;  %1123 = vmatpush.msrb.mxu3 %v3443_v36  ;;  %v3487_v14 = vld [vmem:[#allocation5 + $0x50] sm:$0xff]  ;;  %v3489_v26 = vld [vmem:[#allocation5 + $0x168] sm:$0xff]  ;;  %v1185_v36 = vld [vmem:[#allocation7 + $0x38] sm:$0xff] }
 0x114   : > { %2633 = vpow2.f32 %v891_v53  ;;  %v990_v48 = vadd.f32 %v989_v43, %v988_v27  ;;  %v3462_v53 = vld [vmem:[#allocation5 + $0x70] sm:$0xff]  ;;  %v938_v42 = vmul.f32 %v2628_v31, %v3326_v39  ;;  %1055 = vmatpush.msrb.mxu0 %v3449_v61  ;;  %4531 = vst [vmem:[#allocation21_spill] sm:$0xff] %v3468_v56  ;;  %v964_v0 = vadd.f32 %v963_v60, %v962_v16  ;;  %v3475_v39 = vld [vmem:[#allocation5 + $0x60] sm:$0xff]  ;;  %v3496_v43 = vld [vmem:[#allocation5 + $0x58] sm:$0xff] }
 0x115   : > { %v993_v44 = vsel %vm813_vm0, %v2628_v31, 0.0  ;;  %1078 = vmatpush.msrb.mxu1 %v3455_v24  ;;  %1124 = vmatpush.msrb.mxu3 %v3457_v30  ;;  %4532 = vst [vmem:[#allocation22_spill] sm:$0xff] %v3477_v59  ;;  %v3517_v60 = vld [vmem:[#allocation5 + $0x148] sm:$0xff]  ;;  %v1184_v9 = vld [vmem:[#allocation7 + $0x30] sm:$0xff] }
 0x116   : > { %v992_v62 = vadd.f32 %v991_v11, %v990_v48  ;;  %1056 = vmatpush.msrb.mxu0 %v3462_v53  ;;  %4533 = vst [vmem:[#allocation23_spill] sm:$0xff] %v3480_v4  ;;  %1102 = vmatpush.msrb.mxu2 %v3468_v56  ;;  %v965_v31 = vsel %vm813_vm0, %v938_v42, 0.0  ;;  %v3515_v42 = vld [vmem:[#allocation5 + $0x30] sm:$0xff]  ;;  %v1191_v30 = vld [vmem:[#allocation7 + $0x68] sm:$0xff] }
 0x117   : > { %1079 = vmatpush.msrb.mxu1 %v3470_v1  ;;  %4534 = vst [vmem:[#allocation24_spill] sm:$0xff] %v3489_v26  ;;  %1125 = vmatpush.msrb.mxu3 %v3477_v59  ;;  %v966_v48 = vadd.f32 %v965_v31, %v964_v0  ;;  %v3531_v31 = vld [vmem:[#allocation5 + $0x20] sm:$0xff] }
 0x118   : > { %v2630_v52 = vpop.eup %2629  ;;  %v994_v3 = vadd.f32 %v993_v44, %v992_v62  ;;  %1057 = vmatpush.msrb.mxu0 %v3475_v39  ;;  %4535 = vst [vmem:[#allocation25_spill] sm:$0xff] %v3496_v43  ;;  %1103 = vmatpush.msrb.mxu2 %v3480_v4  ;;  %v3523_v44 = vld [vmem:[#allocation5 + $0x38] sm:$0xff]  ;;  %v1198_v4 = vld [vmem:[#allocation7 + $0xa0] sm:$0xff] }
 0x119   : > { %v2632_v45 = vpop.eup %2631  ;;  %v1001_v40 = vmul.f32 %v2630_v52, %v951_v47  ;;  %v3498_v47 = vld [vmem:[#allocation5 + $0x150] sm:$0xff]  ;;  %1080 = vmatpush.msrb.mxu1 %v3482_v51  ;;  %1126 = vmatpush.msrb.mxu3 %v3489_v26  ;;  %4538 = vst [vmem:[#allocation28_spill] sm:$0xff] %v3517_v60  ;;  %v1201_v26 = vld [vmem:[#allocation7 + $0xb8] sm:$0xff] }
 0x11a   : > { %v2634_v63 = vpop.eup %2633  ;;  %v995_v21 = vsel %vm813_vm0, %v2632_v45, 0.0  ;;  %v940_v27 = vmul.f32 %v2632_v45, %v911_v17  ;;  %v3505_v17 = vld [vmem:[#allocation5 + $0x158] sm:$0xff]  ;;  %1058 = vmatpush.msrb.mxu0 %v3487_v14  ;;  %v3509_v45 = vld [vmem:[#allocation5 + $0x48] sm:$0xff]  ;;  %1104 = vmatpush.msrb.mxu2 %v3496_v43  ;;  %4539 = vst [vmem:[#allocation29_spill] sm:$0xff] %v3523_v44  ;;  %v1200_v43 = vld [vmem:[#allocation7 + $0xb0] sm:$0xff] }
 0x11b   : > { %1037 = vmatmul.f32.vlgmr.msra.gmra.mxu3 %v1001_v40  ;;  %v996_v16 = vadd.f32 %v995_v21, %v994_v3  ;;  %v997_v52 = vsel %vm813_vm0, %v2634_v63, 0.0  ;;  %4536 = vst [vmem:[#allocation26_spill] sm:$0xff] %v3505_v17  ;;  %v3511_v40 = vld [vmem:[#allocation5 + $0x140] sm:$0xff]  ;;  %1081 = vmatpush.msrb.mxu1 %v3498_v47  ;;  %v942_v62 = vmul.f32 %v2634_v63, %v3386_v54 }
 0x11c   : > { %4537 = vst [vmem:[#allocation27_spill] sm:$0xff] %v3509_v45  ;;  %v967_v0 = vsel %vm813_vm0, %v940_v27, 0.0  ;;  %1059 = vmatpush.msrb.mxu0 %v3503_v15  ;;  %1127 = vmatpush.msrb.mxu3 %v3505_v17  ;;  %v1206_v17 = vld [vmem:[#allocation7 + $0xe0] sm:$0xff] }
 0x11d   : > { %v998_v11 = vadd.f32 %v997_v52, %v996_v16  ;;  %v968_v3 = vadd.f32 %v967_v0, %v966_v48  ;;  %1105 = vmatpush.msrb.mxu2 %v3509_v45  ;;  %1082 = vmatpush.msrb.mxu1 %v3511_v40  ;;  %v969_v54 = vsel %vm813_vm0, %v942_v62, 0.0  ;;  %v3533_v16 = vld [vmem:[#allocation5 + $0x130] sm:$0xff]  ;;  %v3535_v48 = vld [vmem:[#allocation5 + $0x28] sm:$0xff]  ;;  %v3539_v52 = vld [vmem:[#allocation5 + $0x138] sm:$0xff] }
 0x11e   : > { %1060 = vmatpush.msrb.mxu0 %v3515_v42  ;;  %1128 = vmatpush.msrb.mxu3 %v3517_v60  ;;  %4540 = vst [vmem:[#allocation30_spill] sm:$0xff] %v3535_v48  ;;  %v3543_v0 = vld [vmem:[#allocation5 + $0x120] sm:$0xff]  ;;  %v3547_v62 = vld [vmem:[#allocation5 + $0x18] sm:$0xff] }
 0x11f   : > { %2635 = vrcp.f32 %v998_v11  ;;  %1106 = vmatpush.msrb.mxu2 %v3523_v44  ;;  %v970_v63 = vadd.f32 %v969_v54, %v968_v3  ;;  %1083 = vmatpush.msrb.mxu1 %v3533_v16  ;;  %4541 = vst [vmem:[#allocation31_spill] sm:$0xff] %v3539_v52  ;;  %v3541_v11 = vld [vmem:[#allocation5 + $0x10] sm:$0xff]  ;;  %v3549_v3 = vld [vmem:[#allocation5 + $0x128] sm:$0xff]  ;;  %v3551_v54 = vld [vmem:[#allocation5] sm:$0xff] }
 0x120   : > { %1061 = vmatpush.msrb.mxu0 %v3531_v31  ;;  %1129 = vmatpush.msrb.mxu3 %v3539_v52  ;;  %4542 = vst [vmem:[#allocation32_spill] sm:$0xff] %v3547_v62  ;;  %v3567_v52 = vld [vmem:[#allocation5 + $0x108] sm:$0xff] }
 0x121   : > { %1107 = vmatpush.msrb.mxu2 %v3535_v48  ;;  %4543 = vst [vmem:[#allocation33_spill] sm:$0xff] %v3549_v3  ;;  %1084 = vmatpush.msrb.mxu1 %v3543_v0  ;;  %v3563_v48 = vld [vmem:[#allocation5 + $0x100] sm:$0xff] }
 0x122   : > { %1062 = vmatpush.msrb.mxu0 %v3541_v11  ;;  %1130 = vmatpush.msrb.mxu3 %v3549_v3  ;;  %4546 = vst [vmem:[#allocation36_spill] sm:$0xff] %v3567_v52 }
 0x123   : > { %1108 = vmatpush.msrb.mxu2 %v3547_v62  ;;  %v2587_v62 = vld [vmem:[%s4457_s11] ss:$0 sm:$0xff] }
 0x124   : > { %1063 = vmatpush.msrb.mxu0 %v3551_v54 }
 0x125   : > { %v2636_v21 = vpop.eup %2635 }
 0x126   : > { %v1002_v27 = vmul.f32 %v2636_v21, %v970_v63  ;;  %v3555_v63 = vld [vmem:[#allocation5 + $0x110] sm:$0xff]  ;;  %v3557_v21 = vld [vmem:[#allocation5 + $0x8] sm:$0xff] }
 0x127   : > { %4544 = vst [vmem:[#allocation34_spill] sm:$0xff] %v3557_v21  ;;  %1085 = vmatpush.msrb.mxu1 %v3555_v63  ;;  %1109 = vmatpush.msrb.mxu2 %v3557_v21 }
 0x128   : > { %1040 = vmatmul.f32.gmra.mxu3 %v1002_v27  ;;  %v3559_v27 = vld [vmem:[#allocation5 + $0x118] sm:$0xff] }
 0x129   : > { %4545 = vst [vmem:[#allocation35_spill] sm:$0xff] %v3559_v27  ;;  %1131 = vmatpush.msrb.mxu3 %v3559_v27  ;;  %1086 = vmatpush.msrb.mxu1 %v3563_v48 }
 0x12b   : > { %1132 = vmatpush.msrb.mxu3 %v3567_v52 }
 0x19e   : > { %v1038_v3 = vpop.f32.mrf.mxu3 }
 0x19f   : > { %v1039_v44 = vadd.f32 %v2587_v62, %v1038_v3  ;;  %v1209_v3 = vld [vmem:[#allocation7 + $0xf8] sm:$0xff] }
 0x1a0   : > { %1239 = vmatpush.msra.mxu1 %v1209_v3 }
 0x1a1   : > { %v3577_v60 = vadd.f32 %v1039_v44, %v3099_v50  ;;  %v1208_v44 = vld [vmem:[#allocation7 + $0xf0] sm:$0xff] }
 0x1a2   : > { %1216 = vmatpush.msra.mxu0 %v1208_v44  ;;  %v1199_v44 = vld [vmem:[#allocation7 + $0xa8] sm:$0xff] }
 0x1a3   : > { %1064 = vmatmul.f32.vlgmr.msrb.gmra.mxu0 %v3577_v60  ;;  %1110 = vmatmul.f32.vlgmr.msrb.gmra.mxu2 %v3577_v60  ;;  %v1046_v21 = vmul.f32 %v3577_v60, %v3577_v60 }
 0x1a4   : > { %1217 = vmatpush.msra.mxu0 %v1206_v17  ;;  %v1196_v17 = vld [vmem:[#allocation7 + $0x90] sm:$0xff] }
 0x1a5   : > { %1087 = vmatmul.f32.vlgmr.msrb.gmra.mxu1 %v1046_v21  ;;  %1133 = vmatmul.f32.vlgmr.msrb.gmra.mxu3 %v1046_v21  ;;  %v1207_v21 = vld [vmem:[#allocation7 + $0xe8] sm:$0xff] }
 0x1a6   : > { %1240 = vmatpush.msra.mxu1 %v1207_v21  ;;  %v1197_v21 = vld [vmem:[#allocation7 + $0x98] sm:$0xff] }
 0x1ab   : > { %v1041_v27 = vpop.f32.mrf.mxu3 }
 0x1ac   : > { %v1042_v52 = vadd.f32 %v2587_v62, %v1041_v27  ;;  %v1204_v62 = vld [vmem:[#allocation7 + $0xd0] sm:$0xff]  ;;  %v1203_v27 = vld [vmem:[#allocation7 + $0xc8] sm:$0xff] }
 0x1ad   : > { %1218 = vmatpush.msra.mxu0 %v1204_v62  ;;  %v1194_v62 = vld [vmem:[#allocation7 + $0x80] sm:$0xff] }
 0x1ae   : > { %v3584_v45 = vadd.f32 %v1042_v52, %v3108_v57  ;;  %v1205_v57 = vld [vmem:[#allocation7 + $0xd8] sm:$0xff]  ;;  %v1202_v52 = vld [vmem:[#allocation7 + $0xc0] sm:$0xff] }
 0x1af   : > { %1241 = vmatpush.msra.mxu1 %v1205_v57  ;;  %1219 = vmatpush.msra.mxu0 %v1202_v52  ;;  %v1195_v57 = vld [vmem:[#allocation7 + $0x88] sm:$0xff] }
 0x1b0   : > { %1067 = vmatmul.f32.gmra.mxu0 %v3584_v45  ;;  %1113 = vmatmul.f32.gmra.mxu2 %v3584_v45  ;;  %v1047_v50 = vmul.f32 %v3584_v45, %v3584_v45 }
 0x1b1   : > { %1242 = vmatpush.msra.mxu1 %v1203_v27  ;;  %1220 = vmatpush.msra.mxu0 %v1200_v43  ;;  %v1192_v43 = vld [vmem:[#allocation7 + $0x70] sm:$0xff] }
 0x1b2   : > { %1090 = vmatmul.f32.gmra.mxu1 %v1047_v50  ;;  %1136 = vmatmul.f32.gmra.mxu3 %v1047_v50 }
 0x1b3   : > { %1243 = vmatpush.msra.mxu1 %v1201_v26  ;;  %1221 = vmatpush.msra.mxu0 %v1198_v4  ;;  %v1193_v26 = vld [vmem:[#allocation7 + $0x78] sm:$0xff] }
 0x1b5   : > { %1244 = vmatpush.msra.mxu1 %v1199_v44  ;;  %1222 = vmatpush.msra.mxu0 %v1196_v17  ;;  %v1190_v44 = vld [vmem:[#allocation7 + $0x60] sm:$0xff]  ;;  %v1189_v17 = vld [vmem:[#allocation7 + $0x58] sm:$0xff] }
 0x1b7   : > { %1245 = vmatpush.msra.mxu1 %v1197_v21  ;;  %1223 = vmatpush.msra.mxu0 %v1194_v62  ;;  %v1186_v62 = vld [vmem:[#allocation7 + $0x40] sm:$0xff] }
 0x1b9   : > { %1246 = vmatpush.msra.mxu1 %v1195_v57  ;;  %1224 = vmatpush.msra.mxu0 %v1192_v43  ;;  %v1187_v57 = vld [vmem:[#allocation7 + $0x48] sm:$0xff] }
 0x1bb   : > { %1247 = vmatpush.msra.mxu1 %v1193_v26  ;;  %1225 = vmatpush.msra.mxu0 %v1190_v44  ;;  %v1178_v44 = vld [vmem:[#allocation7] sm:$0xff] }
 0x1bd   : > { %1248 = vmatpush.msra.mxu1 %v1191_v30  ;;  %v1180_v30 = vld [vmem:[#allocation7 + $0x10] sm:$0xff] }
 0x1bf   : > { %1249 = vmatpush.msra.mxu1 %v1189_v17 }
 0x1c1   : > { %1250 = vmatpush.msra.mxu1 %v1187_v57  ;;  %v1297_v57 = vld [vmem:[#allocation8 + $0xf8] sm:$0xff] }
 0x1c2   : > { %1323 = vmatpush.msra.mxu3 %v1297_v57  ;;  %v3615_v57 = vld [vmem:[%s4457_s11 + $0x2] ss:$0 sm:$0xff] }
 0x1c3   : > { %1251 = vmatpush.msra.mxu1 %v1185_v36  ;;  %v1280_v36 = vld [vmem:[#allocation8 + $0x70] sm:$0xff] }
 0x220   : > { %v1065_v3 = vpop.f32.mrf.mxu0 }
 0x222   : > { %v1088_v50 = vpop.f32.mrf.mxu1 }
 0x223   : > { %v3590_v59 = vadd.f32 %v1088_v50, %v1065_v3  ;;  %v1188_v3 = vld [vmem:[#allocation7 + $0x50] sm:$0xff] }
 0x224   : > { %1226 = vmatpush.msra.mxu0 %v1188_v3 }
 0x225   : > { %v1140_v56 = vmul.f32 %v3590_v59, %v3590_v59 }
 0x226   : > { %v1111_v52 = vpop.f32.mrf.mxu2  ;;  %1227 = vmatpush.msra.mxu0 %v1186_v62  ;;  %v1281_v62 = vld [vmem:[#allocation8 + $0x78] sm:$0xff] }
 0x227   : > { %1300 = vmatpush.msra.mxu2 %v1281_v62  ;;  %v1293_v62 = vld [vmem:[#allocation8 + $0xd8] sm:$0xff] }
 0x228   : > { %v1134_v27 = vpop.f32.mrf.mxu3  ;;  %1228 = vmatpush.msra.mxu0 %v1184_v9  ;;  %v1296_v9 = vld [vmem:[#allocation8 + $0xf0] sm:$0xff] }
 0x229   : > { %v1135_v4 = vadd.f32 %v1134_v27, %v1111_v52  ;;  %v1182_v52 = vld [vmem:[#allocation7 + $0x20] sm:$0xff]  ;;  %v1183_v27 = vld [vmem:[#allocation7 + $0x28] sm:$0xff]  ;;  %1301 = vmatpush.msra.mxu2 %v1280_v36  ;;  %1324 = vmatpush.msra.mxu3 %v1296_v9  ;;  %v1144_v36 = vsub.f32 %v3577_v60, %v3590_v59  ;;  %v1276_v9 = vld [vmem:[#allocation8 + $0x50] sm:$0xff] }
 0x22a   : > { %1229 = vmatpush.msra.mxu0 %v1182_v52  ;;  %1252 = vmatpush.msra.mxu1 %v1183_v27  ;;  %v1274_v60 = vld [vmem:[#allocation8 + $0x40] sm:$0xff] }
 0x22b   : > { %v1142_v50 = vsub.f32 %v1135_v4, %v1140_v56  ;;  %v1181_v56 = vld [vmem:[#allocation7 + $0x18] sm:$0xff] }
 0x22c   : > { %1230 = vmatpush.msra.mxu0 %v1180_v30  ;;  %1253 = vmatpush.msra.mxu1 %v1181_v56  ;;  %v1295_v30 = vld [vmem:[#allocation8 + $0xe8] sm:$0xff] }
 0x22d   : > { %v3594_v21 = vadd.f32 1e-05, %v1142_v50  ;;  %v1068_v26 = vpop.f32.mrf.mxu0  ;;  %v1179_v50 = vld [vmem:[#allocation7 + $0x8] sm:$0xff]  ;;  %1325 = vmatpush.msra.mxu3 %v1295_v30 }
 0x22e   : > { %1231 = vmatpush.msra.mxu0 %v1178_v44  ;;  %1254 = vmatpush.msra.mxu1 %v1179_v50  ;;  %v1278_v44 = vld [vmem:[#allocation8 + $0x60] sm:$0xff]  ;;  %v1275_v30 = vld [vmem:[#allocation8 + $0x48] sm:$0xff] }
 0x22f   : > { %2637 = vrsqrt.f32 %v3594_v21  ;;  %v1091_v43 = vpop.f32.mrf.mxu1  ;;  %v1294_v50 = vld [vmem:[#allocation8 + $0xe0] sm:$0xff]  ;;  %vm1154_vm2 = vweird.f32 %v3594_v21 }
 0x230   : > { %v3597_v4 = vadd.f32 %v1091_v43, %v1068_v26  ;;  %v1279_v43 = vld [vmem:[#allocation8 + $0x68] sm:$0xff]  ;;  %1350 = vmatpush.msrb.mxu0 %v3331_v7  ;;  %1373 = vmatpush.msrb.mxu1 %v3343_v19 }
 0x231   : > { %1302 = vmatpush.msra.mxu2 %v1279_v43  ;;  %1326 = vmatpush.msra.mxu3 %v1294_v50  ;;  %v3625_v43 = vld [vmem:[%s4457_s11 + $0x3] ss:$0 sm:$0xff] }
 0x232   : > { %v1141_v52 = vmul.f32 %v3597_v4, %v3597_v4  ;;  %1351 = vmatpush.msrb.mxu0 %v3335_v10  ;;  %1374 = vmatpush.msrb.mxu1 %v3356_v58 }
 0x233   : > { %v1114_v18 = vpop.f32.mrf.mxu2  ;;  %1303 = vmatpush.msra.mxu2 %v1278_v44  ;;  %1327 = vmatpush.msra.mxu3 %v1293_v62 }
 0x234   : > { %1352 = vmatpush.msrb.mxu0 %v3354_v28  ;;  %1375 = vmatpush.msrb.mxu1 %v3370_v46 }
 0x235   : > { %v2638_v3 = vpop.eup %2637  ;;  %v1137_v6 = vpop.f32.mrf.mxu3 }
 0x236   : > { %v1149_v17 = vmul.f32 %v2638_v3, %v3594_v21  ;;  %v1138_v27 = vadd.f32 %v1137_v6, %v1114_v18  ;;  %vm1155_vm1 = vweird.f32 %v2638_v3  ;;  %v1277_v18 = vld [vmem:[#allocation8 + $0x58] sm:$0xff]  ;;  %1353 = vmatpush.msrb.mxu0 %v3377_v13  ;;  %1376 = vmatpush.msrb.mxu1 %v3390_v33 }
 0x237   : > { %vm1156_vm3 = vmor %vm1154_vm2, %vm1155_vm1  ;;  %1304 = vmatpush.msra.mxu2 %v1277_v18  ;;  %v1289_v18 = vld [vmem:[#allocation8 + $0xb8] sm:$0xff]  ;;  %vm1889_vm1 = vcmask 1040384  }
 0x238   : > { %v1150_v37 = vmul.f32 %v2638_v3, %v1149_v17  ;;  %v1143_v26 = vsub.f32 %v1138_v27, %v1141_v52  ;;  %v1292_v52 = vld [vmem:[#allocation8 + $0xd0] sm:$0xff]  ;;  %1354 = vmatpush.msrb.mxu0 %v3399_v55  ;;  %1377 = vmatpush.msrb.mxu1 %v3410_v41 }
 0x239   : > { %1305 = vmatpush.msra.mxu2 %v1276_v9  ;;  %1328 = vmatpush.msra.mxu3 %v1292_v52  ;;  %v1271_v52 = vld [vmem:[#allocation8 + $0x28] sm:$0xff] }
 0x23a   : > { %v1151_v56 = vmul.f32 0.5, %v1150_v37  ;;  %v3606_v6 = vadd.f32 1e-05, %v1143_v26  ;;  %1355 = vmatpush.msrb.mxu0 %v3418_v25  ;;  %1378 = vmatpush.msrb.mxu1 %v3424_v5 }
 0x23b   : > { %1306 = vmatpush.msra.mxu2 %v1275_v30  ;;  %v1270_v30 = vld [vmem:[#allocation8 + $0x20] sm:$0xff] }
 0x23c   : > { %v1152_v17 = vsub.f32 1.5, %v1151_v56  ;;  %2639 = vrsqrt.f32 %v3606_v6  ;;  %v1291_v56 = vld [vmem:[#allocation8 + $0xc8] sm:$0xff]  ;;  %1356 = vmatpush.msrb.mxu0 %v3432_v12  ;;  %1379 = vmatpush.msrb.mxu1 %v3441_v38  ;;  %vm1164_vm5 = vweird.f32 %v3606_v6 }
 0x23d   : > { %1329 = vmatpush.msra.mxu3 %v1291_v56  ;;  %1307 = vmatpush.msra.mxu2 %v1274_v60  ;;  %v1286_v56 = vld [vmem:[#allocation8 + $0xa0] sm:$0xff]  ;;  %v1269_v60 = vld [vmem:[#allocation8 + $0x18] sm:$0xff] }
 0x23e   : > { %v1153_v37 = vmul.f32 %v2638_v3, %v1152_v17  ;;  %v1273_v17 = vld [vmem:[#allocation8 + $0x38] sm:$0xff]  ;;  %1357 = vmatpush.msrb.mxu0 %v3449_v61  ;;  %1380 = vmatpush.msrb.mxu1 %v3455_v24 }
 0x23f   : > { %1308 = vmatpush.msra.mxu2 %v1273_v17 }
 0x240   : > { %v1157_v21 = vsel %vm1156_vm3, %v2638_v3, %v1153_v37  ;;  %v1290_v3 = vld [vmem:[#allocation8 + $0xc0] sm:$0xff]  ;;  %v1272_v37 = vld [vmem:[#allocation8 + $0x30] sm:$0xff]  ;;  %1358 = vmatpush.msrb.mxu0 %v3462_v53  ;;  %1381 = vmatpush.msrb.mxu1 %v3470_v1 }
 0x241   : > { %v1168_v27 = vmul.f32 %v1157_v21, %v1144_v36  ;;  %1330 = vmatpush.msra.mxu3 %v1290_v3  ;;  %v1288_v36 = vld [vmem:[#allocation8 + $0xb0] sm:$0xff]  ;;  %v1287_v21 = vld [vmem:[#allocation8 + $0xa8] sm:$0xff]  ;;  %1309 = vmatpush.msra.mxu2 %v1272_v37  ;;  %v1285_v3 = vld [vmem:[#allocation8 + $0x98] sm:$0xff] }
 0x242   : > { %v2640_v26 = vpop.eup %2639  ;;  %1359 = vmatpush.msrb.mxu0 %v3475_v39  ;;  %1382 = vmatpush.msrb.mxu1 %v3482_v51  ;;  %v1282_v37 = vld [vmem:[#allocation8 + $0x80] sm:$0xff] }
 0x243   : > { %v1172_v59 = vmul.f32 %v3615_v57, %v1168_v27  ;;  %v1159_v44 = vmul.f32 %v2640_v26, %v3606_v6  ;;  %1331 = vmatpush.msra.mxu3 %v1289_v18  ;;  %vm1165_vm4 = vweird.f32 %v2640_v26  ;;  %1310 = vmatpush.msra.mxu2 %v1271_v52  ;;  %v1210_v52 = vld [vmem:[%s4555_s23] ss:$2 sm:$0x3] }
 0x244   : > { %vm1166_vm6 = vmor %vm1164_vm5, %vm1165_vm4  ;;  %1360 = vmatpush.msrb.mxu0 %v3487_v14  ;;  %1383 = vmatpush.msrb.mxu1 %v3498_v47 }
 0x245   : > { %v3634_v50 = vadd.f32 %v3625_v43, %v1172_v59  ;;  %v1160_v62 = vmul.f32 %v2640_v26, %v1159_v44  ;;  %1332 = vmatpush.msra.mxu3 %v1288_v36  ;;  %v1145_v44 = vsub.f32 %v3584_v45, %v3597_v4  ;;  %1311 = vmatpush.msra.mxu2 %v1270_v30  ;;  %v1268_v4 = vld [vmem:[#allocation8 + $0x10] sm:$0xff]  ;;  %v4547_v36 = vld [vmem:[#allocation15_spill] sm:$0xff]  ;;  %v1212_v30 = vperm.slane %v1210_v52, 0 }
 0x246   : > { %1361 = vmatpush.msrb.mxu0 %v3503_v15  ;;  %1384 = vmatpush.msrb.mxu1 %v3511_v40 }
 0x247   : > { %1232 = vmatmul.f32.vlgmr.msra.gmra.mxu0 %v3634_v50  ;;  %1255 = vmatmul.f32.vlgmr.msra.gmra.mxu1 %v3634_v50  ;;  %v1161_v9 = vmul.f32 0.5, %v1160_v62  ;;  %v1266_v62 = vld [vmem:[#allocation8] sm:$0xff] }
 0x248   : > { %1333 = vmatpush.msra.mxu3 %v1287_v21  ;;  %1312 = vmatpush.msra.mxu2 %v1269_v60  ;;  %v4556_v21 = vld [vmem:[#allocation23_spill] sm:$0xff]  ;;  %v4559_v60 = vld [vmem:[#allocation26_spill] sm:$0xff] }
 0x249   : > { %v1162_v27 = vsub.f32 1.5, %v1161_v9  ;;  %1362 = vmatpush.msrb.mxu0 %v3515_v42  ;;  %1385 = vmatpush.msrb.mxu1 %v3533_v16  ;;  %v1494_v9 = vld [vmem:[#allocation3 + $0x2b0] sm:$0xff] }
 0x24a   : > { %1334 = vmatpush.msra.mxu3 %v1286_v56  ;;  %1313 = vmatpush.msra.mxu2 %v1268_v4  ;;  %v1213_v56 = vperm.slane %v1210_v52, 1  ;;  %v3775_v52 = vld [vmem:[#allocation5 + $0xb8] sm:$0xff] }
 0x24b   : > { %v1163_v59 = vmul.f32 %v2640_v26, %v1162_v27  ;;  %1363 = vmatpush.msrb.mxu0 %v3531_v31  ;;  %1386 = vmatpush.msrb.mxu1 %v3543_v0  ;;  %v4557_v27 = vld [vmem:[#allocation24_spill] sm:$0xff] }
 0x24c   : > { %1335 = vmatpush.msra.mxu3 %v1285_v3  ;;  %v4560_v3 = vld [vmem:[#allocation27_spill] sm:$0xff] }
 0x24d   : > { %v1167_v17 = vsel %vm1166_vm6, %v2640_v26, %v1163_v59  ;;  %1364 = vmatpush.msrb.mxu0 %v3541_v11  ;;  %1387 = vmatpush.msrb.mxu1 %v3555_v63  ;;  %v1283_v26 = vld [vmem:[#allocation8 + $0x88] sm:$0xff]  ;;  %v4558_v59 = vld [vmem:[#allocation25_spill] sm:$0xff] }
 0x24e   : > { %v1169_v18 = vmul.f32 %v1167_v17, %v1145_v44  ;;  %v4561_v44 = vld [vmem:[#allocation28_spill] sm:$0xff] }
 0x24f   : > { %1365 = vmatpush.msrb.mxu0 %v3551_v54  ;;  %1388 = vmatpush.msrb.mxu1 %v3563_v48 }
 0x250   : > { %v1173_v6 = vmul.f32 %v3615_v57, %v1169_v18  ;;  %v1284_v57 = vld [vmem:[#allocation8 + $0x90] sm:$0xff] }
 0x251   : > { %1336 = vmatpush.msra.mxu3 %v1284_v57  ;;  %v4562_v57 = vld [vmem:[#allocation29_spill] sm:$0xff] }
 0x252   : > { %v3657_v45 = vadd.f32 %v3625_v43, %v1173_v6  ;;  %v1267_v43 = vld [vmem:[#allocation8 + $0x8] sm:$0xff] }
 0x253   : > { %1314 = vmatpush.msra.mxu2 %v1267_v43  ;;  %1337 = vmatpush.msra.mxu3 %v1283_v26  ;;  %v4563_v43 = vld [vmem:[#allocation31_spill] sm:$0xff] }
 0x254   : > { %1235 = vmatmul.f32.gmra.mxu0 %v3657_v45  ;;  %1258 = vmatmul.f32.gmra.mxu1 %v3657_v45 }
 0x255   : > { %1315 = vmatpush.msra.mxu2 %v1266_v62  ;;  %1338 = vmatpush.msra.mxu3 %v1282_v37  ;;  %v4564_v37 = vld [vmem:[#allocation30_spill] sm:$0xff] }
 0x257   : > { %1396 = vmatpush.msrb.mxu2 %v3333_v8  ;;  %1419 = vmatpush.msrb.mxu3 %v3347_v23  ;;  %v4548_v8 = vld [vmem:[#allocation16_spill] sm:$0xff]  ;;  %v1497_v23 = vld [vmem:[#allocation3 + $0x2f8] sm:$0xff] }
 0x258   : > { %1499 = vmatpush.msra.mxu0 %v1497_v23  ;;  %v4567_v23 = vld [vmem:[#allocation35_spill] sm:$0xff] }
 0x259   : > { %1397 = vmatpush.msrb.mxu2 %v3345_v20  ;;  %1420 = vmatpush.msrb.mxu3 %v3368_v32  ;;  %v4549_v20 = vld [vmem:[#allocation17_spill] sm:$0xff]  ;;  %v4550_v32 = vld [vmem:[#allocation18_spill] sm:$0xff] }
 0x25b   : > { %1398 = vmatpush.msrb.mxu2 %v3358_v29  ;;  %1421 = vmatpush.msrb.mxu3 %v3381_v34  ;;  %v1496_v29 = vld [vmem:[#allocation3 + $0x2e0] sm:$0xff] }
 0x25c   : > { %v4551_v34 = vld [vmem:[#allocation19_spill] sm:$0xff]  ;;  %1500 = vmatpush.msra.mxu0 %v1496_v29  ;;  %v4569_v29 = vld [vmem:[#allocation36_spill] sm:$0xff] }
 0x25d   : > { %1399 = vmatpush.msrb.mxu2 %v3379_v49  ;;  %1422 = vmatpush.msrb.mxu3 %v3392_v35  ;;  %v4552_v49 = vld [vmem:[#allocation20_spill] sm:$0xff] }
 0x25e   : > { %v1495_v35 = vld [vmem:[#allocation3 + $0x2c8] sm:$0xff] }
 0x25f   : > { %1400 = vmatpush.msrb.mxu2 %v3401_v22  ;;  %1423 = vmatpush.msrb.mxu3 %v3412_v2  ;;  %v4553_v22 = vld [vmem:[#allocation21_spill] sm:$0xff]  ;;  %v4554_v2 = vld [vmem:[#allocation22_spill] sm:$0xff] }
 0x260   : > { %1501 = vmatpush.msra.mxu0 %v1495_v35 }
 0x261   : > { %1401 = vmatpush.msrb.mxu2 %v4547_v36  ;;  %1424 = vmatpush.msrb.mxu3 %v4548_v8  ;;  %v4565_v36 = vld [vmem:[#allocation33_spill] sm:$0xff]  ;;  %v4566_v8 = vld [vmem:[#allocation32_spill] sm:$0xff] }
 0x262   : > { %1502 = vmatpush.msra.mxu0 %v1494_v9 }
 0x263   : > { %1402 = vmatpush.msrb.mxu2 %v4549_v20  ;;  %1425 = vmatpush.msrb.mxu3 %v4550_v32  ;;  %v4568_v32 = vld [vmem:[#allocation34_spill] sm:$0xff] }
 0x265   : > { %1403 = vmatpush.msrb.mxu2 %v4551_v34  ;;  %1426 = vmatpush.msrb.mxu3 %v4552_v49 }
 0x267   : > { %1404 = vmatpush.msrb.mxu2 %v4553_v22  ;;  %1427 = vmatpush.msrb.mxu3 %v4554_v2 }
 0x269   : > { %1405 = vmatpush.msrb.mxu2 %v4556_v21  ;;  %1428 = vmatpush.msrb.mxu3 %v4557_v27 }
 0x26b   : > { %1406 = vmatpush.msrb.mxu2 %v4558_v59  ;;  %1429 = vmatpush.msrb.mxu3 %v4559_v60 }
 0x26d   : > { %1407 = vmatpush.msrb.mxu2 %v4560_v3  ;;  %1430 = vmatpush.msrb.mxu3 %v4561_v44 }
 0x26f   : > { %1408 = vmatpush.msrb.mxu2 %v4562_v57  ;;  %1431 = vmatpush.msrb.mxu3 %v4563_v43 }
 0x271   : > { %1409 = vmatpush.msrb.mxu2 %v4564_v37  ;;  %1432 = vmatpush.msrb.mxu3 %v4565_v36 }
 0x273   : > { %1410 = vmatpush.msrb.mxu2 %v4566_v8  ;;  %1433 = vmatpush.msrb.mxu3 %v4567_v23 }
 0x275   : > { %1411 = vmatpush.msrb.mxu2 %v4568_v32  ;;  %1434 = vmatpush.msrb.mxu3 %v4569_v29 }
 0x2c4   : > { %v1233_v17 = vpop.f32.mrf.mxu0  ;;  %v1256_v18 = vpop.f32.mrf.mxu1 }
 0x2c5   : > { %v1234_v6 = vadd.f32 %v1233_v17, %v1212_v30  ;;  %v1257_v4 = vadd.f32 %v1256_v18, %v1213_v56  ;;  %v2468_v17 = vld [vmem:[%s4453_s7 + $0x98] sm:$0xff]  ;;  %v2467_v18 = vld [vmem:[%s4453_s7 + $0x90] sm:$0xff] }
 0x2c7   : > { %v1262_v26 = vmax.f32 %v1234_v6, 0.0  ;;  %v1263_v62 = vmax.f32 %v1257_v4, 0.0  ;;  %v2466_v6 = vld [vmem:[%s4453_s7 + $0x88] sm:$0xff]  ;;  %v2465_v4 = vld [vmem:[%s4453_s7 + $0x80] sm:$0xff] }
 0x2c9   : > { %1316 = vmatmul.f32.vlgmr.msra.gmra.mxu2 %v1262_v26  ;;  %1339 = vmatmul.f32.vlgmr.msra.gmra.mxu3 %v1263_v62  ;;  %v3843_v62 = vld [vmem:[#allocation5 + $0x1e8] sm:$0xff] }
 0x2ca   : > { %1579 = vmatpush.msra.mxu3 %v3343_v19  ;;  %1559 = vmatpush.msra.mxu2 %v3331_v7 }
 0x2cc   : > { %1580 = vmatpush.msra.mxu3 %v3356_v58  ;;  %1560 = vmatpush.msra.mxu2 %v3335_v10  ;;  %v1493_v10 = vld [vmem:[#allocation3 + $0x298] sm:$0xff]  ;;  %v1491_v58 = vld [vmem:[#allocation3 + $0x268] sm:$0xff] }
 0x2cd   : > { %1503 = vmatpush.msra.mxu0 %v1493_v10  ;;  %v1722_v10 = vld [vmem:[%s4572_s17 + $0xd0] sm:$0xff] }
 0x2ce   : > { %1581 = vmatpush.msra.mxu3 %v3370_v46  ;;  %1561 = vmatpush.msra.mxu2 %v3354_v28  ;;  %v1492_v28 = vld [vmem:[#allocation3 + $0x280] sm:$0xff]  ;;  %v1490_v46 = vld [vmem:[#allocation3 + $0x250] sm:$0xff] }
 0x2cf   : > { %1504 = vmatpush.msra.mxu0 %v1492_v28 }
 0x2d0   : > { %1582 = vmatpush.msra.mxu3 %v3390_v33  ;;  %1562 = vmatpush.msra.mxu2 %v3377_v13  ;;  %v1489_v13 = vld [vmem:[#allocation3 + $0x238] sm:$0xff]  ;;  %v1488_v33 = vld [vmem:[#allocation3 + $0x220] sm:$0xff] }
 0x2d1   : > { %v1236_v49 = vpop.f32.mrf.mxu0  ;;  %v1259_v35 = vpop.f32.mrf.mxu1  ;;  %1505 = vmatpush.msra.mxu0 %v1491_v58  ;;  %v1721_v58 = vld [vmem:[%s4572_s17 + $0xc8] sm:$0xff] }
 0x2d2   : > { %v1237_v2 = vadd.f32 %v1236_v49, %v1212_v30  ;;  %v1260_v9 = vadd.f32 %v1259_v35, %v1213_v56  ;;  %1583 = vmatpush.msra.mxu3 %v3410_v41  ;;  %1563 = vmatpush.msra.mxu2 %v3399_v55  ;;  %v1487_v55 = vld [vmem:[#allocation3 + $0x208] sm:$0xff]  ;;  %v1486_v41 = vld [vmem:[#allocation3 + $0x1f0] sm:$0xff] }
 0x2d3   : > { %1506 = vmatpush.msra.mxu0 %v1490_v46  ;;  %v3778_v56 = vld [vmem:[#allocation5 + $0xa8] sm:$0xff]  ;;  %v1726_v49 = vld [vmem:[%s4572_s17 + $0xf0] sm:$0xff]  ;;  %v3879_v46 = vld [vmem:[#allocation5 + $0x198] sm:$0xff] }
 0x2d4   : > { %v1264_v7 = vmax.f32 %v1237_v2, 0.0  ;;  %v1265_v19 = vmax.f32 %v1260_v9, 0.0  ;;  %1584 = vmatpush.msra.mxu3 %v3424_v5  ;;  %1564 = vmatpush.msra.mxu2 %v3418_v25  ;;  %v1485_v25 = vld [vmem:[#allocation3 + $0x1d8] sm:$0xff]  ;;  %v1484_v5 = vld [vmem:[#allocation3 + $0x1c0] sm:$0xff]  ;;  %v1725_v35 = vld [vmem:[%s4572_s17 + $0xe8] sm:$0xff] }
 0x2d5   : > { %1507 = vmatpush.msra.mxu0 %v1489_v13  ;;  %v3861_v2 = vld [vmem:[#allocation5 + $0x1b8] sm:$0xff]  ;;  %v1724_v9 = vld [vmem:[%s4572_s17 + $0xe0] sm:$0xff] }
 0x2d6   : > { %1319 = vmatmul.f32.gmra.mxu2 %v1264_v7  ;;  %1342 = vmatmul.f32.gmra.mxu3 %v1265_v19  ;;  %v1723_v7 = vld [vmem:[%s4572_s17 + $0xd8] sm:$0xff]  ;;  %v3870_v19 = vld [vmem:[#allocation5 + $0x1a8] sm:$0xff]  ;;  %v1720_v13 = vld [vmem:[%s4572_s17 + $0xc0] sm:$0xff] }
 0x2d7   : > { %1585 = vmatpush.msra.mxu3 %v3441_v38  ;;  %1565 = vmatpush.msra.mxu2 %v3432_v12  ;;  %v2590_v12 = vld [vmem:[%s4457_s11 + $0x1] ss:$0 sm:$0xff]  ;;  %v1483_v38 = vld [vmem:[#allocation3 + $0x1a8] sm:$0xff] }
 0x2d8   : > { %1508 = vmatpush.msra.mxu0 %v1488_v33  ;;  %v1719_v33 = vld [vmem:[%s4572_s17 + $0xb8] sm:$0xff] }
 0x2d9   : > { %1586 = vmatpush.msra.mxu3 %v3455_v24  ;;  %1566 = vmatpush.msra.mxu2 %v3449_v61  ;;  %v2480_v61 = vld [vmem:[%s4453_s7 + $0xf8] sm:$0xff]  ;;  %v2479_v24 = vld [vmem:[%s4453_s7 + $0xf0] sm:$0xff] }
 0x2da   : > { %1509 = vmatpush.msra.mxu0 %v1487_v55  ;;  %1537 = vmatpush.msra.mxu1 %v2480_v61  ;;  %v3888_v55 = vld [vmem:[#allocation5 + $0x188] sm:$0xff]  ;;  %v1715_v61 = vld [vmem:[%s4572_s17 + $0x98] sm:$0xff] }
 0x2db   : > { %1587 = vmatpush.msra.mxu3 %v3470_v1  ;;  %1567 = vmatpush.msra.mxu2 %v3462_v53  ;;  %v1482_v1 = vld [vmem:[#allocation3 + $0x190] sm:$0xff] }
 0x2dc   : > { %1510 = vmatpush.msra.mxu0 %v1486_v41  ;;  %1538 = vmatpush.msra.mxu1 %v2479_v24  ;;  %v1718_v41 = vld [vmem:[%s4572_s17 + $0xb0] sm:$0xff]  ;;  %v3909_v24 = vld [vmem:[#allocation5 + $0x168] sm:$0xff] }
 0x2dd   : > { %1588 = vmatpush.msra.mxu3 %v3482_v51  ;;  %1568 = vmatpush.msra.mxu2 %v3475_v39  ;;  %v2478_v39 = vld [vmem:[%s4453_s7 + $0xe8] sm:$0xff] }
 0x2de   : > { %1511 = vmatpush.msra.mxu0 %v1485_v25  ;;  %1539 = vmatpush.msra.mxu1 %v2478_v39  ;;  %v1717_v25 = vld [vmem:[%s4572_s17 + $0xa8] sm:$0xff] }
 0x2df   : > { %1589 = vmatpush.msra.mxu3 %v3498_v47  ;;  %1569 = vmatpush.msra.mxu2 %v3487_v14  ;;  %v2477_v47 = vld [vmem:[%s4453_s7 + $0xe0] sm:$0xff]  ;;  %v1713_v39 = vld [vmem:[%s4572_s17 + $0x88] sm:$0xff] }
 0x2e0   : > { %1512 = vmatpush.msra.mxu0 %v1484_v5  ;;  %1540 = vmatpush.msra.mxu1 %v2477_v47  ;;  %v3897_v5 = vld [vmem:[#allocation5 + $0x178] sm:$0xff]  ;;  %v1712_v47 = vld [vmem:[%s4572_s17 + $0x80] sm:$0xff] }
 0x2e1   : > { %1590 = vmatpush.msra.mxu3 %v3511_v40  ;;  %1570 = vmatpush.msra.mxu2 %v3503_v15 }
 0x2e2   : > { %1513 = vmatpush.msra.mxu0 %v1483_v38  ;;  %v1498_v38 = vld [vmem:[%s4450_s4 + $0x5] sm:$0x1] }
 0x2e3   : > { %1591 = vmatpush.msra.mxu3 %v3533_v16  ;;  %1571 = vmatpush.msra.mxu2 %v3515_v42  ;;  %v2476_v42 = vld [vmem:[%s4453_s7 + $0xd8] sm:$0xff]  ;;  %v2475_v16 = vld [vmem:[%s4453_s7 + $0xd0] sm:$0xff] }
 0x2e4   : > { %1514 = vmatpush.msra.mxu0 %v1482_v1  ;;  %1541 = vmatpush.msra.mxu1 %v2476_v42  ;;  %v3927_v42 = vld [vmem:[#allocation5 + $0x148] sm:$0xff] }
 0x2e5   : > { %1592 = vmatpush.msra.mxu3 %v3543_v0  ;;  %1572 = vmatpush.msra.mxu2 %v3531_v31  ;;  %v3768_v0 = vld [vmem:[#allocation5 + $0xd8] sm:$0xff] }
 0x2e6   : > { %1542 = vmatpush.msra.mxu1 %v2475_v16 }
 0x2e7   : > { %1593 = vmatpush.msra.mxu3 %v3555_v63  ;;  %1573 = vmatpush.msra.mxu2 %v3541_v11  ;;  %v3765_v11 = vld [vmem:[#allocation5 + $0xe8] sm:$0xff] }
 0x2e9   : > { %1594 = vmatpush.msra.mxu3 %v3563_v48  ;;  %1574 = vmatpush.msra.mxu2 %v3551_v54  ;;  %v3762_v48 = vld [vmem:[#allocation5 + $0xf8] sm:$0xff]  ;;  %v3771_v54 = vld [vmem:[#allocation5 + $0xc8] sm:$0xff] }
 0x34c   : > { %v1317_v53 = vpop.f32.mrf.mxu2  ;;  %v1340_v14 = vpop.f32.mrf.mxu3 }
 0x34d   : > { %v1318_v51 = vadd.f32 %v2590_v12, %v1317_v53  ;;  %v1714_v53 = vld [vmem:[%s4572_s17 + $0x90] sm:$0xff] }
 0x34f   : > { %v1341_v15 = vadd.f32 %v1340_v14, %v1318_v51  ;;  %v3918_v14 = vld [vmem:[#allocation5 + $0x158] sm:$0xff] }
 0x351   : > { %v3750_v40 = vadd.f32 %v1341_v15, %v3634_v50  ;;  %v1711_v15 = vld [vmem:[%s4572_s17 + $0x78] sm:$0xff] }
 0x353   : > { %1366 = vmatmul.f32.vlgmr.msrb.gmra.mxu0 %v3750_v40  ;;  %1412 = vmatmul.f32.vlgmr.msrb.gmra.mxu2 %v3750_v40  ;;  %v1348_v31 = vmul.f32 %v3750_v40, %v3750_v40 }
 0x354   : > { %1599 = vmatpush.msrb.mxu0 %v3762_v48 }
 0x355   : > { %1389 = vmatmul.f32.vlgmr.msrb.gmra.mxu1 %v1348_v31  ;;  %1435 = vmatmul.f32.vlgmr.msrb.gmra.mxu3 %v1348_v31 }
 0x356   : > { %1600 = vmatpush.msrb.mxu0 %v3765_v11  ;;  %1734 = vmatpush.msrb.mxu3 %v1726_v49  ;;  %v1703_v49 = vld [vmem:[%s4572_s17 + $0x38] sm:$0xff] }
 0x358   : > { %1601 = vmatpush.msrb.mxu0 %v3768_v0  ;;  %1735 = vmatpush.msrb.mxu3 %v1724_v9  ;;  %v1702_v9 = vld [vmem:[%s4572_s17 + $0x30] sm:$0xff] }
 0x359   : > { %v1320_v63 = vpop.f32.mrf.mxu2  ;;  %v1343_v27 = vpop.f32.mrf.mxu3 }
 0x35a   : > { %1602 = vmatpush.msrb.mxu0 %v3771_v54  ;;  %v1321_v50 = vadd.f32 %v2590_v12, %v1320_v63  ;;  %1736 = vmatpush.msrb.mxu3 %v1722_v10  ;;  %v1716_v12 = vld [vmem:[%s4572_s17 + $0xa0] sm:$0xff] }
 0x35b   : > { %v1700_v10 = vld [vmem:[%s4572_s17 + $0x20] sm:$0xff] }
 0x35c   : > { %1603 = vmatpush.msrb.mxu0 %v3775_v52  ;;  %v1344_v30 = vadd.f32 %v1343_v27, %v1321_v50  ;;  %1737 = vmatpush.msrb.mxu3 %v1720_v13  ;;  %v1698_v13 = vld [vmem:[%s4572_s17 + $0x10] sm:$0xff] }
 0x35e   : > { %1604 = vmatpush.msrb.mxu0 %v3778_v56  ;;  %v3782_v60 = vadd.f32 %v1344_v30, %v3657_v45  ;;  %v3798_v45 = vld [vmem:[%s553_s16] sm:$0x1]  ;;  %1738 = vmatpush.msrb.mxu3 %v1718_v41 }
 0x35f   : > { %v1696_v41 = vld [vmem:[%s4572_s17] sm:$0xff] }
 0x360   : > { %1605 = vmatpush.msrb.mxu0 %v4549_v20  ;;  %1415 = vmatmul.f32.gmra.mxu2 %v3782_v60  ;;  %v1349_v44 = vmul.f32 %v3782_v60, %v3782_v60  ;;  %v2474_v20 = vld [vmem:[%s4453_s7 + $0xc8] sm:$0xff] }
 0x361   : > { %1369 = vmatmul.f32.gmra.mxu0 %v3782_v60  ;;  %1543 = vmatpush.msra.mxu1 %v2474_v20 }
 0x362   : > { %1606 = vmatpush.msrb.mxu0 %v4551_v34  ;;  %1392 = vmatmul.f32.gmra.mxu1 %v1349_v44  ;;  %v2473_v34 = vld [vmem:[%s4453_s7 + $0xc0] sm:$0xff] }
 0x363   : > { %1438 = vmatmul.f32.gmra.mxu3 %v1349_v44  ;;  %1544 = vmatpush.msra.mxu1 %v2473_v34 }
 0x364   : > { %1607 = vmatpush.msrb.mxu0 %v4553_v22  ;;  %v2472_v22 = vld [vmem:[%s4453_s7 + $0xb8] sm:$0xff]  ;;  %1739 = vmatpush.msrb.mxu3 %v1716_v12 }
 0x365   : > { %1545 = vmatpush.msra.mxu1 %v2472_v22 }
 0x366   : > { %1608 = vmatpush.msrb.mxu0 %v4556_v21  ;;  %v2471_v21 = vld [vmem:[%s4453_s7 + $0xb0] sm:$0xff]  ;;  %1740 = vmatpush.msrb.mxu3 %v1714_v53 }
 0x367   : > { %1546 = vmatpush.msra.mxu1 %v2471_v21 }
 0x368   : > { %1609 = vmatpush.msrb.mxu0 %v4558_v59  ;;  %v2470_v59 = vld [vmem:[%s4453_s7 + $0xa8] sm:$0xff]  ;;  %1741 = vmatpush.msrb.mxu3 %v1712_v47  ;;  %v1536_v47 = vld [vmem:[%s4457_s11 + $0x6] sm:$0x1] }
 0x369   : > { %1515 = vmatmul.f32.vlgmr.msra.gmra.mxu0 %v3798_v45  ;;  %1547 = vmatpush.msra.mxu1 %v2470_v59  ;;  %v1710_v59 = vld [vmem:[%s4572_s17 + $0x70] sm:$0xff] }
 0x36a   : > { %1610 = vmatpush.msrb.mxu0 %v4560_v3  ;;  %v2469_v3 = vld [vmem:[%s4453_s7 + $0xa0] sm:$0xff]  ;;  %1742 = vmatpush.msrb.mxu3 %v1710_v59  ;;  %v4017_v59 = vld [vmem:[#allocation5 + $0x1d0] sm:$0xff] }
 0x36b   : > { %1548 = vmatpush.msra.mxu1 %v2469_v3  ;;  %v1709_v3 = vld [vmem:[%s4572_s17 + $0x68] sm:$0xff] }
 0x36c   : > { %1611 = vmatpush.msrb.mxu0 %v4562_v57  ;;  %v3838_v57 = vld [vmem:[#allocation5 + $0x1f8] sm:$0xff] }
 0x36d   : > { %1549 = vmatpush.msra.mxu1 %v2468_v17  ;;  %v1708_v17 = vld [vmem:[%s4572_s17 + $0x60] sm:$0xff] }
 0x36e   : > { %1612 = vmatpush.msrb.mxu0 %v4564_v37  ;;  %v3846_v37 = vld [vmem:[#allocation5 + $0x1d8] sm:$0xff]  ;;  %1743 = vmatpush.msrb.mxu3 %v1708_v17  ;;  %v4035_v17 = vld [vmem:[#allocation5 + $0x190] sm:$0xff] }
 0x36f   : > { %1550 = vmatpush.msra.mxu1 %v2467_v18  ;;  %v1707_v18 = vld [vmem:[%s4572_s17 + $0x58] sm:$0xff] }
 0x370   : > { %1613 = vmatpush.msrb.mxu0 %v4566_v8  ;;  %v3849_v8 = vld [vmem:[#allocation5 + $0x1c8] sm:$0xff] }
 0x371   : > { %1551 = vmatpush.msra.mxu1 %v2466_v6  ;;  %v1706_v6 = vld [vmem:[%s4572_s17 + $0x50] sm:$0xff] }
 0x372   : > { %1614 = vmatpush.msrb.mxu0 %v4568_v32  ;;  %v1727_v32 = vld [vmem:[%s4571_s25 + $0xf8] sm:$0xff]  ;;  %1744 = vmatpush.msrb.mxu3 %v1706_v6  ;;  %v4047_v6 = vld [vmem:[#allocation5 + $0x170] sm:$0xff]  ;;  %s4598_s25 = sld [smem:[#allocation43_spill]] }
 0x373   : > { %1552 = vmatpush.msra.mxu1 %v2465_v4  ;;  %v1705_v4 = vld [vmem:[%s4572_s17 + $0x48] sm:$0xff] }
 0x374   : > { %1757 = vmatpush.msra.mxu0 %v1727_v32  ;;  %v1704_v32 = vld [vmem:[%s4572_s17 + $0x40] sm:$0xff] }
 0x375   : > { %1619 = vmatpush.msrb.mxu1 %v3838_v57  ;;  %1745 = vmatpush.msrb.mxu3 %v1704_v32  ;;  %v4056_v32 = vld [vmem:[#allocation5 + $0x58] sm:$0xff] }
 0x376   : > { %1758 = vmatpush.msra.mxu0 %v1725_v35  ;;  %4577 = vst [vmem:[#allocation19_spill] sm:$0xff] %v4056_v32 }
 0x377   : > { %1620 = vmatpush.msrb.mxu1 %v3843_v62  ;;  %1746 = vmatpush.msrb.mxu3 %v1702_v9  ;;  %v4065_v9 = vld [vmem:[#allocation5 + $0x140] sm:$0xff] }
 0x378   : > { %1759 = vmatpush.msra.mxu0 %v1723_v7  ;;  %v1701_v7 = vld [vmem:[%s4572_s17 + $0x28] sm:$0xff]  ;;  %s556_s18 = scalar_lea.vmem %s4598_s25, %s4604_s28 }
 0x379   : > { %1621 = vmatpush.msrb.mxu1 %v3846_v37  ;;  %1747 = vmatpush.msrb.mxu3 %v1700_v10  ;;  %v4068_v10 = vld [vmem:[#allocation5 + $0x130] sm:$0xff] }
 0x37a   : > { %1760 = vmatpush.msra.mxu0 %v1721_v58 }
 0x37b   : > { %1622 = vmatpush.msrb.mxu1 %v3849_v8  ;;  %1748 = vmatpush.msrb.mxu3 %v1698_v13  ;;  %v2717_v13 = vld [vmem:[#allocation5 + $0x18] sm:$0xff] }
 0x37c   : > { %1761 = vmatpush.msra.mxu0 %v1719_v33  ;;  %v1697_v33 = vld [vmem:[%s4572_s17 + $0x8] sm:$0xff] }
 0x37d   : > { %1623 = vmatpush.msrb.mxu1 %v3861_v2  ;;  %1749 = vmatpush.msrb.mxu3 %v1696_v41  ;;  %v2719_v41 = vld [vmem:[#allocation5 + $0x8] sm:$0xff] }
 0x37e   : > { %1762 = vmatpush.msra.mxu0 %v1717_v25 }
 0x37f   : > { %1624 = vmatpush.msrb.mxu1 %v3870_v19 }
 0x380   : > { %1763 = vmatpush.msra.mxu0 %v1715_v61 }
 0x381   : > { %1625 = vmatpush.msrb.mxu1 %v3879_v46 }
 0x382   : > { %1764 = vmatpush.msra.mxu0 %v1713_v39 }
 0x383   : > { %1626 = vmatpush.msrb.mxu1 %v3888_v55 }
 0x384   : > { %1765 = vmatpush.msra.mxu0 %v1711_v15 }
 0x385   : > { %1627 = vmatpush.msrb.mxu1 %v3897_v5 }
 0x386   : > { %1766 = vmatpush.msra.mxu0 %v1709_v3  ;;  %v4021_v3 = vld [vmem:[#allocation5 + $0x1c0] sm:$0xff] }
 0x387   : > { %1628 = vmatpush.msrb.mxu1 %v3909_v24 }
 0x388   : > { %1767 = vmatpush.msra.mxu0 %v1707_v18  ;;  %v4041_v18 = vld [vmem:[#allocation5 + $0x180] sm:$0xff] }
 0x389   : > { %1629 = vmatpush.msrb.mxu1 %v3918_v14 }
 0x38a   : > { %1768 = vmatpush.msra.mxu0 %v1705_v4  ;;  %v4050_v4 = vld [vmem:[#allocation5 + $0x68] sm:$0xff] }
 0x38b   : > { %1630 = vmatpush.msrb.mxu1 %v3927_v42  ;;  %4576 = vst [vmem:[#allocation18_spill] sm:$0xff] %v4050_v4 }
 0x38c   : > { %1769 = vmatpush.msra.mxu0 %v1703_v49  ;;  %v4059_v49 = vld [vmem:[#allocation5 + $0x150] sm:$0xff] }
 0x38d   : > { %1631 = vmatpush.msrb.mxu1 %v4563_v43 }
 0x38e   : > { %1770 = vmatpush.msra.mxu0 %v1701_v7  ;;  %v2713_v7 = vld [vmem:[#allocation5 + $0x38] sm:$0xff] }
 0x38f   : > { %1632 = vmatpush.msrb.mxu1 %v4565_v36 }
 0x391   : > { %1633 = vmatpush.msrb.mxu1 %v4567_v23 }
 0x393   : > { %1634 = vmatpush.msrb.mxu1 %v4569_v29 }
 0x3d0   : > { %v3841_v26 = vpop.f32.mrf.mxu0 }
 0x3d2   : > { %v1390_v31 = vpop.f32.mrf.mxu1 }
 0x3d3   : > { %v3935_v50 = vadd.f32 %v1390_v31, %v3841_v26 }
 0x3d5   : > { %v1442_v30 = vmul.f32 %v3935_v50, %v3935_v50 }
 0x3d6   : > { %v1413_v63 = vpop.f32.mrf.mxu2 }
 0x3d8   : > { %v1436_v16 = vpop.f32.mrf.mxu3 }
 0x3d9   : > { %v1437_v27 = vadd.f32 %v1436_v16, %v1413_v63  ;;  %v1446_v63 = vsub.f32 %v3750_v40, %v3935_v50 }
 0x3db   : > { %v1444_v20 = vsub.f32 %v1437_v27, %v1442_v30 }
 0x3dd   : > { %v1448_v22 = vadd.f32 1e-05, %v1444_v20  ;;  %v2591_v20 = vld [vmem:[%s4457_s11 + $0x4] ss:$0 sm:$0xff] }
 0x3de   : > { %v1370_v28 = vpop.f32.mrf.mxu0 }
 0x3df   : > { %v1393_v44 = vpop.f32.mrf.mxu1  ;;  %2641 = vrsqrt.f32 %v1448_v22  ;;  %vm1456_vm8 = vweird.f32 %v1448_v22 }
 0x3e0   : > { %v3939_v43 = vadd.f32 %v1393_v44, %v1370_v28  ;;  %v1699_v28 = vld [vmem:[%s4572_s17 + $0x18] sm:$0xff] }
 0x3e1   : > { %1771 = vmatpush.msra.mxu0 %v1699_v28  ;;  %v2715_v28 = vld [vmem:[#allocation5 + $0x28] sm:$0xff] }
 0x3e2   : > { %v1443_v29 = vmul.f32 %v3939_v43, %v3939_v43 }
 0x3e3   : > { %v1416_v36 = vpop.f32.mrf.mxu2  ;;  %1772 = vmatpush.msra.mxu0 %v1697_v33  ;;  %v4074_v33 = vld [vmem:[#allocation5 + $0x110] sm:$0xff] }
 0x3e4   : > { %4580 = vst [vmem:[#allocation22_spill] sm:$0xff] %v4074_v33 }
 0x3e5   : > { %v2642_v35 = vpop.eup %2641 }
 0x3e6   : > { %v1516_v1 = vpop.f32.mrf.mxu0  ;;  %v1439_v34 = vpop.f32.mrf.mxu3  ;;  %v1451_v58 = vmul.f32 %v2642_v35, %v1448_v22  ;;  %vm1457_vm7 = vweird.f32 %v2642_v35  ;;  %v4007_v22 = vld [vmem:[#allocation5 + $0x1f0] sm:$0xff] }
 0x3e7   : > { %v1517_v51 = vadd.f32 %v1516_v1, %v1498_v38  ;;  %v1440_v23 = vadd.f32 %v1439_v34, %v1416_v36  ;;  %vm1458_vm9 = vmor %vm1456_vm8, %vm1457_vm7 }
 0x3e8   : > { %v1452_v25 = vmul.f32 %v2642_v35, %v1451_v58  ;;  %v4071_v58 = vld [vmem:[#allocation5 + $0x120] sm:$0xff] }
 0x3e9   : > { %1553 = vmatmul.f32.vlgmr.msra.gmra.mxu1 %v1517_v51  ;;  %v1445_v21 = vsub.f32 %v1440_v23, %v1443_v29  ;;  %v1447_v23 = vsub.f32 %v3782_v60, %v3939_v43  ;;  %v4013_v29 = vld [vmem:[#allocation5 + $0x1e0] sm:$0xff]  ;;  %v4025_v60 = vld [vmem:[#allocation5 + $0x1b0] sm:$0xff]  ;;  %4579 = vst [vmem:[#allocation21_spill] sm:$0xff] %v4071_v58 }
 0x3ea   : > { %v1453_v38 = vmul.f32 0.5, %v1452_v25  ;;  %v4077_v25 = vld [vmem:[#allocation5 + $0x100] sm:$0xff] }
 0x3eb   : > { %v1449_v26 = vadd.f32 1e-05, %v1445_v21  ;;  %4581 = vst [vmem:[#allocation23_spill] sm:$0xff] %v4077_v25 }
 0x3ec   : > { %v1454_v53 = vsub.f32 1.5, %v1453_v38  ;;  %v2495_v38 = vld [vmem:[%s4453_s7 + $0x170] sm:$0xff] }
 0x3ed   : > { %2643 = vrsqrt.f32 %v1449_v26  ;;  %vm1466_vm11 = vweird.f32 %v1449_v26 }
 0x3ee   : > { %v1455_v39 = vmul.f32 %v2642_v35, %v1454_v53  ;;  %v2493_v53 = vld [vmem:[%s4453_s7 + $0x160] sm:$0xff] }
 0x3f0   : > { %v1459_v15 = vsel %vm1458_vm9, %v2642_v35, %v1455_v39  ;;  %v4062_v35 = vld [vmem:[#allocation5 + $0x48] sm:$0xff]  ;;  %v2491_v39 = vld [vmem:[%s4453_s7 + $0x150] sm:$0xff] }
 0x3f1   : > { %v1470_v44 = vmul.f32 %v1459_v15, %v1446_v63  ;;  %4578 = vst [vmem:[#allocation20_spill] sm:$0xff] %v4062_v35  ;;  %v2488_v15 = vld [vmem:[%s4453_s7 + $0x138] sm:$0xff] }
 0x3f3   : > { %v2644_v12 = vpop.eup %2643  ;;  %v1474_v40 = vmul.f32 %v2591_v20, %v1470_v44 }
 0x3f4   : > { %v1461_v61 = vmul.f32 %v2644_v12, %v1449_v26  ;;  %vm1467_vm10 = vweird.f32 %v2644_v12  ;;  %v4053_v26 = vld [vmem:[#allocation5 + $0x160] sm:$0xff] }
 0x3f5   : > { %vm1468_vm12 = vmor %vm1466_vm11, %vm1467_vm10 }
 0x3f6   : > { %v1462_v1 = vmul.f32 %v2644_v12, %v1461_v61  ;;  %v2494_v61 = vld [vmem:[%s4453_s7 + $0x168] sm:$0xff] }
 0x3f8   : > { %v1463_v51 = vmul.f32 0.5, %v1462_v1  ;;  %v2492_v1 = vld [vmem:[%s4453_s7 + $0x158] sm:$0xff] }
 0x3fa   : > { %v1464_v31 = vsub.f32 1.5, %v1463_v51  ;;  %v2490_v51 = vld [vmem:[%s4453_s7 + $0x148] sm:$0xff] }
 0x3fc   : > { %v1465_v34 = vmul.f32 %v2644_v12, %v1464_v31  ;;  %v2487_v31 = vld [vmem:[%s4453_s7 + $0x130] sm:$0xff] }
 0x3fe   : > { %v1469_v50 = vsel %vm1468_vm12, %v2644_v12, %v1465_v34  ;;  %v2496_v12 = vld [vmem:[%s4453_s7 + $0x178] sm:$0xff] }
 0x3ff   : > { %v1471_v21 = vmul.f32 %v1469_v50, %v1447_v23  ;;  %1676 = vmatpush.msrb.mxu2 %v2496_v12  ;;  %v2483_v23 = vld [vmem:[%s4453_s7 + $0x110] sm:$0xff] }
 0x401   : > { %1677 = vmatpush.msrb.mxu2 %v2495_v38  ;;  %v4137_v38 = vld [vmem:[#allocation5 + $0xc0] sm:$0xff] }
 0x403   : > { %1678 = vmatpush.msrb.mxu2 %v2494_v61 }
 0x405   : > { %1679 = vmatpush.msrb.mxu2 %v2493_v53  ;;  %v4140_v53 = vld [vmem:[#allocation5 + $0xb0] sm:$0xff] }
 0x407   : > { %1680 = vmatpush.msrb.mxu2 %v2492_v1 }
 0x409   : > { %1681 = vmatpush.msrb.mxu2 %v2491_v39  ;;  %v4143_v39 = vld [vmem:[#allocation5 + $0xa0] sm:$0xff] }
 0x40b   : > { %1682 = vmatpush.msrb.mxu2 %v2490_v51 }
 0x466   : > { %v1554_v16 = vpop.f32.mrf.mxu1 }
 0x467   : > { %v1555_v27 = vadd.f32 %v1554_v16, %v1536_v47  ;;  %v2489_v47 = vld [vmem:[%s4453_s7 + $0x140] sm:$0xff]  ;;  %v2486_v16 = vld [vmem:[%s4453_s7 + $0x128] sm:$0xff] }
 0x468   : > { %1683 = vmatpush.msrb.mxu2 %v2489_v47  ;;  %v4146_v47 = vld [vmem:[#allocation5 + $0x90] sm:$0xff] }
 0x469   : > { %v3994_v30 = vadd.f32 %v1555_v27, %v3798_v45  ;;  %v2592_v45 = vld [vmem:[%s4457_s11 + $0x5] ss:$0 sm:$0xff] }
 0x46a   : > { %1684 = vmatpush.msrb.mxu2 %v2488_v15  ;;  %v2485_v27 = vld [vmem:[%s4453_s7 + $0x120] sm:$0xff] }
 0x46b   : > { %1575 = vmatmul.f32.vlgmr.msra.gmra.mxu2 %v3994_v30  ;;  %1615 = vmatmul.f32.vlgmr.msrb.gmra.mxu0 %v3994_v30  ;;  %v1558_v36 = vmul.f32 %v3994_v30, %v3994_v30 }
 0x46c   : > { %2010 = vmatpush.msrb.mxu0 %v3762_v48  ;;  %v1478_v48 = vadd.f32 %v2592_v45, %v1474_v40  ;;  %1685 = vmatpush.msrb.mxu2 %v2487_v31 }
 0x46d   : > { %1595 = vmatmul.f32.vlgmr.msra.gmra.mxu3 %v1558_v36  ;;  %1635 = vmatmul.f32.vlgmr.msrb.gmra.mxu1 %v1558_v36  ;;  %v2484_v36 = vld [vmem:[%s4453_s7 + $0x118] sm:$0xff] }
 0x46e   : > { %1990 = vmatpush.msra.mxu3 %v4007_v22  ;;  %2011 = vmatpush.msrb.mxu0 %v3765_v11  ;;  %v1475_v11 = vmul.f32 %v2591_v20, %v1471_v21  ;;  %v2482_v21 = vld [vmem:[%s4453_s7 + $0x108] sm:$0xff] }
 0x46f   : > { %1686 = vmatpush.msrb.mxu2 %v2486_v16  ;;  %v4150_v16 = vld [vmem:[#allocation5 + $0x80] sm:$0xff] }
 0x470   : > { %1991 = vmatpush.msra.mxu3 %v4013_v29  ;;  %2012 = vmatpush.msrb.mxu0 %v3768_v0  ;;  %v4029_v0 = vld [vmem:[#allocation5 + $0x1a0] sm:$0xff]  ;;  %v1479_v43 = vadd.f32 %v2592_v45, %v1475_v11 }
 0x471   : > { %1687 = vmatpush.msrb.mxu2 %v2485_v27  ;;  %v1654_v27 = vld [vmem:[%s4457_s11 + $0xa] sm:$0x1] }
 0x472   : > { %1992 = vmatpush.msra.mxu3 %v4017_v59  ;;  %2013 = vmatpush.msrb.mxu0 %v3771_v54  ;;  %v4032_v54 = vld [vmem:[#allocation5 + $0x98] sm:$0xff] }
 0x473   : > { %1773 = vmatmul.f32.vlgmr.msra.gmra.mxu0 %v1478_v48  ;;  %4573 = vst [vmem:[#allocation15_spill] sm:$0xff] %v4032_v54  ;;  %1688 = vmatpush.msrb.mxu2 %v2484_v36  ;;  %v1656_v36 = vld [vmem:[%s4457_s11 + $0xb] sm:$0x1] }
 0x474   : > { %1993 = vmatpush.msra.mxu3 %v4021_v3  ;;  %2014 = vmatpush.msrb.mxu0 %v3775_v52  ;;  %v4038_v52 = vld [vmem:[#allocation5 + $0x88] sm:$0xff] }
 0x475   : > { %1750 = vmatmul.f32.vlgmr.msrb.gmra.mxu3 %v1478_v48  ;;  %4574 = vst [vmem:[#allocation16_spill] sm:$0xff] %v4038_v52  ;;  %1689 = vmatpush.msrb.mxu2 %v2483_v23  ;;  %v4174_v23 = vld [vmem:[#allocation5 + $0x30] sm:$0xff] }
 0x476   : > { %1994 = vmatpush.msra.mxu3 %v4025_v60  ;;  %2015 = vmatpush.msrb.mxu0 %v3778_v56  ;;  %v4044_v56 = vld [vmem:[#allocation5 + $0x78] sm:$0xff] }
 0x477   : > { %4575 = vst [vmem:[#allocation17_spill] sm:$0xff] %v4044_v56  ;;  %1690 = vmatpush.msrb.mxu2 %v2482_v21  ;;  %v4180_v21 = vld [vmem:[#allocation5 + $0x10] sm:$0xff] }
 0x478   : > { %1995 = vmatpush.msra.mxu3 %v4029_v0  ;;  %2016 = vmatpush.msrb.mxu0 %v4032_v54  ;;  %4582 = vst [vmem:[#allocation24_spill] sm:$0xff] %v4180_v21 }
 0x47a   : > { %1996 = vmatpush.msra.mxu3 %v4035_v17  ;;  %2017 = vmatpush.msrb.mxu0 %v4038_v52 }
 0x47b   : > { %1776 = vmatmul.f32.gmra.mxu0 %v1479_v43 }
 0x47c   : > { %1997 = vmatpush.msra.mxu3 %v4041_v18  ;;  %2018 = vmatpush.msrb.mxu0 %v4044_v56 }
 0x47d   : > { %1753 = vmatmul.f32.gmra.mxu3 %v1479_v43  ;;  %v2481_v43 = vld [vmem:[%s4453_s7 + $0x100] sm:$0xff] }
 0x47e   : > { %1998 = vmatpush.msra.mxu3 %v4047_v6  ;;  %2019 = vmatpush.msrb.mxu0 %v4050_v4 }
 0x47f   : > { %1691 = vmatpush.msrb.mxu2 %v2481_v43  ;;  %v2512_v43 = vld [vmem:[%s4453_s7 + $0x1f8] sm:$0xff] }
 0x480   : > { %1999 = vmatpush.msra.mxu3 %v4053_v26  ;;  %2020 = vmatpush.msrb.mxu0 %v4056_v32 }
 0x481   : > { %1948 = vmatpush.msra.mxu1 %v2512_v43  ;;  %v4225_v43 = vld [vmem:[%s4584_s3] sm:$0x3] }
 0x482   : > { %2000 = vmatpush.msra.mxu3 %v4059_v49  ;;  %2021 = vmatpush.msrb.mxu0 %v4062_v35 }
 0x484   : > { %2001 = vmatpush.msra.mxu3 %v4065_v9  ;;  %2022 = vmatpush.msrb.mxu0 %v2713_v7  ;;  %v4128_v7 = vld [vmem:[#allocation5 + $0xf0] sm:$0xff] }
 0x485   : > { %1970 = vmatpush.msra.mxu2 %v4128_v7 }
 0x486   : > { %2002 = vmatpush.msra.mxu3 %v4068_v10  ;;  %2023 = vmatpush.msrb.mxu0 %v2715_v28  ;;  %v4131_v28 = vld [vmem:[#allocation5 + $0xe0] sm:$0xff] }
 0x487   : > { %1971 = vmatpush.msra.mxu2 %v4131_v28 }
 0x488   : > { %2003 = vmatpush.msra.mxu3 %v4071_v58  ;;  %2024 = vmatpush.msrb.mxu0 %v2717_v13 }
 0x48a   : > { %2004 = vmatpush.msra.mxu3 %v4074_v33  ;;  %2025 = vmatpush.msrb.mxu0 %v2719_v41  ;;  %v4134_v41 = vld [vmem:[#allocation5 + $0xd0] sm:$0xff] }
 0x48b   : > { %1972 = vmatpush.msra.mxu2 %v4134_v41 }
 0x48c   : > { %2005 = vmatpush.msra.mxu3 %v4077_v25 }
 0x48d   : > { %1973 = vmatpush.msra.mxu2 %v4137_v38 }
 0x48f   : > { %1974 = vmatpush.msra.mxu2 %v4140_v53 }
 0x491   : > { %1975 = vmatpush.msra.mxu2 %v4143_v39 }
 0x493   : > { %1976 = vmatpush.msra.mxu2 %v4146_v47 }
 0x495   : > { %1977 = vmatpush.msra.mxu2 %v4150_v16 }
 0x4e8   : > { %v1616_v40 = vpop.f32.mrf.mxu0 }
 0x4ea   : > { %v1636_v63 = vpop.f32.mrf.mxu1 }
 0x4eb   : > { %v1637_v45 = vadd.f32 %v1636_v63, %v1616_v40 }
 0x4ee   : > { %v1576_v44 = vpop.f32.mrf.mxu2 }
 0x4f0   : > { %v1596_v20 = vpop.f32.mrf.mxu3 }
 0x4f1   : > { %v1597_v34 = vadd.f32 %v1596_v20, %v1576_v44  ;;  %v4156_v20 = vld [vmem:[#allocation5 + $0x70] sm:$0xff] }
 0x4f2   : > { %1978 = vmatpush.msra.mxu2 %v4156_v20 }
 0x4f3   : > { %v1639_v50 = vmul.f32 %v1597_v34, %v1597_v34  ;;  %v1641_v31 = vsub.f32 %v3994_v30, %v1597_v34  ;;  %v4162_v34 = vld [vmem:[#allocation5 + $0x60] sm:$0xff] }
 0x4f4   : > { %1979 = vmatpush.msra.mxu2 %v4162_v34 }
 0x4f5   : > { %v1640_v48 = vsub.f32 %v1637_v45, %v1639_v50  ;;  %v4167_v45 = vld [vmem:[#allocation5 + $0x50] sm:$0xff]  ;;  %v4171_v50 = vld [vmem:[#allocation5 + $0x40] sm:$0xff] }
 0x4f6   : > { %1980 = vmatpush.msra.mxu2 %v4167_v45 }
 0x4f7   : > { %v1642_v11 = vadd.f32 1e-05, %v1640_v48  ;;  %v4177_v48 = vld [vmem:[#allocation5 + $0x20] sm:$0xff] }
 0x4f8   : > { %1981 = vmatpush.msra.mxu2 %v4171_v50 }
 0x4f9   : > { %2645 = vrsqrt.f32 %v1642_v11  ;;  %vm1649_vm14 = vweird.f32 %v1642_v11 }
 0x4fa   : > { %1982 = vmatpush.msra.mxu2 %v4174_v23 }
 0x4fc   : > { %1983 = vmatpush.msra.mxu2 %v4177_v48 }
 0x4fe   : > { %1984 = vmatpush.msra.mxu2 %v4180_v21 }
 0x4ff   : > { %v2646_v13 = vpop.eup %2645 }
 0x500   : > { %v1644_v12 = vmul.f32 %v2646_v13, %v1642_v11  ;;  %vm1650_vm13 = vweird.f32 %v2646_v13  ;;  %v4183_v11 = vld [vmem:[#allocation5] sm:$0xff] }
 0x501   : > { %vm1651_vm15 = vmor %vm1649_vm14, %vm1650_vm13  ;;  %4583 = vst [vmem:[#allocation25_spill] sm:$0xff] %v4183_v11  ;;  %1985 = vmatpush.msra.mxu2 %v4183_v11 }
 0x502   : > { %v1645_v61 = vmul.f32 %v2646_v13, %v1644_v12  ;;  %v2510_v12 = vld [vmem:[%s4453_s7 + $0x1e8] sm:$0xff] }
 0x504   : > { %v1646_v1 = vmul.f32 0.5, %v1645_v61  ;;  %v2509_v61 = vld [vmem:[%s4453_s7 + $0x1e0] sm:$0xff] }
 0x506   : > { %v1647_v51 = vsub.f32 1.5, %v1646_v1  ;;  %v2508_v1 = vld [vmem:[%s4453_s7 + $0x1d8] sm:$0xff] }
 0x508   : > { %v1648_v15 = vmul.f32 %v2646_v13, %v1647_v51  ;;  %v2507_v51 = vld [vmem:[%s4453_s7 + $0x1d0] sm:$0xff] }
 0x50a   : > { %v1652_v63 = vsel %vm1651_vm15, %v2646_v13, %v1648_v15  ;;  %v2511_v13 = vld [vmem:[%s4453_s7 + $0x1f0] sm:$0xff]  ;;  %v2506_v15 = vld [vmem:[%s4453_s7 + $0x1c8] sm:$0xff] }
 0x50b   : > { %v1653_v44 = vmul.f32 %v1652_v63, %v1641_v31  ;;  %1949 = vmatpush.msra.mxu1 %v2511_v13  ;;  %v2505_v31 = vld [vmem:[%s4453_s7 + $0x1c0] sm:$0xff]  ;;  %v2504_v63 = vld [vmem:[%s4453_s7 + $0x1b8] sm:$0xff] }
 0x50c   : > { %v2500_v13 = vld [vmem:[%s4453_s7 + $0x198] sm:$0xff] }
 0x50d   : > { %v1655_v30 = vmul.f32 %v1654_v27, %v1653_v44  ;;  %1950 = vmatpush.msra.mxu1 %v2510_v12  ;;  %v1751_v27 = vpop.f32.mrf.mxu3  ;;  %v2503_v44 = vld [vmem:[%s4453_s7 + $0x1b0] sm:$0xff]  ;;  %v1730_v12 = vperm.slane %v4225_v43, 0 }
 0x50f   : > { %v4165_v40 = vadd.f32 %v1656_v36, %v1655_v30  ;;  %1951 = vmatpush.msra.mxu1 %v2509_v61  ;;  %v2502_v36 = vld [vmem:[%s4453_s7 + $0x1a8] sm:$0xff]  ;;  %v2501_v30 = vld [vmem:[%s4453_s7 + $0x1a0] sm:$0xff]  ;;  %v2499_v61 = vld [vmem:[%s4453_s7 + $0x190] sm:$0xff] }
 0x511   : > { %1692 = vmatmul.f32.vlgmr.msrb.gmra.mxu2 %v4165_v40  ;;  %1952 = vmatpush.msra.mxu1 %v2508_v1 }
 0x513   : > { %1953 = vmatpush.msra.mxu1 %v2507_v51  ;;  %v2498_v51 = vld [vmem:[%s4453_s7 + $0x188] sm:$0xff] }
 0x515   : > { %1954 = vmatpush.msra.mxu1 %v2506_v15  ;;  %v1754_v1 = vpop.f32.mrf.mxu3  ;;  %v1752_v15 = vadd.f32 %v1751_v27, %v1730_v12 }
 0x517   : > { %1955 = vmatpush.msra.mxu1 %v2505_v31  ;;  %v2497_v31 = vld [vmem:[%s4453_s7 + $0x180] sm:$0xff]  ;;  %v1785_v32 = vrot.slane %v1752_v15, 4  ;;  %v1782_v56 = vrot.slane %v1752_v15, 1  ;;  %v1786_v27 = vrot.slane %v1752_v15, 5  ;;  %v1787_v52 = vrot.slane %v1752_v15, 6 }
 0x518   : > { %v1788_v54 = vrot.slane %v1752_v15, 7 }
 0x519   : > { %1956 = vmatpush.msra.mxu1 %v2504_v63  ;;  %v1755_v63 = vadd.f32 %v1754_v1, %v1730_v12 }
 0x51b   : > { %1957 = vmatpush.msra.mxu1 %v2503_v44  ;;  %v1675_v44 = vld [vmem:[%s4457_s11 + $0x7] sm:$0x1] }
 0x51d   : > { %1958 = vmatpush.msra.mxu1 %v2502_v36  ;;  %v1808_v36 = vlaneseq }
 0x51f   : > { %1959 = vmatpush.msra.mxu1 %v2501_v30  ;;  %v1783_v30 = vrot.slane %v1752_v15, 2  ;;  %vm4244_vm0 = vcmp.lt.s32.totalorder %v1808_v36, 128 }
 0x521   : > { %1960 = vmatpush.msra.mxu1 %v2500_v13  ;;  %v1784_v13 = vrot.slane %v1752_v15, 3 }
 0x523   : > { %1961 = vmatpush.msra.mxu1 %v2499_v61  ;;  %v1789_v61 = vrot.slane %v1755_v63, 1 }
 0x525   : > { %1962 = vmatpush.msra.mxu1 %v2498_v51 }
 0x527   : > { %1963 = vmatpush.msra.mxu1 %v2497_v31 }
 0x529   : > { %2030 = vmatpush.msrb.mxu1 %v3838_v57 }
 0x52b   : > { %2031 = vmatpush.msrb.mxu1 %v3843_v62 }
 0x52d   : > { %2032 = vmatpush.msrb.mxu1 %v3846_v37 }
 0x52f   : > { %2033 = vmatpush.msrb.mxu1 %v3849_v8 }
 0x531   : > { %2034 = vmatpush.msrb.mxu1 %v3861_v2 }
 0x533   : > { %2035 = vmatpush.msrb.mxu1 %v3870_v19  ;;  %v1731_v19 = vperm.slane %v4225_v43, 1 }
 0x535   : > { %2036 = vmatpush.msrb.mxu1 %v3879_v46  ;;  %v1774_v46 = vpop.f32.mrf.mxu0 }
 0x537   : > { %2037 = vmatpush.msrb.mxu1 %v3888_v55 }
 0x539   : > { %2038 = vmatpush.msrb.mxu1 %v3897_v5 }
 0x53b   : > { %2039 = vmatpush.msrb.mxu1 %v3909_v24 }
 0x53d   : > { %2040 = vmatpush.msrb.mxu1 %v3918_v14 }
 0x53f   : > { %2041 = vmatpush.msrb.mxu1 %v3927_v42 }
 0x594   : > { %v1693_v35 = vpop.f32.mrf.mxu2 }
 0x595   : > { %v1694_v4 = vadd.f32 %v1693_v35, %v1675_v44 }
 0x597   : > { %v1798_v1 = vmul.f32 %v1752_v15, %v1694_v4  ;;  %v1799_v51 = vmul.f32 %v1782_v56, %v1694_v4  ;;  %v1800_v25 = vmul.f32 %v1783_v30, %v1694_v4  ;;  %v1801_v11 = vmul.f32 %v1784_v13, %v1694_v4 }
 0x598   : > { %v1802_v31 = vmul.f32 %v1785_v32, %v1694_v4  ;;  %v1803_v33 = vmul.f32 %v1786_v27, %v1694_v4  ;;  %v1804_v35 = vmul.f32 %v1787_v52, %v1694_v4  ;;  %v1805_v44 = vmul.f32 %v1788_v54, %v1694_v4 }
 0x599   : > { %v4249_v21 = vmul.f32 %v1755_v63, %v1694_v4  ;;  %v4251_v57 = vmul.f32 %v1789_v61, %v1694_v4  ;;  %v1812_v36 = vsel %vm4244_vm0, %v1798_v1, -inf  ;;  %v1813_v58 = vsel %vm4244_vm0, %v1799_v51, -inf }
 0x59a   : > { %v1814_v56 = vsel %vm4244_vm0, %v1800_v25, -inf  ;;  %v1815_v62 = vsel %vm4244_vm0, %v1801_v11, -inf  ;;  %v1816_v54 = vsel %vm4244_vm0, %v1802_v31, -inf  ;;  %v1818_v52 = vsel %vm4244_vm0, %v1803_v33, -inf }
 0x59b   : > { %v1817_v4 = vmax.f32 %v1812_v36, %v1816_v54  ;;  %v1819_v32 = vmax.f32 %v1813_v58, %v1818_v52  ;;  %v1820_v15 = vsel %vm4244_vm0, %v1804_v35, -inf  ;;  %v1822_v37 = vsel %vm4244_vm0, %v1805_v44, -inf }
 0x59c   : > { %v1821_v63 = vmax.f32 %v1814_v56, %v1820_v15  ;;  %v1823_v30 = vmax.f32 %v1815_v62, %v1822_v37  ;;  %v1824_v13 = vsel %vm4244_vm0, %v4249_v21, -inf  ;;  %v1826_v27 = vsel %vm4244_vm0, %v4251_v57, -inf }
 0x59d   : > { %v1825_v61 = vmax.f32 %v1817_v4, %v1824_v13  ;;  %v1827_v58 = vmax.f32 %v1819_v32, %v1826_v27 }
 0x59e   : > { %v1829_v54 = vmax.f32 %v1821_v63, %v1823_v30 }
 0x59f   : > { %v1828_v36 = vmax.f32 %v1825_v61, %v1827_v58 }
 0x5a1   : > { %v4279_v52 = vmax.f32 %v1828_v36, %v1829_v54 }
 0x5a3   : > { %v1831_v8 = vsub.f32 %v1798_v1, %v4279_v52  ;;  %v1832_v56 = vsub.f32 %v1799_v51, %v4279_v52  ;;  %v1833_v62 = vsub.f32 %v1800_v25, %v4279_v52  ;;  %v1834_v12 = vsub.f32 %v1801_v11, %v4279_v52 }
 0x5a4   : > { %v1835_v2 = vsub.f32 %v1802_v31, %v4279_v52  ;;  %v1836_v4 = vsub.f32 %v1803_v33, %v4279_v52  ;;  %v1837_v1 = vsub.f32 %v1804_v35, %v4279_v52  ;;  %v4295_v33 = vadd.f32 %v1774_v46, %v1731_v19  ;;  %v4320_v46 = vld [vmem:[#allocation5 + $0x118] sm:$0xff] }
 0x5a5   : > { %v1841_v32 = vmul.f32 1.442695, %v1831_v8  ;;  %v1843_v15 = vmul.f32 1.442695, %v1832_v56  ;;  %v1845_v51 = vmul.f32 1.442695, %v1833_v62  ;;  %v1838_v11 = vsub.f32 %v1805_v44, %v4279_v52 }
 0x5a6   : > { %v1847_v37 = vmul.f32 1.442695, %v1834_v12  ;;  %v1849_v25 = vmul.f32 1.442695, %v1835_v2  ;;  %v1851_v55 = vmul.f32 1.442695, %v1836_v4  ;;  %v1839_v24 = vsub.f32 %v4249_v21, %v4279_v52 }
 0x5a7   : > { %2647 = vpow2.f32 %v1841_v32  ;;  %v1853_v5 = vmul.f32 1.442695, %v1837_v1  ;;  %v1855_v35 = vmul.f32 1.442695, %v1838_v11  ;;  %v1863_v63 = vrot.slane %v4295_v33, 1  ;;  %v4304_v44 = vld [vmem:[#allocation5 + $0x138] sm:$0xff] }
 0x5a8   : > { %2649 = vpow2.f32 %v1843_v15  ;;  %v1864_v30 = vrot.slane %v4295_v33, 2  ;;  %2042 = vmatpush.msrb.mxu1 %v4304_v44  ;;  %v1840_v13 = vsub.f32 %v4251_v57, %v4279_v52  ;;  %v1865_v61 = vrot.slane %v4295_v33, 3  ;;  %v4314_v8 = vld [vmem:[#allocation5 + $0x128] sm:$0xff] }
 0x5a9   : > { %2651 = vpow2.f32 %v1845_v51  ;;  %v1866_v58 = vrot.slane %v4295_v33, 4  ;;  %v1857_v62 = vmul.f32 1.442695, %v1839_v24 }
 0x5aa   : > { %2653 = vpow2.f32 %v1847_v37  ;;  %2043 = vmatpush.msrb.mxu1 %v4314_v8  ;;  %v1859_v51 = vmul.f32 1.442695, %v1840_v13 }
 0x5ab   : > { %2655 = vpow2.f32 %v1849_v25 }
 0x5ac   : > { %2657 = vpow2.f32 %v1851_v55  ;;  %2044 = vmatpush.msrb.mxu1 %v4320_v46  ;;  %v1867_v55 = vrot.slane %v4295_v33, 5 }
 0x5ad   : > { %v2648_v31 = vpop.eup %2647  ;;  %2659 = vpow2.f32 %v1853_v5 }
 0x5ae   : > { %v2650_v14 = vpop.eup %2649  ;;  %v1879_v42 = vmul.f32 %v2648_v31, %v4295_v33  ;;  %v1909_v21 = vsel %vm1889_vm1, %v2648_v31, 0.0  ;;  %2661 = vpow2.f32 %v1855_v35  ;;  %v4326_v31 = vld [vmem:[#allocation5 + $0x108] sm:$0xff] }
 0x5af   : > { %v2652_v27 = vpop.eup %2651  ;;  %v1880_v36 = vmul.f32 %v2650_v14, %v1863_v63  ;;  %v1910_v54 = vsel %vm1889_vm1, %v2650_v14, 0.0  ;;  %2045 = vmatpush.msrb.mxu1 %v4326_v31  ;;  %2663 = vpow2.f32 %v1857_v62  ;;  %v1868_v14 = vrot.slane %v4295_v33, 6 }
 0x5b0   : > { %v2654_v56 = vpop.eup %2653  ;;  %v1881_v57 = vmul.f32 %v2652_v27, %v1864_v30  ;;  %v1890_v52 = vsel %vm1889_vm1, %v1879_v42, 0.0  ;;  %v1911_v12 = vadd.f32 %v1910_v54, %v1909_v21  ;;  %v1912_v15 = vsel %vm1889_vm1, %v2652_v27, 0.0 }
 0x5b1   : > { %v2656_v2 = vpop.eup %2655  ;;  %v1882_v4 = vmul.f32 %v2654_v56, %v1865_v61  ;;  %v1891_v32 = vsel %vm1889_vm1, %v1880_v36, 0.0  ;;  %v1914_v24 = vsel %vm1889_vm1, %v2654_v56, 0.0  ;;  %2665 = vpow2.f32 %v1859_v51 }
 0x5b2   : > { %v2658_v1 = vpop.eup %2657  ;;  %v1892_v37 = vadd.f32 %v1891_v32, %v1890_v52  ;;  %v1913_v25 = vadd.f32 %v1912_v15, %v1911_v12  ;;  %v1883_v11 = vmul.f32 %v2656_v2, %v1866_v58  ;;  %v1893_v5 = vsel %vm1889_vm1, %v1881_v57, 0.0  ;;  %v1777_v12 = vpop.f32.mrf.mxu0 }
 0x5b3   : > { %v2660_v35 = vpop.eup %2659  ;;  %v1884_v13 = vmul.f32 %v2658_v1, %v1867_v55  ;;  %v1895_v42 = vsel %vm1889_vm1, %v1882_v4, 0.0  ;;  %v1916_v21 = vsel %vm1889_vm1, %v2656_v2, 0.0  ;;  %v1918_v56 = vsel %vm1889_vm1, %v2658_v1, 0.0 }
 0x5b4   : > { %v1894_v63 = vadd.f32 %v1893_v5, %v1892_v37  ;;  %v1915_v30 = vadd.f32 %v1914_v24, %v1913_v25  ;;  %v2662_v58 = vpop.eup %2661  ;;  %v1885_v36 = vmul.f32 %v2660_v35, %v1868_v14  ;;  %v1897_v54 = vsel %vm1889_vm1, %v1883_v11, 0.0 }
 0x5b5   : > { %v1869_v62 = vrot.slane %v4295_v33, 7  ;;  %v1899_v32 = vsel %vm1889_vm1, %v1884_v13, 0.0  ;;  %v1920_v4 = vsel %vm1889_vm1, %v2660_v35, 0.0  ;;  %v2664_v15 = vpop.eup %2663  ;;  %v1922_v55 = vsel %vm1889_vm1, %v2662_v58, 0.0 }
 0x5b6   : > { %v1896_v27 = vadd.f32 %v1895_v42, %v1894_v63  ;;  %v1917_v61 = vadd.f32 %v1916_v21, %v1915_v30  ;;  %v1901_v25 = vsel %vm1889_vm1, %v1885_v36, 0.0  ;;  %v1778_v1 = vadd.f32 %v1777_v12, %v1731_v19 }
 0x5b7   : > { %v1886_v2 = vmul.f32 %v2662_v58, %v1869_v62  ;;  %v2666_v11 = vpop.eup %2665  ;;  %v1924_v24 = vsel %vm1889_vm1, %v2664_v15, 0.0 }
 0x5b8   : > { %v1898_v57 = vadd.f32 %v1897_v54, %v1896_v27  ;;  %v1919_v52 = vadd.f32 %v1918_v56, %v1917_v61  ;;  %v1887_v63 = vmul.f32 %v2664_v15, %v1778_v1  ;;  %v1926_v13 = vsel %vm1889_vm1, %v2666_v11, 0.0  ;;  %v1947_v56 = vld [vmem:[%s4457_s11 + $0x8] sm:$0x1]  ;;  %v2098_v15 = vld [vmem:[#allocation7 + $0x1e0] sm:$0xff] }
 0x5b9   : > { %v1903_v30 = vsel %vm1889_vm1, %v1886_v2, 0.0  ;;  %v1870_v42 = vrot.slane %v1778_v1, 1  ;;  %v2099_v2 = vld [vmem:[#allocation7 + $0x1e8] sm:$0xff]  ;;  %v2090_v1 = vld [vmem:[#allocation7 + $0x1a0] sm:$0xff] }
 0x5ba   : > { %v1900_v51 = vadd.f32 %v1899_v32, %v1898_v57  ;;  %v1921_v37 = vadd.f32 %v1920_v4, %v1919_v52  ;;  %v1905_v61 = vsel %vm1889_vm1, %v1887_v63, 0.0  ;;  %v2100_v32 = vld [vmem:[#allocation7 + $0x1f0] sm:$0xff]  ;;  %v2101_v4 = vld [vmem:[#allocation7 + $0x1f8] sm:$0xff]  ;;  %v2086_v63 = vld [vmem:[#allocation7 + $0x180] sm:$0xff] }
 0x5bb   : > { %v1888_v27 = vmul.f32 %v2666_v11, %v1870_v42  ;;  %2109 = vmatpush.msrb.mxu2 %v2100_v32  ;;  %2129 = vmatpush.msrb.mxu3 %v2101_v4  ;;  %v2093_v11 = vld [vmem:[#allocation7 + $0x1b8] sm:$0xff]  ;;  %v2083_v42 = vld [vmem:[#allocation7 + $0x168] sm:$0xff] }
 0x5bc   : > { %v1902_v33 = vadd.f32 %v1901_v25, %v1900_v51  ;;  %v1923_v5 = vadd.f32 %v1922_v55, %v1921_v37  ;;  %v2096_v51 = vld [vmem:[#allocation7 + $0x1d0] sm:$0xff]  ;;  %v2094_v37 = vld [vmem:[#allocation7 + $0x1c0] sm:$0xff]  ;;  %v2095_v25 = vld [vmem:[#allocation7 + $0x1c8] sm:$0xff] }
 0x5bd   : > { %v1907_v43 = vsel %vm1889_vm1, %v1888_v27, 0.0  ;;  %2110 = vmatpush.msrb.mxu2 %v2098_v15  ;;  %2130 = vmatpush.msrb.mxu3 %v2099_v2  ;;  %v2092_v55 = vld [vmem:[#allocation7 + $0x1b0] sm:$0xff]  ;;  %v2081_v27 = vld [vmem:[#allocation7 + $0x158] sm:$0xff] }
 0x5be   : > { %v1925_v35 = vadd.f32 %v1924_v24, %v1923_v5  ;;  %v1904_v14 = vadd.f32 %v1903_v30, %v1902_v33  ;;  %v2091_v33 = vld [vmem:[#allocation7 + $0x1a8] sm:$0xff]  ;;  %v2088_v5 = vld [vmem:[#allocation7 + $0x190] sm:$0xff]  ;;  %v2089_v24 = vld [vmem:[#allocation7 + $0x198] sm:$0xff] }
 0x5bf   : > { %2111 = vmatpush.msrb.mxu2 %v2096_v51  ;;  %v2087_v30 = vld [vmem:[#allocation7 + $0x188] sm:$0xff]  ;;  %v2167_v32 = vld [vmem:[#allocation8 + $0x178] sm:$0xff]  ;;  %v2166_v2 = vld [vmem:[#allocation8 + $0x170] sm:$0xff] }
 0x5c0   : > { %v1927_v21 = vadd.f32 %v1926_v13, %v1925_v35  ;;  %v1906_v58 = vadd.f32 %v1905_v61, %v1904_v14  ;;  %v2084_v35 = vld [vmem:[#allocation7 + $0x170] sm:$0xff]  ;;  %v2085_v14 = vld [vmem:[#allocation7 + $0x178] sm:$0xff]  ;;  %v2082_v13 = vld [vmem:[#allocation7 + $0x160] sm:$0xff]  ;;  %2185 = vmatpush.msra.mxu0 %v2167_v32 }
 0x5c1   : > { %2112 = vmatpush.msrb.mxu2 %v2094_v37  ;;  %v2078_v61 = vld [vmem:[#allocation7 + $0x140] sm:$0xff]  ;;  %v2183_v4 = vld [vmem:[#allocation8 + $0x1f8] sm:$0xff]  ;;  %v2182_v51 = vld [vmem:[#allocation8 + $0x1f0] sm:$0xff] }
 0x5c2   : > { %2667 = vrcp.f32 %v1927_v21  ;;  %v1908_v19 = vadd.f32 %v1907_v43, %v1906_v58  ;;  %v2080_v21 = vld [vmem:[#allocation7 + $0x150] sm:$0xff]  ;;  %v2079_v58 = vld [vmem:[#allocation7 + $0x148] sm:$0xff]  ;;  %2186 = vmatpush.msra.mxu0 %v2166_v2  ;;  %v2742_v32 = vld [vmem:[#allocation5 + $0x1f8] sm:$0xff] }
 0x5c3   : > { %2113 = vmatpush.msrb.mxu2 %v2092_v55  ;;  %v2073_v55 = vld [vmem:[#allocation7 + $0x118] sm:$0xff] }
 0x5c4   : > { %v2745_v2 = vld [vmem:[#allocation5 + $0xd8] sm:$0xff] }
 0x5c5   : > { %2114 = vmatpush.msrb.mxu2 %v2090_v1  ;;  %v2181_v1 = vld [vmem:[#allocation8 + $0x1e8] sm:$0xff] }
 0x5c7   : > { %2115 = vmatpush.msrb.mxu2 %v2088_v5  ;;  %v2070_v5 = vld [vmem:[#allocation7 + $0x100] sm:$0xff] }
 0x5c8   : > { %v2668_v36 = vpop.eup %2667 }
 0x5c9   : > { %v1929_v54 = vmul.f32 %v2668_v36, %v1908_v19  ;;  %2116 = vmatpush.msrb.mxu2 %v2086_v63  ;;  %v2076_v19 = vld [vmem:[#allocation7 + $0x130] sm:$0xff]  ;;  %v2077_v36 = vld [vmem:[#allocation7 + $0x138] sm:$0xff]  ;;  %v2164_v63 = vld [vmem:[#allocation8 + $0x160] sm:$0xff] }
 0x5cb   : > { %1964 = vmatmul.f32.vlgmr.msra.gmra.mxu1 %v1929_v54  ;;  %2117 = vmatpush.msrb.mxu2 %v2084_v35 }
 0x5cc   : > { %2205 = vmatpush.msra.mxu1 %v2183_v4  ;;  %v2743_v4 = vld [vmem:[#allocation5 + $0xe8] sm:$0xff] }
 0x5cd   : > { %2118 = vmatpush.msrb.mxu2 %v2082_v13  ;;  %v2179_v13 = vld [vmem:[#allocation8 + $0x1d8] sm:$0xff] }
 0x5ce   : > { %2206 = vmatpush.msra.mxu1 %v2182_v51  ;;  %v2746_v51 = vld [vmem:[#allocation5 + $0x1d8] sm:$0xff] }
 0x5cf   : > { %2119 = vmatpush.msrb.mxu2 %v2080_v21  ;;  %v2178_v21 = vld [vmem:[#allocation8 + $0x1d0] sm:$0xff] }
 0x5d0   : > { %2207 = vmatpush.msra.mxu1 %v2181_v1  ;;  %v2752_v1 = vld [vmem:[#allocation5 + $0x1a8] sm:$0xff] }
 0x5d1   : > { %2120 = vmatpush.msrb.mxu2 %v2078_v61  ;;  %v2177_v61 = vld [vmem:[#allocation8 + $0x1c8] sm:$0xff] }
 0x5d3   : > { %2121 = vmatpush.msrb.mxu2 %v2076_v19 }
 0x648   : > { %v1965_v62 = vpop.f32.mrf.mxu1 }
 0x649   : > { %v1966_v57 = vadd.f32 %v1965_v62, %v1947_v56  ;;  %v2074_v62 = vld [vmem:[#allocation7 + $0x120] sm:$0xff] }
 0x64a   : > { %2122 = vmatpush.msrb.mxu2 %v2074_v62  ;;  %v2172_v62 = vld [vmem:[#allocation8 + $0x1a0] sm:$0xff] }
 0x64b   : > { %v4350_v52 = vadd.f32 %v1966_v57, %v4165_v40  ;;  %v2097_v40 = vld [vmem:[#allocation7 + $0x1d8] sm:$0xff] }
 0x64c   : > { %2131 = vmatpush.msrb.mxu3 %v2097_v40 }
 0x64d   : > { %1986 = vmatmul.f32.vlgmr.msra.gmra.mxu2 %v4350_v52  ;;  %2026 = vmatmul.f32.vlgmr.msrb.gmra.mxu0 %v4350_v52  ;;  %v1969_v12 = vmul.f32 %v4350_v52, %v4350_v52 }
 0x64e   : > { %2132 = vmatpush.msrb.mxu3 %v2095_v25  ;;  %v2072_v25 = vld [vmem:[#allocation7 + $0x110] sm:$0xff] }
 0x64f   : > { %2006 = vmatmul.f32.vlgmr.msra.gmra.mxu3 %v1969_v12  ;;  %2046 = vmatmul.f32.vlgmr.msrb.gmra.mxu1 %v1969_v12  ;;  %v2075_v12 = vld [vmem:[#allocation7 + $0x128] sm:$0xff] }
 0x650   : > { %2133 = vmatpush.msrb.mxu3 %v2093_v11  ;;  %v2165_v11 = vld [vmem:[#allocation8 + $0x168] sm:$0xff]  ;;  %2123 = vmatpush.msrb.mxu2 %v2072_v25  ;;  %v2749_v25 = vld [vmem:[#allocation5 + $0xb8] sm:$0xff] }
 0x651   : > { %2187 = vmatpush.msra.mxu0 %v2165_v11  ;;  %v2751_v11 = vld [vmem:[#allocation5 + $0xa8] sm:$0xff] }
 0x652   : > { %2134 = vmatpush.msrb.mxu3 %v2091_v33  ;;  %2124 = vmatpush.msrb.mxu2 %v2070_v5  ;;  %v2753_v5 = vld [vmem:[#allocation5 + $0x198] sm:$0xff] }
 0x653   : > { %2188 = vmatpush.msra.mxu0 %v2164_v63  ;;  %v2754_v63 = vld [vmem:[#allocation5 + $0x188] sm:$0xff] }
 0x654   : > { %2135 = vmatpush.msrb.mxu3 %v2089_v24  ;;  %v2071_v24 = vld [vmem:[#allocation7 + $0x108] sm:$0xff]  ;;  %2227 = vmatpush.msra.mxu2 %v4128_v7  ;;  %v2159_v7 = vld [vmem:[#allocation8 + $0x138] sm:$0xff] }
 0x656   : > { %2136 = vmatpush.msrb.mxu3 %v2087_v30  ;;  %v2180_v30 = vld [vmem:[#allocation8 + $0x1e0] sm:$0xff]  ;;  %2228 = vmatpush.msra.mxu2 %v4131_v28  ;;  %v2158_v28 = vld [vmem:[#allocation8 + $0x130] sm:$0xff] }
 0x657   : > { %2208 = vmatpush.msra.mxu1 %v2180_v30  ;;  %v4594_v30 = vld [vmem:[#allocation17_spill] sm:$0xff] }
 0x658   : > { %2137 = vmatpush.msrb.mxu3 %v2085_v14  ;;  %v2163_v14 = vld [vmem:[#allocation8 + $0x158] sm:$0xff]  ;;  %2229 = vmatpush.msra.mxu2 %v4134_v41  ;;  %v2157_v41 = vld [vmem:[#allocation8 + $0x128] sm:$0xff] }
 0x659   : > { %2189 = vmatpush.msra.mxu0 %v2163_v14  ;;  %2209 = vmatpush.msra.mxu1 %v2179_v13  ;;  %v2513_v14 = vld [vmem:[%s4555_s23 + $0x1] ss:$2 sm:$0x3]  ;;  %v4595_v13 = vld [vmem:[#allocation18_spill] sm:$0xff] }
 0x65a   : > { %2138 = vmatpush.msrb.mxu3 %v2083_v42  ;;  %v2162_v42 = vld [vmem:[#allocation8 + $0x150] sm:$0xff]  ;;  %2230 = vmatpush.msra.mxu2 %v4137_v38  ;;  %v2156_v38 = vld [vmem:[#allocation8 + $0x120] sm:$0xff] }
 0x65b   : > { %2190 = vmatpush.msra.mxu0 %v2162_v42  ;;  %2210 = vmatpush.msra.mxu1 %v2178_v21  ;;  %v2756_v42 = vld [vmem:[#allocation5 + $0x168] sm:$0xff]  ;;  %v2105_v21 = vperm.slane %v2513_v14, 0 }
 0x65c   : > { %2139 = vmatpush.msrb.mxu3 %v2081_v27  ;;  %v2161_v27 = vld [vmem:[#allocation8 + $0x148] sm:$0xff]  ;;  %2231 = vmatpush.msra.mxu2 %v4140_v53  ;;  %v2155_v53 = vld [vmem:[#allocation8 + $0x118] sm:$0xff] }
 0x65d   : > { %2191 = vmatpush.msra.mxu0 %v2161_v27  ;;  %2211 = vmatpush.msra.mxu1 %v2177_v61  ;;  %v2106_v27 = vperm.slane %v2513_v14, 1  ;;  %v4596_v61 = vld [vmem:[#allocation19_spill] sm:$0xff] }
 0x65e   : > { %2140 = vmatpush.msrb.mxu3 %v2079_v58  ;;  %v2160_v58 = vld [vmem:[#allocation8 + $0x140] sm:$0xff]  ;;  %2232 = vmatpush.msra.mxu2 %v4143_v39 }
 0x65f   : > { %2192 = vmatpush.msra.mxu0 %v2160_v58  ;;  %v2757_v58 = vld [vmem:[#allocation5 + $0x158] sm:$0xff] }
 0x660   : > { %2141 = vmatpush.msrb.mxu3 %v2077_v36  ;;  %v2175_v36 = vld [vmem:[#allocation8 + $0x1b8] sm:$0xff]  ;;  %2233 = vmatpush.msra.mxu2 %v4146_v47 }
 0x661   : > { %2193 = vmatpush.msra.mxu0 %v2159_v7 }
 0x662   : > { %2142 = vmatpush.msrb.mxu3 %v2075_v12  ;;  %v2171_v12 = vld [vmem:[#allocation8 + $0x198] sm:$0xff]  ;;  %2234 = vmatpush.msra.mxu2 %v4150_v16 }
 0x663   : > { %2194 = vmatpush.msra.mxu0 %v2158_v28  ;;  %v2759_v28 = vld [vmem:[#allocation5 + $0x38] sm:$0xff] }
 0x664   : > { %2143 = vmatpush.msrb.mxu3 %v2073_v55  ;;  %2235 = vmatpush.msra.mxu2 %v4156_v20  ;;  %v4590_v20 = vld [vmem:[#allocation25_spill] sm:$0xff]  ;;  %v2750_v55 = vld [vmem:[#allocation5 + $0x1b8] sm:$0xff] }
 0x665   : > { %2195 = vmatpush.msra.mxu0 %v2157_v41  ;;  %v2760_v41 = vld [vmem:[#allocation5 + $0x28] sm:$0xff] }
 0x666   : > { %2144 = vmatpush.msrb.mxu3 %v2071_v24  ;;  %2236 = vmatpush.msra.mxu2 %v4162_v34  ;;  %v4591_v34 = vld [vmem:[#allocation23_spill] sm:$0xff]  ;;  %v4593_v24 = vld [vmem:[#allocation16_spill] sm:$0xff] }
 0x667   : > { %2196 = vmatpush.msra.mxu0 %v2156_v38 }
 0x668   : > { %2247 = vmatpush.msra.mxu3 %v4007_v22  ;;  %2237 = vmatpush.msra.mxu2 %v4167_v45  ;;  %v2170_v45 = vld [vmem:[#allocation8 + $0x190] sm:$0xff] }
 0x669   : > { %2197 = vmatpush.msra.mxu0 %v2155_v53 }
 0x66a   : > { %2248 = vmatpush.msra.mxu3 %v4013_v29  ;;  %2238 = vmatpush.msra.mxu2 %v4171_v50  ;;  %v2153_v50 = vld [vmem:[#allocation8 + $0x108] sm:$0xff] }
 0x66c   : > { %2249 = vmatpush.msra.mxu3 %v4017_v59  ;;  %2239 = vmatpush.msra.mxu2 %v4174_v23  ;;  %v2169_v23 = vld [vmem:[#allocation8 + $0x188] sm:$0xff] }
 0x66e   : > { %2250 = vmatpush.msra.mxu3 %v4021_v3  ;;  %2240 = vmatpush.msra.mxu2 %v4177_v48  ;;  %v2741_v48 = vld [vmem:[#allocation5 + $0xf8] sm:$0xff] }
 0x670   : > { %2251 = vmatpush.msra.mxu3 %v4025_v60 }
 0x672   : > { %2252 = vmatpush.msra.mxu3 %v4029_v0 }
 0x674   : > { %2253 = vmatpush.msra.mxu3 %v4035_v17  ;;  %v2065_v17 = vld [vmem:[%s4457_s11 + $0xc] sm:$0x1] }
 0x676   : > { %2254 = vmatpush.msra.mxu3 %v4041_v18  ;;  %v2067_v18 = vld [vmem:[%s4457_s11 + $0xd] sm:$0x1] }
 0x678   : > { %2255 = vmatpush.msra.mxu3 %v4047_v6  ;;  %v4587_v6 = vld [vmem:[#allocation21_spill] sm:$0xff] }
 0x67a   : > { %2256 = vmatpush.msra.mxu3 %v4053_v26  ;;  %v4588_v26 = vld [vmem:[#allocation24_spill] sm:$0xff] }
 0x67b   : > { %2241 = vmatpush.msra.mxu2 %v4588_v26 }
 0x67c   : > { %2257 = vmatpush.msra.mxu3 %v4059_v49  ;;  %v4589_v49 = vld [vmem:[#allocation22_spill] sm:$0xff] }
 0x67d   : > { %2242 = vmatpush.msra.mxu2 %v4590_v20 }
 0x67e   : > { %2258 = vmatpush.msra.mxu3 %v4065_v9  ;;  %v2154_v9 = vld [vmem:[#allocation8 + $0x110] sm:$0xff] }
 0x67f   : > { %2198 = vmatpush.msra.mxu0 %v2154_v9 }
 0x680   : > { %2259 = vmatpush.msra.mxu3 %v4068_v10  ;;  %v2168_v10 = vld [vmem:[#allocation8 + $0x180] sm:$0xff] }
 0x681   : > { %2199 = vmatpush.msra.mxu0 %v2153_v50 }
 0x682   : > { %2260 = vmatpush.msra.mxu3 %v4587_v6 }
 0x684   : > { %2261 = vmatpush.msra.mxu3 %v4589_v49 }
 0x686   : > { %2262 = vmatpush.msra.mxu3 %v4591_v34 }
 0x6ca   : > { %v2027_v15 = vpop.f32.mrf.mxu0 }
 0x6cc   : > { %v2047_v43 = vpop.f32.mrf.mxu1 }
 0x6cd   : > { %v2048_v40 = vadd.f32 %v2047_v43, %v2027_v15  ;;  %v2176_v43 = vld [vmem:[#allocation8 + $0x1c0] sm:$0xff]  ;;  %v2744_v15 = vld [vmem:[#allocation5 + $0x1e8] sm:$0xff] }
 0x6ce   : > { %2212 = vmatpush.msra.mxu1 %v2176_v43  ;;  %v4597_v43 = vld [vmem:[#allocation20_spill] sm:$0xff] }
 0x6d0   : > { %v1987_v54 = vpop.f32.mrf.mxu2  ;;  %2213 = vmatpush.msra.mxu1 %v2175_v36 }
 0x6d2   : > { %v2007_v56 = vpop.f32.mrf.mxu3 }
 0x6d3   : > { %v4356_v57 = vadd.f32 %v2007_v56, %v1987_v54  ;;  %v2174_v54 = vld [vmem:[#allocation8 + $0x1b0] sm:$0xff]  ;;  %v2173_v56 = vld [vmem:[#allocation8 + $0x1a8] sm:$0xff] }
 0x6d4   : > { %2214 = vmatpush.msra.mxu1 %v2174_v54 }
 0x6d5   : > { %v2050_v37 = vmul.f32 %v4356_v57, %v4356_v57  ;;  %v2052_v0 = vsub.f32 %v4350_v52, %v4356_v57  ;;  %v2152_v57 = vld [vmem:[#allocation8 + $0x100] sm:$0xff] }
 0x6d6   : > { %2215 = vmatpush.msra.mxu1 %v2173_v56  ;;  %2200 = vmatpush.msra.mxu0 %v2152_v57  ;;  %v2761_v56 = vld [vmem:[#allocation5 + $0x18] sm:$0xff] }
 0x6d7   : > { %v2051_v33 = vsub.f32 %v2048_v40, %v2050_v37  ;;  %v2747_v40 = vld [vmem:[#allocation5 + $0xc8] sm:$0xff] }
 0x6d8   : > { %2216 = vmatpush.msra.mxu1 %v2172_v62  ;;  %2267 = vmatpush.msrb.mxu0 %v2741_v48  ;;  %v2748_v37 = vld [vmem:[#allocation5 + $0x1c8] sm:$0xff] }
 0x6d9   : > { %v4360_v35 = vadd.f32 1e-05, %v2051_v33  ;;  %v4592_v33 = vld [vmem:[#allocation15_spill] sm:$0xff] }
 0x6da   : > { %2217 = vmatpush.msra.mxu1 %v2171_v12  ;;  %2268 = vmatpush.msrb.mxu0 %v2743_v4 }
 0x6db   : > { %2669 = vrsqrt.f32 %v4360_v35  ;;  %vm2060_vm3 = vweird.f32 %v4360_v35 }
 0x6dc   : > { %2218 = vmatpush.msra.mxu1 %v2170_v45  ;;  %2269 = vmatpush.msrb.mxu0 %v2745_v2 }
 0x6de   : > { %2219 = vmatpush.msra.mxu1 %v2169_v23  ;;  %2270 = vmatpush.msrb.mxu0 %v2747_v40  ;;  %v2322_v23 = vld [vmem:[%s4457_s11 + $0xe] sm:$0x1] }
 0x6e0   : > { %2220 = vmatpush.msra.mxu1 %v2168_v10  ;;  %2271 = vmatpush.msrb.mxu0 %v2749_v25  ;;  %v2324_v10 = vld [vmem:[%s4457_s11 + $0xf] sm:$0x1] }
 0x6e1   : > { %v2670_v19 = vpop.eup %2669 }
 0x6e2   : > { %v2055_v22 = vmul.f32 %v2670_v19, %v4360_v35  ;;  %vm2061_vm2 = vweird.f32 %v2670_v19  ;;  %2287 = vmatpush.msrb.mxu1 %v2742_v32  ;;  %2272 = vmatpush.msrb.mxu0 %v2751_v11  ;;  %v2755_v35 = vld [vmem:[#allocation5 + $0x178] sm:$0xff] }
 0x6e3   : > { %vm2062_vm4 = vmor %vm2060_vm3, %vm2061_vm2 }
 0x6e4   : > { %v2056_v29 = vmul.f32 %v2670_v19, %v2055_v22  ;;  %2288 = vmatpush.msrb.mxu1 %v2744_v15  ;;  %2273 = vmatpush.msrb.mxu0 %v4592_v33 }
 0x6e6   : > { %v2057_v59 = vmul.f32 0.5, %v2056_v29  ;;  %2289 = vmatpush.msrb.mxu1 %v2746_v51  ;;  %2274 = vmatpush.msrb.mxu0 %v4593_v24 }
 0x6e8   : > { %v2058_v3 = vsub.f32 1.5, %v2057_v59  ;;  %2290 = vmatpush.msrb.mxu1 %v2748_v37  ;;  %2275 = vmatpush.msrb.mxu0 %v4594_v30 }
 0x6ea   : > { %v2059_v60 = vmul.f32 %v2670_v19, %v2058_v3  ;;  %2291 = vmatpush.msrb.mxu1 %v2750_v55  ;;  %2276 = vmatpush.msrb.mxu0 %v4595_v13  ;;  %v2762_v3 = vld [vmem:[#allocation5 + $0x8] sm:$0xff] }
 0x6ec   : > { %v2063_v39 = vsel %vm2062_vm4, %v2670_v19, %v2059_v60  ;;  %2292 = vmatpush.msrb.mxu1 %v2752_v1  ;;  %2277 = vmatpush.msrb.mxu0 %v4596_v61  ;;  %v2758_v19 = vld [vmem:[#allocation5 + $0x148] sm:$0xff] }
 0x6ed   : > { %v2064_v47 = vmul.f32 %v2063_v39, %v2052_v0 }
 0x6ee   : > { %2293 = vmatpush.msrb.mxu1 %v2753_v5  ;;  %2278 = vmatpush.msrb.mxu0 %v4597_v43 }
 0x6ef   : > { %v2066_v16 = vmul.f32 %v2065_v17, %v2064_v47 }
 0x6f0   : > { %2294 = vmatpush.msrb.mxu1 %v2754_v63  ;;  %2279 = vmatpush.msrb.mxu0 %v2759_v28 }
 0x6f1   : > { %v4395_v52 = vadd.f32 %v2067_v18, %v2066_v16 }
 0x6f2   : > { %2295 = vmatpush.msrb.mxu1 %v2755_v35  ;;  %2280 = vmatpush.msrb.mxu0 %v2760_v41 }
 0x6f3   : > { %2125 = vmatmul.f32.vlgmr.msrb.gmra.mxu2 %v4395_v52  ;;  %2145 = vmatmul.f32.vlgmr.msrb.gmra.mxu3 %v4395_v52 }
 0x6f4   : > { %2296 = vmatpush.msrb.mxu1 %v2756_v42  ;;  %2281 = vmatpush.msrb.mxu0 %v2761_v56 }
 0x6f6   : > { %2297 = vmatpush.msrb.mxu1 %v2757_v58  ;;  %2282 = vmatpush.msrb.mxu0 %v2762_v3 }
 0x6f8   : > { %2298 = vmatpush.msrb.mxu1 %v2758_v19 }
 0x6fa   : > { %2299 = vmatpush.msrb.mxu1 %v4304_v44  ;;  %v2184_v44 = vld [vmem:[%s4457_s11 + $0x9] sm:$0x1] }
 0x6fc   : > { %2300 = vmatpush.msrb.mxu1 %v4314_v8 }
 0x6fe   : > { %2301 = vmatpush.msrb.mxu1 %v4320_v46 }
 0x700   : > { %2302 = vmatpush.msrb.mxu1 %v4326_v31 }
 0x776   : > { %v2126_v22 = vpop.f32.mrf.mxu2  ;;  %v2146_v7 = vpop.f32.mrf.mxu3 }
 0x777   : > { %v2127_v36 = vadd.f32 %v2126_v22, %v2105_v21  ;;  %v2147_v29 = vadd.f32 %v2146_v7, %v2106_v27 }
 0x779   : > { %v2149_v54 = vmax.f32 %v2127_v36, 0.0  ;;  %v2150_v59 = vmax.f32 %v2147_v29, 0.0 }
 0x77b   : > { %2201 = vmatmul.f32.vlgmr.msra.gmra.mxu0 %v2149_v54  ;;  %2221 = vmatmul.f32.vlgmr.msra.gmra.mxu1 %v2150_v59 }
 0x7f8   : > { %v2202_v38 = vpop.f32.mrf.mxu0  ;;  %v2222_v60 = vpop.f32.mrf.mxu1 }
 0x7f9   : > { %v2203_v62 = vadd.f32 %v2202_v38, %v2184_v44 }
 0x7fb   : > { %v2223_v53 = vadd.f32 %v2222_v60, %v2203_v62 }
 0x7fd   : > { %v2225_v8 = vadd.f32 %v2223_v53, %v4395_v52 }
 0x7ff   : > { %2243 = vmatmul.f32.vlgmr.msra.gmra.mxu2 %v2225_v8  ;;  %2283 = vmatmul.f32.vlgmr.msrb.gmra.mxu0 %v2225_v8  ;;  %v2226_v12 = vmul.f32 %v2225_v8, %v2225_v8 }
 0x801   : > { %2263 = vmatmul.f32.vlgmr.msra.gmra.mxu3 %v2226_v12  ;;  %2303 = vmatmul.f32.vlgmr.msrb.gmra.mxu1 %v2226_v12 }
 0x87c   : > { %v2284_v31 = vpop.f32.mrf.mxu0 }
 0x87e   : > { %v2304_v46 = vpop.f32.mrf.mxu1 }
 0x87f   : > { %v2305_v47 = vadd.f32 %v2304_v46, %v2284_v31 }
 0x882   : > { %v2244_v0 = vpop.f32.mrf.mxu2 }
 0x884   : > { %v2264_v39 = vpop.f32.mrf.mxu3 }
 0x885   : > { %v2265_v17 = vadd.f32 %v2264_v39, %v2244_v0 }
 0x887   : > { %v2307_v18 = vmul.f32 %v2265_v17, %v2265_v17  ;;  %v2309_v45 = vsub.f32 %v2225_v8, %v2265_v17 }
 0x889   : > { %v2308_v16 = vsub.f32 %v2305_v47, %v2307_v18 }
 0x88b   : > { %v2310_v6 = vadd.f32 1e-05, %v2308_v16 }
 0x88d   : > { %2671 = vrsqrt.f32 %v2310_v6  ;;  %vm2317_vm6 = vweird.f32 %v2310_v6 }
 0x893   : > { %v2672_v26 = vpop.eup %2671 }
 0x894   : > { %v2312_v49 = vmul.f32 %v2672_v26, %v2310_v6  ;;  %vm2318_vm5 = vweird.f32 %v2672_v26 }
 0x895   : > { %vm2319_vm7 = vmor %vm2317_vm6, %vm2318_vm5 }
 0x896   : > { %v2313_v20 = vmul.f32 %v2672_v26, %v2312_v49 }
 0x898   : > { %v2314_v34 = vmul.f32 0.5, %v2313_v20 }
 0x89a   : > { %v2315_v52 = vsub.f32 1.5, %v2314_v34 }
 0x89c   : > { %v2316_v9 = vmul.f32 %v2672_v26, %v2315_v52 }
 0x89e   : > { %v2320_v50 = vsel %vm2319_vm7, %v2672_v26, %v2316_v9 }
 0x89f   : > { %v2321_v57 = vmul.f32 %v2320_v50, %v2309_v45 }
 0x8a1   : > { %v2323_v48 = vmul.f32 %v2322_v23, %v2321_v57 }
 0x8a3   : > { %v2325_v32 = vadd.f32 %v2324_v10, %v2323_v48 }
 0x8a5   : > { %v2326_v4 = vsub.f32 0.0, %v2325_v32 }
 0x8a7   : > { %v2327_v15 = vmul.f32 1.442695, %v2326_v4 }
 0x8a9   : > { %2673 = vpow2.f32 %v2327_v15 }
 0x8af   : > { %v2674_v2 = vpop.eup %2673 }
 0x8b0   : > { %v2329_v51 = vadd.f32 1.0, %v2674_v2 }
 0x8b2   : > { %2675 = vrcp.f32 %v2329_v51  ;;  %v2341_v55 = vand.u32 2147483648, %v2329_v51  ;;  %v2339_v1 = vand.u32 2147483647, %v2329_v51  ;;  %vm2335_vm9 = vweird.f32 %v2329_v51 }
 0x8b4   : > { %v2342_v5 = vor.u32 1.1754944e-38, %v2341_v55  ;;  %vm2340_vm11 = vcmp.eq.f32.partialorder %v2339_v1, 8.507059e+37 }
 0x8b8   : > { %v2676_v40 = vpop.eup %2675 }
 0x8b9   : > { %v2331_v37 = vmul.f32 %v2676_v40, %v2329_v51  ;;  %vm2336_vm8 = vweird.f32 %v2676_v40 }
 0x8ba   : > { %vm2337_vm10 = vmor %vm2335_vm9, %vm2336_vm8 }
 0x8bb   : > { %v2332_v25 = vsub.f32 1.0, %v2331_v37 }
 0x8bd   : > { %v2333_v11 = vmul.f32 %v2676_v40, %v2332_v25 }
 0x8bf   : > { %v2334_v33 = vadd.f32 %v2676_v40, %v2333_v11 }
 0x8c1   : > { %v2338_v24 = vsel %vm2337_vm10, %v2676_v40, %v2334_v33 }
 0x8c2   : > { %v2343_v63 = vsel %vm2340_vm11, %v2342_v5, %v2338_v24 }
 0x8c3   : > { %2345 = vst [vmem:[%s556_s18] sm:$0x1] %v2343_v63 }
 0x8c4 PF: > { %s4599_s27 = sld [smem:[#allocation13_spill]]  ;;  %s4601_s25 = smov %s2913_s26 }
 0x8c5   : > { %s4600_s19 = sld [smem:[#allocation14_spill]] }
 0x8ca   : > { %p23_p12 = scmp.ge.s32.totalorder %s4599_s27, 4  }
 0x8cb   : > { %s4602_s26 = smov %s4600_s19 }
 0x8cc   :  { %25 = sbr.rel (!%p23_p12) target bundleno = 12 (0xc), region = 172 }
 0x8d1   :  { %2363 = vsyncpa [#allocation4], 1 }
 0x8d2   :  { %2365 = vsyncpa [#allocation4 + $0x1], 1 }
 0x8d3   :  { %2366 = vsyncpa [#allocation6], 1 }
 0x8d4   :  { %2367 = vsyncpa [#allocation9], 1 }

</bundles_post_ra>
